<compile_context>
chip_gen: v7x
topology: tpu7x:2x2x1
jax: 0.10.0
libtpu: 0.0.40
codegen_flags: <defaults>
</compile_context>

<pallas_src>
import functools

import jax
import jax.numpy as jnp
from jax import lax
from jax.experimental import pallas as pl
from jax.experimental.pallas import tpu as pltpu

_MIB = 1024 * 1024


def _round_up(x, m):
    return ((x + m - 1) // m) * m


def _cdiv(a, b):
    return -(-a // b)


# -----------------------------------------------------------------------------
# Fused kernel: time-gridded LSTM recurrence + projection epilogue.
#   Rows are time-major: row = t * BP + b.  Per grid step (one time block):
#     1) one big bf16 MXU matmul produces all input-gate contributions,
#     2) a short unrolled loop runs the recurrence with h/c in persistent VMEM,
#     3) one big bf16 MXU matmul projects the block's LSTM outputs to the
#        output block (masked past max(lengths)).
# -----------------------------------------------------------------------------
def lstm_proj_kernel(tmax_ref, lengths_ref, data_ref, wih_ref, whh_ref, bg_ref,
                     wproj_ref, bproj_ref, out_ref,
                     h_scr, c_scr, gx_scr, lo_scr,
                     *, t_tile, bp, hp, unroll):
    tb = pl.program_id(0)
    t_base = tb * t_tile

    @pl.when(tb == 0)
    def _init():
        h_scr[...] = jnp.zeros_like(h_scr)
        c_scr[...] = jnp.zeros_like(c_scr)

    # Hoisted input->gates matmul for the whole time block (bf16 operands, f32
    # accumulation), bias folded in once; stored bf16 to halve the dominant
    # VMEM scratch.
    gx_scr[...] = (
        jnp.dot(data_ref[...], wih_ref[...], preferred_element_type=jnp.float32)
        + bg_ref[...]).astype(jnp.bfloat16)

    lengths = lengths_ref[...]                          # (bp, 1) int32

    def step(i, carry):
        off = pl.multiple_of(i * bp, bp)                # bp-aligned (bp % 16 == 0)
        # Per-step critical path: small (bp, hp) x (hp, 4hp) recurrence matmul.
        gates = gx_scr[pl.ds(off, bp), :].astype(jnp.float32) + jnp.dot(
            h_scr[...].astype(jnp.bfloat16), whh_ref[...],
            preferred_element_type=jnp.float32)         # (bp, 4hp) f32

        # sigmoid(x) = 0.5*tanh(0.5*x) + 0.5 -> one EUP push per gate
        # (the EUP sits on the sequential per-step path).
        i_g = 0.5 * jnp.tanh(0.5 * gates[:, 0 * hp:1 * hp]) + 0.5
        f_g = 0.5 * jnp.tanh(0.5 * gates[:, 1 * hp:2 * hp]) + 0.5
        g_g = jnp.tanh(gates[:, 2 * hp:3 * hp])
        o_g = 0.5 * jnp.tanh(0.5 * gates[:, 3 * hp:4 * hp]) + 0.5

        h_prev = h_scr[...]
        c_prev = c_scr[...]
        c_new = f_g * c_prev + i_g * g_g
        h_new = o_g * jnp.tanh(c_new)

        # int32 compare; broadcast the validity mask once, reuse three times.
        valid = (t_base + i) < lengths                  # (bp, 1) bool
        valid_w = jnp.broadcast_to(valid, (bp, hp))
        h_scr[...] = jnp.where(valid_w, h_new, h_prev)
        c_scr[...] = jnp.where(valid_w, c_new, c_prev)
        # packed/padded LSTM output: zero past each sequence's length.
        lo_scr[pl.ds(off, bp), :] = jnp.where(valid_w, h_new, 0.0).astype(
            lo_scr.dtype)
        return carry

    lax.fori_loop(0, t_tile, step, 0, unroll=unroll)

    # Fused projection epilogue: one big bf16 matmul over the whole time block,
    # written directly to the output block (no lo HBM round-trip).
    proj = jnp.dot(lo_scr[...], wproj_ref[...],
                   preferred_element_type=jnp.float32) + bproj_ref[...]
    # row = i*bp + b : (row < (t_max - t_base)*bp)  <=>  (t_base + i < t_max)
    rows = lax.broadcasted_iota(jnp.int32, (t_tile * bp, 1), 0)
    mask = rows < (tmax_ref[0] - t_base) * bp
    out_ref[...] = jnp.where(mask, proj, 0.0)


def _pick_t_tile(T, BP, HP, DP, budget_bytes, t_tile_cap=None):
    """VMEM-budget-aware, balanced time tile (no degenerate-tile cliff)."""
    per_t = BP * (4 * HP * 2          # gx_scr, bf16
                  + HP * 2            # lo_scr, bf16
                  + 2 * DP * 2        # data block, double-buffered, bf16
                  + 2 * DP * 4)       # out block, double-buffered, f32
    fixed = (2 * 2 * (DP * 4 * HP + HP * 4 * HP + HP * DP)   # weights (bf16, worst-case 2x buffered)
             + 2 * BP * HP * 4                               # h, c scratch
             + 2 * (4 * HP + DP) * 4 + BP * 4)               # biases, lengths
    avail = max(budget_bytes - fixed, per_t)
    cap = max(1, min(avail // per_t, 64, T))
    if t_tile_cap is not None:
        cap = max(1, min(cap, t_tile_cap))
    n_blocks = _cdiv(T, cap)
    t_tile = _cdiv(T, n_blocks)
    est_bytes = fixed + per_t * t_tile
    return int(t_tile), int(n_blocks), int(est_bytes)


def rnn_layers_forward(data, non_pad_mask, params, *, t_tile_cap=None):
    """data: (B, T, d_model); non_pad_mask: (B, T, 1). Returns (B, T, d_model)."""
    B, T, D = data.shape
    w_ih, w_hh, b_ih, b_hh, w_proj, b_proj = params
    H = w_hh.shape[1]

    # Batch padded to a multiple of 16 so per-step dynamic row slices of the
    # packed bf16 scratches are tile-aligned.  HP/DP padded to 256 when large
    # enough to fill the v6e/v7x 256x256 MXU; 128 otherwise.
    BP = _round_up(max(B, 16), 16)
    HP = _round_up(H, 256 if H >= 256 else 128)
    DP = _round_up(D, 256 if D >= 256 else 128)

    try:
        vmem_cap = int(pltpu.get_tpu_info().vmem_capacity_bytes)
    except Exception:
        vmem_cap = 64 * _MIB          # assume the smallest per-core VMEM (v7x)
    budget = min(vmem_cap // 2, 40 * _MIB)

    t_tile, n_blocks, est_bytes = _pick_t_tile(T, BP, HP, DP, budget, t_tile_cap)
    T_pad = t_tile * n_blocks
    vmem_limit = int(max(min(vmem_cap, est_bytes + 8 * _MIB), 16 * _MIB))
    unroll = min(t_tile, 8)

    # ---- weight repack: each gate occupies a contiguous, lane-aligned HP slab
    def pack_gate_weight(w, in_dim, in_pad):
        # w: (4*H, in_dim), torch gate order (i, f, g, o) -> (in_pad, 4*HP) bf16
        wg = jnp.transpose(w.reshape(4, H, in_dim), (0, 2, 1))       # (4, in, H)
        wg = jnp.pad(wg, ((0, 0), (0, in_pad - in_dim), (0, HP - H)))
        wg = jnp.transpose(wg, (1, 0, 2)).reshape(in_pad, 4 * HP)
        return wg.astype(jnp.bfloat16)

    wih_p = pack_gate_weight(w_ih, D, DP)                            # (DP, 4HP)
    whh_p = pack_gate_weight(w_hh, H, HP)                            # (HP, 4HP)
    bg = jnp.pad((b_ih + b_hh).reshape(4, H), ((0, 0), (0, HP - H)))
    bg = bg.reshape(1, 4 * HP).astype(jnp.float32)
    wproj_p = jnp.pad(jnp.transpose(w_proj),
                      ((0, HP - H), (0, DP - D))).astype(jnp.bfloat16)  # (HP, DP)
    bproj_p = jnp.pad(b_proj, (0, DP - D)).reshape(1, DP).astype(jnp.float32)

    # ---- activations: time-major 2D rows (row = t*BP + b), T padded ----
    lengths_i = jnp.sum(non_pad_mask[..., 0].astype(jnp.int32), axis=1)  # (B,)
    t_max = jnp.max(lengths_i).reshape(1).astype(jnp.int32)
    lengths2d = jnp.pad(lengths_i, (0, BP - B)).reshape(BP, 1).astype(jnp.int32)

    data_t = jnp.transpose(data, (1, 0, 2))                          # (T, B, D)
    data_t = jnp.pad(data_t, ((0, T_pad - T), (0, BP - B), (0, DP - D)))
    data2d = data_t.reshape(T_pad * BP, DP).astype(jnp.bfloat16)

    kernel = functools.partial(lstm_proj_kernel, t_tile=t_tile, bp=BP, hp=HP,
                               unroll=unroll)
    out_shape = jax.ShapeDtypeStruct((T_pad * BP, DP), jnp.float32)
    scratch = [
        pltpu.VMEM((BP, HP), jnp.float32),                 # h state
        pltpu.VMEM((BP, HP), jnp.float32),                 # c state
        pltpu.VMEM((t_tile * BP, 4 * HP), jnp.bfloat16),   # hoisted gates_x
        pltpu.VMEM((t_tile * BP, HP), jnp.bfloat16),       # block LSTM outputs
    ]

    def build_call(single_buffer_weights):
        extra = {}
        if single_buffer_weights and hasattr(pl, "Buffered"):
            extra = dict(pipeline_mode=pl.Buffered(1))

        def const2d(shape):
            # Constant-index (grid-resident) operand: request single-buffering.
            return pl.BlockSpec(shape, lambda tb, tmax: (0, 0), **extra)

        grid_spec = pltpu.PrefetchScalarGridSpec(
            num_scalar_prefetch=1,
            grid=(n_blocks,),
            in_specs=[
                const2d((BP, 1)),                                          # lengths
                pl.BlockSpec((t_tile * BP, DP), lambda tb, tmax: (tb, 0)),  # data rows
                const2d((DP, 4 * HP)),                                     # W_ih
                const2d((HP, 4 * HP)),                                     # W_hh
                const2d((1, 4 * HP)),                                      # gate bias
                const2d((HP, DP)),                                         # W_proj
                const2d((1, DP)),                                          # b_proj
            ],
            out_specs=pl.BlockSpec((t_tile * BP, DP), lambda tb, tmax: (tb, 0)),
            scratch_shapes=scratch,
        )
        return pl.pallas_call(
            kernel,
            out_shape=out_shape,
            grid_spec=grid_spec,
            compiler_params=pltpu.CompilerParams(
                dimension_semantics=("arbitrary",),
                vmem_limit_bytes=vmem_limit),
        )

    args = (t_max, lengths2d, data2d, wih_p, whh_p, bg, wproj_p, bproj_p)
    try:
        out2d = build_call(True)(*args)
    except Exception:
        # Fallback if this JAX build rejects pipeline_mode=pl.Buffered(1).
        out2d = build_call(False)(*args)

    out = out2d.reshape(T_pad, BP, DP)[:T, :B, :D]
    return jnp.transpose(out, (1, 0, 2))


def rnn_layers_reference(data, non_pad_mask, params):
    """Pure-JAX f32 reference reproducing the PyTorch module semantics."""
    w_ih, w_hh, b_ih, b_hh, w_proj, b_proj = params
    B, T, D = data.shape
    H = w_hh.shape[1]
    lengths = jnp.sum(non_pad_mask[..., 0], axis=1)                  # (B,)
    t_max = jnp.max(lengths)

    def step(carry, x_t_and_t):
        h, c = carry
        x_t, t = x_t_and_t
        gates = x_t @ w_ih.T + b_ih + h @ w_hh.T + b_hh
        i_g = jax.nn.sigmoid(gates[:, 0 * H:1 * H])
        f_g = jax.nn.sigmoid(gates[:, 1 * H:2 * H])
        g_g = jnp.tanh(gates[:, 2 * H:3 * H])
        o_g = jax.nn.sigmoid(gates[:, 3 * H:4 * H])
        c_new = f_g * c + i_g * g_g
        h_new = o_g * jnp.tanh(c_new)
        valid = (t < lengths)[:, None]
        h = jnp.where(valid, h_new, h)
        c = jnp.where(valid, c_new, c)
        out_t = jnp.where(valid, h_new, 0.0)
        return (h, c), out_t

    x_tbd = jnp.transpose(data, (1, 0, 2))
    (_, _), lo = lax.scan(step, (jnp.zeros((B, H)), jnp.zeros((B, H))),
                          (x_tbd, jnp.arange(T, dtype=jnp.float32)))
    lo = jnp.transpose(lo, (1, 0, 2))                                # (B, T, H)
    out = lo @ w_proj.T + b_proj
    t_idx = jnp.arange(T, dtype=jnp.float32)[None, :, None]
    return jnp.where(t_idx < t_max, out, 0.0)


if __name__ == "__main__":
    B, T = 2, 10
    d_model, d_rnn = 32, 32

    key = jax.random.PRNGKey(0)
    k = jax.random.split(key, 8)

    data = jax.random.normal(k[0], (B, T, d_model), dtype=jnp.float32)
    # lengths [7, 4]: valid positions contiguous from the start
    lengths = jnp.array([7, 4], dtype=jnp.int32)
    non_pad_mask = (jnp.arange(T)[None, :] < lengths[:, None]).astype(
        jnp.float32)[..., None]                                      # (B, T, 1)

    scale = 0.2
    w_ih = scale * jax.random.normal(k[1], (4 * d_rnn, d_model), dtype=jnp.float32)
    w_hh = scale * jax.random.normal(k[2], (4 * d_rnn, d_rnn), dtype=jnp.float32)
    b_ih = scale * jax.random.normal(k[3], (4 * d_rnn,), dtype=jnp.float32)
    b_hh = scale * jax.random.normal(k[4], (4 * d_rnn,), dtype=jnp.float32)
    w_proj = scale * jax.random.normal(k[5], (d_model, d_rnn), dtype=jnp.float32)
    b_proj = scale * jax.random.normal(k[6], (d_model,), dtype=jnp.float32)
    params = (w_ih, w_hh, b_ih, b_hh, w_proj, b_proj)

    # t_tile_cap=4 forces a multi-block time grid (with a padded tail) even at
    # this tiny size, exercising the carried h/c scratch and the tail masking.
    out = rnn_layers_forward(data, non_pad_mask, params, t_tile_cap=4)
    jax.block_until_ready(out)

    ref = rnn_layers_reference(data, non_pad_mask, params)
    assert out.shape == (B, T, d_model)
    # bf16 MXU operands / bf16 gate scratch (f32 accumulation & state) =>
    # tolerance loosened vs the f32 reference.
    assert jnp.allclose(out, ref, atol=5e-2, rtol=5e-2), "mismatch vs reference"

    print("KERNEL_OK")
</pallas_src>

<mosaic_0001>
module attributes {stable_mosaic.version = 11 : i64} {
  func.func @lstm_proj_kernel(%arg0: i32, %arg1: memref<1xi32, #tpu.memory_space<smem>>, %arg2: memref<16x1xi32, #tpu.memory_space<vmem>>, %arg3: memref<64x128xbf16, #tpu.memory_space<vmem>>, %arg4: memref<128x512xbf16, #tpu.memory_space<vmem>>, %arg5: memref<128x512xbf16, #tpu.memory_space<vmem>>, %arg6: memref<1x512xf32, #tpu.memory_space<vmem>>, %arg7: memref<128x128xbf16, #tpu.memory_space<vmem>>, %arg8: memref<1x128xf32, #tpu.memory_space<vmem>>, %arg9: memref<64x128xf32, #tpu.memory_space<vmem>>, %arg10: memref<16x128xf32, #tpu.memory_space<vmem>>, %arg11: memref<16x128xf32, #tpu.memory_space<vmem>>, %arg12: memref<64x512xbf16, #tpu.memory_space<vmem>>, %arg13: memref<64x128xbf16, #tpu.memory_space<vmem>>) attributes {dimension_semantics = [#tpu.dimension_semantics<arbitrary>], iteration_bounds = array<i64: 3>, scalar_prefetch = 1 : i64, scratch_operands = 4 : i64, tpu.core_type = #tpu.core_type<tc>, window_params = [{pipeline_mode = #tpu.pipeline_mode<synchronous>, transform_indices = @transform_0, window_bounds = array<i64: 16, 1>}, {transform_indices = @transform_1, window_bounds = array<i64: 64, 128>}, {pipeline_mode = #tpu.pipeline_mode<synchronous>, transform_indices = @transform_2, window_bounds = array<i64: 128, 512>}, {pipeline_mode = #tpu.pipeline_mode<synchronous>, transform_indices = @transform_3, window_bounds = array<i64: 128, 512>}, {pipeline_mode = #tpu.pipeline_mode<synchronous>, transform_indices = @transform_4, window_bounds = array<i64: 1, 512>}, {pipeline_mode = #tpu.pipeline_mode<synchronous>, transform_indices = @transform_5, window_bounds = array<i64: 128, 128>}, {pipeline_mode = #tpu.pipeline_mode<synchronous>, transform_indices = @transform_6, window_bounds = array<i64: 1, 128>}, {transform_indices = @transform_7, window_bounds = array<i64: 64, 128>}]} {
    %c4_i32 = arith.constant 4 : i32
    %0 = arith.muli %arg0, %c4_i32 : i32
    %c0_i32 = arith.constant 0 : i32
    %1 = arith.cmpi eq, %arg0, %c0_i32 : i32
    %2 = arith.extui %1 : i1 to i32
    %c0_i32_0 = arith.constant 0 : i32
    %3 = arith.cmpi ne, %2, %c0_i32_0 : i32
    scf.if %3 {
      %cst_127 = arith.constant 0.000000e+00 : f32
      %258 = vector.broadcast %cst_127 : f32 to vector<16x128xf32>
      %c0_128 = arith.constant 0 : index
      %c0_129 = arith.constant 0 : index
      %259 = vector.load %arg10[%c0_128, %c0_129] : memref<16x128xf32, #tpu.memory_space<vmem>>, vector<16x128xf32>
      tpu.vector_store %arg10[%c0_128, %c0_129], %258 {strides = array<i32>} : memref<16x128xf32, #tpu.memory_space<vmem>>, vector<16x128xf32>,
      %cst_130 = arith.constant 0.000000e+00 : f32
      %260 = vector.broadcast %cst_130 : f32 to vector<16x128xf32>
      %c0_131 = arith.constant 0 : index
      %c0_132 = arith.constant 0 : index
      %261 = vector.load %arg11[%c0_131, %c0_132] : memref<16x128xf32, #tpu.memory_space<vmem>>, vector<16x128xf32>
      tpu.vector_store %arg11[%c0_131, %c0_132], %260 {strides = array<i32>} : memref<16x128xf32, #tpu.memory_space<vmem>>, vector<16x128xf32>,
    } else {
    }
    %c0 = arith.constant 0 : index
    %c0_1 = arith.constant 0 : index
    %4 = vector.load %arg3[%c0, %c0_1] : memref<64x128xbf16, #tpu.memory_space<vmem>>, vector<64x128xbf16>
    %c0_2 = arith.constant 0 : index
    %c0_3 = arith.constant 0 : index
    %5 = vector.load %arg4[%c0_2, %c0_3] : memref<128x512xbf16, #tpu.memory_space<vmem>>, vector<128x512xbf16>
    %cst = arith.constant dense<0.000000e+00> : vector<64x512xf32>
    %6 = tpu.matmul %4, %5, %cst {dimension_numbers = #tpu.dot_dimension_numbers<[1], [0], [0], [1], [0, 0, 1, 1], [], []>} : vector<64x128xbf16>, vector<128x512xbf16>, vector<64x512xf32> -> vector<64x512xf32>
    %c0_4 = arith.constant 0 : index
    %c0_5 = arith.constant 0 : index
    %7 = vector.load %arg6[%c0_4, %c0_5] : memref<1x512xf32, #tpu.memory_space<vmem>>, vector<1x512xf32>
    %8 = vector.broadcast %7 : vector<1x512xf32> to vector<64x512xf32>
    %9 = arith.addf %6, %8 : vector<64x512xf32>
    %10 = arith.truncf %9 : vector<64x512xf32> to vector<64x512xbf16>
    %c0_6 = arith.constant 0 : index
    %c0_7 = arith.constant 0 : index
    %11 = vector.load %arg12[%c0_6, %c0_7] : memref<64x512xbf16, #tpu.memory_space<vmem>>, vector<64x512xbf16>
    tpu.vector_store %arg12[%c0_6, %c0_7], %10 {strides = array<i32>} : memref<64x512xbf16, #tpu.memory_space<vmem>>, vector<64x512xbf16>,
    %c0_8 = arith.constant 0 : index
    %c0_9 = arith.constant 0 : index
    %12 = vector.load %arg2[%c0_8, %c0_9] : memref<16x1xi32, #tpu.memory_space<vmem>>, vector<16x1xi32>
    %c0_i32_10 = arith.constant 0 : i32
    %c16_i32 = arith.constant 16 : i32
    %13 = arith.muli %c0_i32_10, %c16_i32 : i32
    %14 = tpu.assume_multiple %13, 16 : i32
    %15 = arith.index_cast %14 : i32 to index
    %c0_11 = arith.constant 0 : index
    %16 = vector.load %arg12[%15, %c0_11] : memref<64x512xbf16, #tpu.memory_space<vmem>>, vector<16x512xbf16>
    %17 = arith.extf %16 : vector<16x512xbf16> to vector<16x512xf32>
    %c0_12 = arith.constant 0 : index
    %c0_13 = arith.constant 0 : index
    %18 = vector.load %arg10[%c0_12, %c0_13] : memref<16x128xf32, #tpu.memory_space<vmem>>, vector<16x128xf32>
    %19 = arith.truncf %18 : vector<16x128xf32> to vector<16x128xbf16>
    %c0_14 = arith.constant 0 : index
    %c0_15 = arith.constant 0 : index
    %20 = vector.load %arg5[%c0_14, %c0_15] : memref<128x512xbf16, #tpu.memory_space<vmem>>, vector<128x512xbf16>
    %cst_16 = arith.constant dense<0.000000e+00> : vector<16x512xf32>
    %21 = tpu.matmul %19, %20, %cst_16 {dimension_numbers = #tpu.dot_dimension_numbers<[1], [0], [0], [1], [0, 0, 1, 1], [], []>} : vector<16x128xbf16>, vector<128x512xbf16>, vector<16x512xf32> -> vector<16x512xf32>
    %22 = arith.addf %17, %21 : vector<16x512xf32>
    %23 = vector.extract_strided_slice %22 {offsets = [0, 0], sizes = [16, 128], strides = [1, 1]} : vector<16x512xf32> to vector<16x128xf32>
    %cst_17 = arith.constant 5.000000e-01 : f32
    %24 = vector.broadcast %cst_17 : f32 to vector<16x128xf32>
    %25 = arith.mulf %24, %23 : vector<16x128xf32>
    %26 = math.tanh %25 : vector<16x128xf32>
    %cst_18 = arith.constant 5.000000e-01 : f32
    %27 = vector.broadcast %cst_18 : f32 to vector<16x128xf32>
    %28 = arith.mulf %27, %26 : vector<16x128xf32>
    %cst_19 = arith.constant 5.000000e-01 : f32
    %29 = vector.broadcast %cst_19 : f32 to vector<16x128xf32>
    %30 = arith.addf %28, %29 : vector<16x128xf32>
    %31 = vector.extract_strided_slice %22 {offsets = [0, 128], sizes = [16, 128], strides = [1, 1]} : vector<16x512xf32> to vector<16x128xf32>
    %cst_20 = arith.constant 5.000000e-01 : f32
    %32 = vector.broadcast %cst_20 : f32 to vector<16x128xf32>
    %33 = arith.mulf %32, %31 : vector<16x128xf32>
    %34 = math.tanh %33 : vector<16x128xf32>
    %cst_21 = arith.constant 5.000000e-01 : f32
    %35 = vector.broadcast %cst_21 : f32 to vector<16x128xf32>
    %36 = arith.mulf %35, %34 : vector<16x128xf32>
    %cst_22 = arith.constant 5.000000e-01 : f32
    %37 = vector.broadcast %cst_22 : f32 to vector<16x128xf32>
    %38 = arith.addf %36, %37 : vector<16x128xf32>
    %39 = vector.extract_strided_slice %22 {offsets = [0, 256], sizes = [16, 128], strides = [1, 1]} : vector<16x512xf32> to vector<16x128xf32>
    %40 = math.tanh %39 : vector<16x128xf32>
    %41 = vector.extract_strided_slice %22 {offsets = [0, 384], sizes = [16, 128], strides = [1, 1]} : vector<16x512xf32> to vector<16x128xf32>
    %cst_23 = arith.constant 5.000000e-01 : f32
    %42 = vector.broadcast %cst_23 : f32 to vector<16x128xf32>
    %43 = arith.mulf %42, %41 : vector<16x128xf32>
    %44 = math.tanh %43 : vector<16x128xf32>
    %cst_24 = arith.constant 5.000000e-01 : f32
    %45 = vector.broadcast %cst_24 : f32 to vector<16x128xf32>
    %46 = arith.mulf %45, %44 : vector<16x128xf32>
    %cst_25 = arith.constant 5.000000e-01 : f32
    %47 = vector.broadcast %cst_25 : f32 to vector<16x128xf32>
    %48 = arith.addf %46, %47 : vector<16x128xf32>
    %c0_26 = arith.constant 0 : index
    %c0_27 = arith.constant 0 : index
    %49 = vector.load %arg10[%c0_26, %c0_27] : memref<16x128xf32, #tpu.memory_space<vmem>>, vector<16x128xf32>
    %c0_28 = arith.constant 0 : index
    %c0_29 = arith.constant 0 : index
    %50 = vector.load %arg11[%c0_28, %c0_29] : memref<16x128xf32, #tpu.memory_space<vmem>>, vector<16x128xf32>
    %51 = arith.mulf %38, %50 : vector<16x128xf32>
    %52 = arith.mulf %30, %40 : vector<16x128xf32>
    %53 = arith.addf %51, %52 : vector<16x128xf32>
    %54 = math.tanh %53 : vector<16x128xf32>
    %55 = arith.mulf %48, %54 : vector<16x128xf32>
    %56 = arith.addi %0, %c0_i32_10 : i32
    %57 = vector.broadcast %56 : i32 to vector<16x1xi32>
    %58 = arith.cmpi slt, %57, %12 : vector<16x1xi32>
    %59 = vector.shape_cast %58 : vector<16x1xi1> to vector<16x1xi1>
    %60 = vector.broadcast %59 : vector<16x1xi1> to vector<16x128xi1>
    %61 = arith.select %60, %55, %49 : vector<16x128xi1>, vector<16x128xf32>
    %c0_30 = arith.constant 0 : index
    %c0_31 = arith.constant 0 : index
    %62 = vector.load %arg10[%c0_30, %c0_31] : memref<16x128xf32, #tpu.memory_space<vmem>>, vector<16x128xf32>
    tpu.vector_store %arg10[%c0_30, %c0_31], %61 {strides = array<i32>} : memref<16x128xf32, #tpu.memory_space<vmem>>, vector<16x128xf32>,
    %63 = arith.select %60, %53, %50 : vector<16x128xi1>, vector<16x128xf32>
    %c0_32 = arith.constant 0 : index
    %c0_33 = arith.constant 0 : index
    %64 = vector.load %arg11[%c0_32, %c0_33] : memref<16x128xf32, #tpu.memory_space<vmem>>, vector<16x128xf32>
    tpu.vector_store %arg11[%c0_32, %c0_33], %63 {strides = array<i32>} : memref<16x128xf32, #tpu.memory_space<vmem>>, vector<16x128xf32>,
    %cst_34 = arith.constant 0.000000e+00 : f32
    %65 = vector.broadcast %cst_34 : f32 to vector<16x128xf32>
    %66 = arith.select %60, %55, %65 : vector<16x128xi1>, vector<16x128xf32>
    %67 = arith.truncf %66 : vector<16x128xf32> to vector<16x128xbf16>
    %68 = arith.index_cast %14 : i32 to index
    %c0_35 = arith.constant 0 : index
    %69 = vector.load %arg13[%68, %c0_35] : memref<64x128xbf16, #tpu.memory_space<vmem>>, vector<16x128xbf16>
    tpu.vector_store %arg13[%68, %c0_35], %67 {strides = array<i32>} : memref<64x128xbf16, #tpu.memory_space<vmem>>, vector<16x128xbf16>,
    %c1_i32 = arith.constant 1 : i32
    %c16_i32_36 = arith.constant 16 : i32
    %70 = arith.muli %c1_i32, %c16_i32_36 : i32
    %71 = tpu.assume_multiple %70, 16 : i32
    %72 = arith.index_cast %71 : i32 to index
    %c0_37 = arith.constant 0 : index
    %73 = vector.load %arg12[%72, %c0_37] : memref<64x512xbf16, #tpu.memory_space<vmem>>, vector<16x512xbf16>
    %74 = arith.extf %73 : vector<16x512xbf16> to vector<16x512xf32>
    %c0_38 = arith.constant 0 : index
    %c0_39 = arith.constant 0 : index
    %75 = vector.load %arg10[%c0_38, %c0_39] : memref<16x128xf32, #tpu.memory_space<vmem>>, vector<16x128xf32>
    %76 = arith.truncf %75 : vector<16x128xf32> to vector<16x128xbf16>
    %c0_40 = arith.constant 0 : index
    %c0_41 = arith.constant 0 : index
    %77 = vector.load %arg5[%c0_40, %c0_41] : memref<128x512xbf16, #tpu.memory_space<vmem>>, vector<128x512xbf16>
    %cst_42 = arith.constant dense<0.000000e+00> : vector<16x512xf32>
    %78 = tpu.matmul %76, %77, %cst_42 {dimension_numbers = #tpu.dot_dimension_numbers<[1], [0], [0], [1], [0, 0, 1, 1], [], []>} : vector<16x128xbf16>, vector<128x512xbf16>, vector<16x512xf32> -> vector<16x512xf32>
    %79 = arith.addf %74, %78 : vector<16x512xf32>
    %80 = vector.extract_strided_slice %79 {offsets = [0, 0], sizes = [16, 128], strides = [1, 1]} : vector<16x512xf32> to vector<16x128xf32>
    %cst_43 = arith.constant 5.000000e-01 : f32
    %81 = vector.broadcast %cst_43 : f32 to vector<16x128xf32>
    %82 = arith.mulf %81, %80 : vector<16x128xf32>
    %83 = math.tanh %82 : vector<16x128xf32>
    %cst_44 = arith.constant 5.000000e-01 : f32
    %84 = vector.broadcast %cst_44 : f32 to vector<16x128xf32>
    %85 = arith.mulf %84, %83 : vector<16x128xf32>
    %cst_45 = arith.constant 5.000000e-01 : f32
    %86 = vector.broadcast %cst_45 : f32 to vector<16x128xf32>
    %87 = arith.addf %85, %86 : vector<16x128xf32>
    %88 = vector.extract_strided_slice %79 {offsets = [0, 128], sizes = [16, 128], strides = [1, 1]} : vector<16x512xf32> to vector<16x128xf32>
    %cst_46 = arith.constant 5.000000e-01 : f32
    %89 = vector.broadcast %cst_46 : f32 to vector<16x128xf32>
    %90 = arith.mulf %89, %88 : vector<16x128xf32>
    %91 = math.tanh %90 : vector<16x128xf32>
    %cst_47 = arith.constant 5.000000e-01 : f32
    %92 = vector.broadcast %cst_47 : f32 to vector<16x128xf32>
    %93 = arith.mulf %92, %91 : vector<16x128xf32>
    %cst_48 = arith.constant 5.000000e-01 : f32
    %94 = vector.broadcast %cst_48 : f32 to vector<16x128xf32>
    %95 = arith.addf %93, %94 : vector<16x128xf32>
    %96 = vector.extract_strided_slice %79 {offsets = [0, 256], sizes = [16, 128], strides = [1, 1]} : vector<16x512xf32> to vector<16x128xf32>
    %97 = math.tanh %96 : vector<16x128xf32>
    %98 = vector.extract_strided_slice %79 {offsets = [0, 384], sizes = [16, 128], strides = [1, 1]} : vector<16x512xf32> to vector<16x128xf32>
    %cst_49 = arith.constant 5.000000e-01 : f32
    %99 = vector.broadcast %cst_49 : f32 to vector<16x128xf32>
    %100 = arith.mulf %99, %98 : vector<16x128xf32>
    %101 = math.tanh %100 : vector<16x128xf32>
    %cst_50 = arith.constant 5.000000e-01 : f32
    %102 = vector.broadcast %cst_50 : f32 to vector<16x128xf32>
    %103 = arith.mulf %102, %101 : vector<16x128xf32>
    %cst_51 = arith.constant 5.000000e-01 : f32
    %104 = vector.broadcast %cst_51 : f32 to vector<16x128xf32>
    %105 = arith.addf %103, %104 : vector<16x128xf32>
    %c0_52 = arith.constant 0 : index
    %c0_53 = arith.constant 0 : index
    %106 = vector.load %arg10[%c0_52, %c0_53] : memref<16x128xf32, #tpu.memory_space<vmem>>, vector<16x128xf32>
    %c0_54 = arith.constant 0 : index
    %c0_55 = arith.constant 0 : index
    %107 = vector.load %arg11[%c0_54, %c0_55] : memref<16x128xf32, #tpu.memory_space<vmem>>, vector<16x128xf32>
    %108 = arith.mulf %95, %107 : vector<16x128xf32>
    %109 = arith.mulf %87, %97 : vector<16x128xf32>
    %110 = arith.addf %108, %109 : vector<16x128xf32>
    %111 = math.tanh %110 : vector<16x128xf32>
    %112 = arith.mulf %105, %111 : vector<16x128xf32>
    %113 = arith.addi %0, %c1_i32 : i32
    %114 = vector.broadcast %113 : i32 to vector<16x1xi32>
    %115 = arith.cmpi slt, %114, %12 : vector<16x1xi32>
    %116 = vector.shape_cast %115 : vector<16x1xi1> to vector<16x1xi1>
    %117 = vector.broadcast %116 : vector<16x1xi1> to vector<16x128xi1>
    %118 = arith.select %117, %112, %106 : vector<16x128xi1>, vector<16x128xf32>
    %c0_56 = arith.constant 0 : index
    %c0_57 = arith.constant 0 : index
    %119 = vector.load %arg10[%c0_56, %c0_57] : memref<16x128xf32, #tpu.memory_space<vmem>>, vector<16x128xf32>
    tpu.vector_store %arg10[%c0_56, %c0_57], %118 {strides = array<i32>} : memref<16x128xf32, #tpu.memory_space<vmem>>, vector<16x128xf32>,
    %120 = arith.select %117, %110, %107 : vector<16x128xi1>, vector<16x128xf32>
    %c0_58 = arith.constant 0 : index
    %c0_59 = arith.constant 0 : index
    %121 = vector.load %arg11[%c0_58, %c0_59] : memref<16x128xf32, #tpu.memory_space<vmem>>, vector<16x128xf32>
    tpu.vector_store %arg11[%c0_58, %c0_59], %120 {strides = array<i32>} : memref<16x128xf32, #tpu.memory_space<vmem>>, vector<16x128xf32>,
    %cst_60 = arith.constant 0.000000e+00 : f32
    %122 = vector.broadcast %cst_60 : f32 to vector<16x128xf32>
    %123 = arith.select %117, %112, %122 : vector<16x128xi1>, vector<16x128xf32>
    %124 = arith.truncf %123 : vector<16x128xf32> to vector<16x128xbf16>
    %125 = arith.index_cast %71 : i32 to index
    %c0_61 = arith.constant 0 : index
    %126 = vector.load %arg13[%125, %c0_61] : memref<64x128xbf16, #tpu.memory_space<vmem>>, vector<16x128xbf16>
    tpu.vector_store %arg13[%125, %c0_61], %124 {strides = array<i32>} : memref<64x128xbf16, #tpu.memory_space<vmem>>, vector<16x128xbf16>,
    %c2_i32 = arith.constant 2 : i32
    %c16_i32_62 = arith.constant 16 : i32
    %127 = arith.muli %c2_i32, %c16_i32_62 : i32
    %128 = tpu.assume_multiple %127, 16 : i32
    %129 = arith.index_cast %128 : i32 to index
    %c0_63 = arith.constant 0 : index
    %130 = vector.load %arg12[%129, %c0_63] : memref<64x512xbf16, #tpu.memory_space<vmem>>, vector<16x512xbf16>
    %131 = arith.extf %130 : vector<16x512xbf16> to vector<16x512xf32>
    %c0_64 = arith.constant 0 : index
    %c0_65 = arith.constant 0 : index
    %132 = vector.load %arg10[%c0_64, %c0_65] : memref<16x128xf32, #tpu.memory_space<vmem>>, vector<16x128xf32>
    %133 = arith.truncf %132 : vector<16x128xf32> to vector<16x128xbf16>
    %c0_66 = arith.constant 0 : index
    %c0_67 = arith.constant 0 : index
    %134 = vector.load %arg5[%c0_66, %c0_67] : memref<128x512xbf16, #tpu.memory_space<vmem>>, vector<128x512xbf16>
    %cst_68 = arith.constant dense<0.000000e+00> : vector<16x512xf32>
    %135 = tpu.matmul %133, %134, %cst_68 {dimension_numbers = #tpu.dot_dimension_numbers<[1], [0], [0], [1], [0, 0, 1, 1], [], []>} : vector<16x128xbf16>, vector<128x512xbf16>, vector<16x512xf32> -> vector<16x512xf32>
    %136 = arith.addf %131, %135 : vector<16x512xf32>
    %137 = vector.extract_strided_slice %136 {offsets = [0, 0], sizes = [16, 128], strides = [1, 1]} : vector<16x512xf32> to vector<16x128xf32>
    %cst_69 = arith.constant 5.000000e-01 : f32
    %138 = vector.broadcast %cst_69 : f32 to vector<16x128xf32>
    %139 = arith.mulf %138, %137 : vector<16x128xf32>
    %140 = math.tanh %139 : vector<16x128xf32>
    %cst_70 = arith.constant 5.000000e-01 : f32
    %141 = vector.broadcast %cst_70 : f32 to vector<16x128xf32>
    %142 = arith.mulf %141, %140 : vector<16x128xf32>
    %cst_71 = arith.constant 5.000000e-01 : f32
    %143 = vector.broadcast %cst_71 : f32 to vector<16x128xf32>
    %144 = arith.addf %142, %143 : vector<16x128xf32>
    %145 = vector.extract_strided_slice %136 {offsets = [0, 128], sizes = [16, 128], strides = [1, 1]} : vector<16x512xf32> to vector<16x128xf32>
    %cst_72 = arith.constant 5.000000e-01 : f32
    %146 = vector.broadcast %cst_72 : f32 to vector<16x128xf32>
    %147 = arith.mulf %146, %145 : vector<16x128xf32>
    %148 = math.tanh %147 : vector<16x128xf32>
    %cst_73 = arith.constant 5.000000e-01 : f32
    %149 = vector.broadcast %cst_73 : f32 to vector<16x128xf32>
    %150 = arith.mulf %149, %148 : vector<16x128xf32>
    %cst_74 = arith.constant 5.000000e-01 : f32
    %151 = vector.broadcast %cst_74 : f32 to vector<16x128xf32>
    %152 = arith.addf %150, %151 : vector<16x128xf32>
    %153 = vector.extract_strided_slice %136 {offsets = [0, 256], sizes = [16, 128], strides = [1, 1]} : vector<16x512xf32> to vector<16x128xf32>
    %154 = math.tanh %153 : vector<16x128xf32>
    %155 = vector.extract_strided_slice %136 {offsets = [0, 384], sizes = [16, 128], strides = [1, 1]} : vector<16x512xf32> to vector<16x128xf32>
    %cst_75 = arith.constant 5.000000e-01 : f32
    %156 = vector.broadcast %cst_75 : f32 to vector<16x128xf32>
    %157 = arith.mulf %156, %155 : vector<16x128xf32>
    %158 = math.tanh %157 : vector<16x128xf32>
    %cst_76 = arith.constant 5.000000e-01 : f32
    %159 = vector.broadcast %cst_76 : f32 to vector<16x128xf32>
    %160 = arith.mulf %159, %158 : vector<16x128xf32>
    %cst_77 = arith.constant 5.000000e-01 : f32
    %161 = vector.broadcast %cst_77 : f32 to vector<16x128xf32>
    %162 = arith.addf %160, %161 : vector<16x128xf32>
    %c0_78 = arith.constant 0 : index
    %c0_79 = arith.constant 0 : index
    %163 = vector.load %arg10[%c0_78, %c0_79] : memref<16x128xf32, #tpu.memory_space<vmem>>, vector<16x128xf32>
    %c0_80 = arith.constant 0 : index
    %c0_81 = arith.constant 0 : index
    %164 = vector.load %arg11[%c0_80, %c0_81] : memref<16x128xf32, #tpu.memory_space<vmem>>, vector<16x128xf32>
    %165 = arith.mulf %152, %164 : vector<16x128xf32>
    %166 = arith.mulf %144, %154 : vector<16x128xf32>
    %167 = arith.addf %165, %166 : vector<16x128xf32>
    %168 = math.tanh %167 : vector<16x128xf32>
    %169 = arith.mulf %162, %168 : vector<16x128xf32>
    %170 = arith.addi %0, %c2_i32 : i32
    %171 = vector.broadcast %170 : i32 to vector<16x1xi32>
    %172 = arith.cmpi slt, %171, %12 : vector<16x1xi32>
    %173 = vector.shape_cast %172 : vector<16x1xi1> to vector<16x1xi1>
    %174 = vector.broadcast %173 : vector<16x1xi1> to vector<16x128xi1>
    %175 = arith.select %174, %169, %163 : vector<16x128xi1>, vector<16x128xf32>
    %c0_82 = arith.constant 0 : index
    %c0_83 = arith.constant 0 : index
    %176 = vector.load %arg10[%c0_82, %c0_83] : memref<16x128xf32, #tpu.memory_space<vmem>>, vector<16x128xf32>
    tpu.vector_store %arg10[%c0_82, %c0_83], %175 {strides = array<i32>} : memref<16x128xf32, #tpu.memory_space<vmem>>, vector<16x128xf32>,
    %177 = arith.select %174, %167, %164 : vector<16x128xi1>, vector<16x128xf32>
    %c0_84 = arith.constant 0 : index
    %c0_85 = arith.constant 0 : index
    %178 = vector.load %arg11[%c0_84, %c0_85] : memref<16x128xf32, #tpu.memory_space<vmem>>, vector<16x128xf32>
    tpu.vector_store %arg11[%c0_84, %c0_85], %177 {strides = array<i32>} : memref<16x128xf32, #tpu.memory_space<vmem>>, vector<16x128xf32>,
    %cst_86 = arith.constant 0.000000e+00 : f32
    %179 = vector.broadcast %cst_86 : f32 to vector<16x128xf32>
    %180 = arith.select %174, %169, %179 : vector<16x128xi1>, vector<16x128xf32>
    %181 = arith.truncf %180 : vector<16x128xf32> to vector<16x128xbf16>
    %182 = arith.index_cast %128 : i32 to index
    %c0_87 = arith.constant 0 : index
    %183 = vector.load %arg13[%182, %c0_87] : memref<64x128xbf16, #tpu.memory_space<vmem>>, vector<16x128xbf16>
    tpu.vector_store %arg13[%182, %c0_87], %181 {strides = array<i32>} : memref<64x128xbf16, #tpu.memory_space<vmem>>, vector<16x128xbf16>,
    %c3_i32 = arith.constant 3 : i32
    %c16_i32_88 = arith.constant 16 : i32
    %184 = arith.muli %c3_i32, %c16_i32_88 : i32
    %185 = tpu.assume_multiple %184, 16 : i32
    %186 = arith.index_cast %185 : i32 to index
    %c0_89 = arith.constant 0 : index
    %187 = vector.load %arg12[%186, %c0_89] : memref<64x512xbf16, #tpu.memory_space<vmem>>, vector<16x512xbf16>
    %188 = arith.extf %187 : vector<16x512xbf16> to vector<16x512xf32>
    %c0_90 = arith.constant 0 : index
    %c0_91 = arith.constant 0 : index
    %189 = vector.load %arg10[%c0_90, %c0_91] : memref<16x128xf32, #tpu.memory_space<vmem>>, vector<16x128xf32>
    %190 = arith.truncf %189 : vector<16x128xf32> to vector<16x128xbf16>
    %c0_92 = arith.constant 0 : index
    %c0_93 = arith.constant 0 : index
    %191 = vector.load %arg5[%c0_92, %c0_93] : memref<128x512xbf16, #tpu.memory_space<vmem>>, vector<128x512xbf16>
    %cst_94 = arith.constant dense<0.000000e+00> : vector<16x512xf32>
    %192 = tpu.matmul %190, %191, %cst_94 {dimension_numbers = #tpu.dot_dimension_numbers<[1], [0], [0], [1], [0, 0, 1, 1], [], []>} : vector<16x128xbf16>, vector<128x512xbf16>, vector<16x512xf32> -> vector<16x512xf32>
    %193 = arith.addf %188, %192 : vector<16x512xf32>
    %194 = vector.extract_strided_slice %193 {offsets = [0, 0], sizes = [16, 128], strides = [1, 1]} : vector<16x512xf32> to vector<16x128xf32>
    %cst_95 = arith.constant 5.000000e-01 : f32
    %195 = vector.broadcast %cst_95 : f32 to vector<16x128xf32>
    %196 = arith.mulf %195, %194 : vector<16x128xf32>
    %197 = math.tanh %196 : vector<16x128xf32>
    %cst_96 = arith.constant 5.000000e-01 : f32
    %198 = vector.broadcast %cst_96 : f32 to vector<16x128xf32>
    %199 = arith.mulf %198, %197 : vector<16x128xf32>
    %cst_97 = arith.constant 5.000000e-01 : f32
    %200 = vector.broadcast %cst_97 : f32 to vector<16x128xf32>
    %201 = arith.addf %199, %200 : vector<16x128xf32>
    %202 = vector.extract_strided_slice %193 {offsets = [0, 128], sizes = [16, 128], strides = [1, 1]} : vector<16x512xf32> to vector<16x128xf32>
    %cst_98 = arith.constant 5.000000e-01 : f32
    %203 = vector.broadcast %cst_98 : f32 to vector<16x128xf32>
    %204 = arith.mulf %203, %202 : vector<16x128xf32>
    %205 = math.tanh %204 : vector<16x128xf32>
    %cst_99 = arith.constant 5.000000e-01 : f32
    %206 = vector.broadcast %cst_99 : f32 to vector<16x128xf32>
    %207 = arith.mulf %206, %205 : vector<16x128xf32>
    %cst_100 = arith.constant 5.000000e-01 : f32
    %208 = vector.broadcast %cst_100 : f32 to vector<16x128xf32>
    %209 = arith.addf %207, %208 : vector<16x128xf32>
    %210 = vector.extract_strided_slice %193 {offsets = [0, 256], sizes = [16, 128], strides = [1, 1]} : vector<16x512xf32> to vector<16x128xf32>
    %211 = math.tanh %210 : vector<16x128xf32>
    %212 = vector.extract_strided_slice %193 {offsets = [0, 384], sizes = [16, 128], strides = [1, 1]} : vector<16x512xf32> to vector<16x128xf32>
    %cst_101 = arith.constant 5.000000e-01 : f32
    %213 = vector.broadcast %cst_101 : f32 to vector<16x128xf32>
    %214 = arith.mulf %213, %212 : vector<16x128xf32>
    %215 = math.tanh %214 : vector<16x128xf32>
    %cst_102 = arith.constant 5.000000e-01 : f32
    %216 = vector.broadcast %cst_102 : f32 to vector<16x128xf32>
    %217 = arith.mulf %216, %215 : vector<16x128xf32>
    %cst_103 = arith.constant 5.000000e-01 : f32
    %218 = vector.broadcast %cst_103 : f32 to vector<16x128xf32>
    %219 = arith.addf %217, %218 : vector<16x128xf32>
    %c0_104 = arith.constant 0 : index
    %c0_105 = arith.constant 0 : index
    %220 = vector.load %arg10[%c0_104, %c0_105] : memref<16x128xf32, #tpu.memory_space<vmem>>, vector<16x128xf32>
    %c0_106 = arith.constant 0 : index
    %c0_107 = arith.constant 0 : index
    %221 = vector.load %arg11[%c0_106, %c0_107] : memref<16x128xf32, #tpu.memory_space<vmem>>, vector<16x128xf32>
    %222 = arith.mulf %209, %221 : vector<16x128xf32>
    %223 = arith.mulf %201, %211 : vector<16x128xf32>
    %224 = arith.addf %222, %223 : vector<16x128xf32>
    %225 = math.tanh %224 : vector<16x128xf32>
    %226 = arith.mulf %219, %225 : vector<16x128xf32>
    %227 = arith.addi %0, %c3_i32 : i32
    %228 = vector.broadcast %227 : i32 to vector<16x1xi32>
    %229 = arith.cmpi slt, %228, %12 : vector<16x1xi32>
    %230 = vector.shape_cast %229 : vector<16x1xi1> to vector<16x1xi1>
    %231 = vector.broadcast %230 : vector<16x1xi1> to vector<16x128xi1>
    %232 = arith.select %231, %226, %220 : vector<16x128xi1>, vector<16x128xf32>
    %c0_108 = arith.constant 0 : index
    %c0_109 = arith.constant 0 : index
    %233 = vector.load %arg10[%c0_108, %c0_109] : memref<16x128xf32, #tpu.memory_space<vmem>>, vector<16x128xf32>
    tpu.vector_store %arg10[%c0_108, %c0_109], %232 {strides = array<i32>} : memref<16x128xf32, #tpu.memory_space<vmem>>, vector<16x128xf32>,
    %234 = arith.select %231, %224, %221 : vector<16x128xi1>, vector<16x128xf32>
    %c0_110 = arith.constant 0 : index
    %c0_111 = arith.constant 0 : index
    %235 = vector.load %arg11[%c0_110, %c0_111] : memref<16x128xf32, #tpu.memory_space<vmem>>, vector<16x128xf32>
    tpu.vector_store %arg11[%c0_110, %c0_111], %234 {strides = array<i32>} : memref<16x128xf32, #tpu.memory_space<vmem>>, vector<16x128xf32>,
    %cst_112 = arith.constant 0.000000e+00 : f32
    %236 = vector.broadcast %cst_112 : f32 to vector<16x128xf32>
    %237 = arith.select %231, %226, %236 : vector<16x128xi1>, vector<16x128xf32>
    %238 = arith.truncf %237 : vector<16x128xf32> to vector<16x128xbf16>
    %239 = arith.index_cast %185 : i32 to index
    %c0_113 = arith.constant 0 : index
    %240 = vector.load %arg13[%239, %c0_113] : memref<64x128xbf16, #tpu.memory_space<vmem>>, vector<16x128xbf16>
    tpu.vector_store %arg13[%239, %c0_113], %238 {strides = array<i32>} : memref<64x128xbf16, #tpu.memory_space<vmem>>, vector<16x128xbf16>,
    %c4_i32_114 = arith.constant 4 : i32
    %c0_115 = arith.constant 0 : index
    %c0_116 = arith.constant 0 : index
    %241 = vector.load %arg13[%c0_115, %c0_116] : memref<64x128xbf16, #tpu.memory_space<vmem>>, vector<64x128xbf16>
    %c0_117 = arith.constant 0 : index
    %c0_118 = arith.constant 0 : index
    %242 = vector.load %arg7[%c0_117, %c0_118] : memref<128x128xbf16, #tpu.memory_space<vmem>>, vector<128x128xbf16>
    %cst_119 = arith.constant dense<0.000000e+00> : vector<64x128xf32>
    %243 = tpu.matmul %241, %242, %cst_119 {dimension_numbers = #tpu.dot_dimension_numbers<[1], [0], [0], [1], [0, 0, 1, 1], [], []>} : vector<64x128xbf16>, vector<128x128xbf16>, vector<64x128xf32> -> vector<64x128xf32>
    %c0_120 = arith.constant 0 : index
    %c0_121 = arith.constant 0 : index
    %244 = vector.load %arg8[%c0_120, %c0_121] : memref<1x128xf32, #tpu.memory_space<vmem>>, vector<1x128xf32>
    %245 = vector.broadcast %244 : vector<1x128xf32> to vector<64x128xf32>
    %246 = arith.addf %243, %245 : vector<64x128xf32>
    %247 = tpu.iota {dimensions = array<i32: 0>} : vector<64x1xi32>
    %c0_122 = arith.constant 0 : index
    %248 = memref.load %arg1[%c0_122] : memref<1xi32, #tpu.memory_space<smem>>
    %249 = arith.subi %248, %0 : i32
    %c16_i32_123 = arith.constant 16 : i32
    %250 = arith.muli %249, %c16_i32_123 : i32
    %251 = vector.broadcast %250 : i32 to vector<64x1xi32>
    %252 = arith.cmpi slt, %247, %251 : vector<64x1xi32>
    %cst_124 = arith.constant 0.000000e+00 : f32
    %253 = vector.shape_cast %252 : vector<64x1xi1> to vector<64x1xi1>
    %254 = vector.broadcast %253 : vector<64x1xi1> to vector<64x128xi1>
    %255 = vector.broadcast %cst_124 : f32 to vector<64x128xf32>
    %256 = arith.select %254, %246, %255 : vector<64x128xi1>, vector<64x128xf32>
    %c0_125 = arith.constant 0 : index
    %c0_126 = arith.constant 0 : index
    %257 = vector.load %arg9[%c0_125, %c0_126] : memref<64x128xf32, #tpu.memory_space<vmem>>, vector<64x128xf32>
    tpu.vector_store %arg9[%c0_125, %c0_126], %256 {strides = array<i32>} : memref<64x128xf32, #tpu.memory_space<vmem>>, vector<64x128xf32>,
    return
  }
  func.func @transform_0(%arg0: i32, %arg1: memref<1xi32, #tpu.memory_space<smem>>) -> (i32, i32) {
    %c0_i32 = arith.constant 0 : i32
    %c0_i32_0 = arith.constant 0 : i32
    %c0_i32_1 = arith.constant 0 : i32
    return %c0_i32, %c0_i32_0 : i32, i32
  }
  func.func @transform_1(%arg0: i32, %arg1: memref<1xi32, #tpu.memory_space<smem>>) -> (i32, i32) {
    %c0_i32 = arith.constant 0 : i32
    %c0_i32_0 = arith.constant 0 : i32
    return %arg0, %c0_i32 : i32, i32
  }
  func.func @transform_2(%arg0: i32, %arg1: memref<1xi32, #tpu.memory_space<smem>>) -> (i32, i32) {
    %c0_i32 = arith.constant 0 : i32
    %c0_i32_0 = arith.constant 0 : i32
    %c0_i32_1 = arith.constant 0 : i32
    return %c0_i32, %c0_i32_0 : i32, i32
  }
  func.func @transform_3(%arg0: i32, %arg1: memref<1xi32, #tpu.memory_space<smem>>) -> (i32, i32) {
    %c0_i32 = arith.constant 0 : i32
    %c0_i32_0 = arith.constant 0 : i32
    %c0_i32_1 = arith.constant 0 : i32
    return %c0_i32, %c0_i32_0 : i32, i32
  }
  func.func @transform_4(%arg0: i32, %arg1: memref<1xi32, #tpu.memory_space<smem>>) -> (i32, i32) {
    %c0_i32 = arith.constant 0 : i32
    %c0_i32_0 = arith.constant 0 : i32
    %c0_i32_1 = arith.constant 0 : i32
    return %c0_i32, %c0_i32_0 : i32, i32
  }
  func.func @transform_5(%arg0: i32, %arg1: memref<1xi32, #tpu.memory_space<smem>>) -> (i32, i32) {
    %c0_i32 = arith.constant 0 : i32
    %c0_i32_0 = arith.constant 0 : i32
    %c0_i32_1 = arith.constant 0 : i32
    return %c0_i32, %c0_i32_0 : i32, i32
  }
  func.func @transform_6(%arg0: i32, %arg1: memref<1xi32, #tpu.memory_space<smem>>) -> (i32, i32) {
    %c0_i32 = arith.constant 0 : i32
    %c0_i32_0 = arith.constant 0 : i32
    %c0_i32_1 = arith.constant 0 : i32
    return %c0_i32, %c0_i32_0 : i32, i32
  }
  func.func @transform_7(%arg0: i32, %arg1: memref<1xi32, #tpu.memory_space<smem>>) -> (i32, i32) {
    %c0_i32 = arith.constant 0 : i32
    %c0_i32_0 = arith.constant 0 : i32
    return %arg0, %c0_i32 : i32, i32
  }
}

module attributes {stable_mosaic.version = 11 : i64} {
  func.func @lstm_proj_kernel(%arg0: i32, %arg1: memref<1xi32, #tpu.memory_space<smem>>, %arg2: memref<16x1xi32, #tpu.memory_space<vmem>>, %arg3: memref<64x128xbf16, #tpu.memory_space<vmem>>, %arg4: memref<128x512xbf16, #tpu.memory_space<vmem>>, %arg5: memref<128x512xbf16, #tpu.memory_space<vmem>>, %arg6: memref<1x512xf32, #tpu.memory_space<vmem>>, %arg7: memref<128x128xbf16, #tpu.memory_space<vmem>>, %arg8: memref<1x128xf32, #tpu.memory_space<vmem>>, %arg9: memref<64x128xf32, #tpu.memory_space<vmem>>, %arg10: memref<16x128xf32, #tpu.memory_space<vmem>>, %arg11: memref<16x128xf32, #tpu.memory_space<vmem>>, %arg12: memref<64x512xbf16, #tpu.memory_space<vmem>>, %arg13: memref<64x128xbf16, #tpu.memory_space<vmem>>) attributes {dimension_semantics = [#tpu.dimension_semantics<arbitrary>], iteration_bounds = array<i64: 3>, scalar_prefetch = 1 : i64, scratch_operands = 4 : i64, tpu.core_type = #tpu.core_type<tc>, window_params = [{pipeline_mode = #tpu.pipeline_mode<synchronous>, transform_indices = @transform_0, window_bounds = array<i64: 16, 1>}, {transform_indices = @transform_1, window_bounds = array<i64: 64, 128>}, {pipeline_mode = #tpu.pipeline_mode<synchronous>, transform_indices = @transform_2, window_bounds = array<i64: 128, 512>}, {pipeline_mode = #tpu.pipeline_mode<synchronous>, transform_indices = @transform_3, window_bounds = array<i64: 128, 512>}, {pipeline_mode = #tpu.pipeline_mode<synchronous>, transform_indices = @transform_4, window_bounds = array<i64: 1, 512>}, {pipeline_mode = #tpu.pipeline_mode<synchronous>, transform_indices = @transform_5, window_bounds = array<i64: 128, 128>}, {pipeline_mode = #tpu.pipeline_mode<synchronous>, transform_indices = @transform_6, window_bounds = array<i64: 1, 128>}, {transform_indices = @transform_7, window_bounds = array<i64: 64, 128>}]} {
    %c4_i32 = arith.constant 4 : i32
    %0 = arith.muli %arg0, %c4_i32 : i32
    %c0_i32 = arith.constant 0 : i32
    %1 = arith.cmpi eq, %arg0, %c0_i32 : i32
    %2 = arith.extui %1 : i1 to i32
    %c0_i32_0 = arith.constant 0 : i32
    %3 = arith.cmpi ne, %2, %c0_i32_0 : i32
    scf.if %3 {
      %cst_127 = arith.constant 0.000000e+00 : f32
      %258 = vector.broadcast %cst_127 : f32 to vector<16x128xf32>
      %c0_128 = arith.constant 0 : index
      %c0_129 = arith.constant 0 : index
      %259 = vector.load %arg10[%c0_128, %c0_129] : memref<16x128xf32, #tpu.memory_space<vmem>>, vector<16x128xf32>
      tpu.vector_store %arg10[%c0_128, %c0_129], %258 {strides = array<i32>} : memref<16x128xf32, #tpu.memory_space<vmem>>, vector<16x128xf32>,
      %cst_130 = arith.constant 0.000000e+00 : f32
      %260 = vector.broadcast %cst_130 : f32 to vector<16x128xf32>
      %c0_131 = arith.constant 0 : index
      %c0_132 = arith.constant 0 : index
      %261 = vector.load %arg11[%c0_131, %c0_132] : memref<16x128xf32, #tpu.memory_space<vmem>>, vector<16x128xf32>
      tpu.vector_store %arg11[%c0_131, %c0_132], %260 {strides = array<i32>} : memref<16x128xf32, #tpu.memory_space<vmem>>, vector<16x128xf32>,
    } else {
    }
    %c0 = arith.constant 0 : index
    %c0_1 = arith.constant 0 : index
    %4 = vector.load %arg3[%c0, %c0_1] : memref<64x128xbf16, #tpu.memory_space<vmem>>, vector<64x128xbf16>
    %c0_2 = arith.constant 0 : index
    %c0_3 = arith.constant 0 : index
    %5 = vector.load %arg4[%c0_2, %c0_3] : memref<128x512xbf16, #tpu.memory_space<vmem>>, vector<128x512xbf16>
    %cst = arith.constant dense<0.000000e+00> : vector<64x512xf32>
    %6 = tpu.matmul %4, %5, %cst {dimension_numbers = #tpu.dot_dimension_numbers<[1], [0], [0], [1], [0, 0, 1, 1], [], []>} : vector<64x128xbf16>, vector<128x512xbf16>, vector<64x512xf32> -> vector<64x512xf32>
    %c0_4 = arith.constant 0 : index
    %c0_5 = arith.constant 0 : index
    %7 = vector.load %arg6[%c0_4, %c0_5] : memref<1x512xf32, #tpu.memory_space<vmem>>, vector<1x512xf32>
    %8 = vector.broadcast %7 : vector<1x512xf32> to vector<64x512xf32>
    %9 = arith.addf %6, %8 : vector<64x512xf32>
    %10 = arith.truncf %9 : vector<64x512xf32> to vector<64x512xbf16>
    %c0_6 = arith.constant 0 : index
    %c0_7 = arith.constant 0 : index
    %11 = vector.load %arg12[%c0_6, %c0_7] : memref<64x512xbf16, #tpu.memory_space<vmem>>, vector<64x512xbf16>
    tpu.vector_store %arg12[%c0_6, %c0_7], %10 {strides = array<i32>} : memref<64x512xbf16, #tpu.memory_space<vmem>>, vector<64x512xbf16>,
    %c0_8 = arith.constant 0 : index
    %c0_9 = arith.constant 0 : index
    %12 = vector.load %arg2[%c0_8, %c0_9] : memref<16x1xi32, #tpu.memory_space<vmem>>, vector<16x1xi32>
    %c0_i32_10 = arith.constant 0 : i32
    %c16_i32 = arith.constant 16 : i32
    %13 = arith.muli %c0_i32_10, %c16_i32 : i32
    %14 = tpu.assume_multiple %13, 16 : i32
    %15 = arith.index_cast %14 : i32 to index
    %c0_11 = arith.constant 0 : index
    %16 = vector.load %arg12[%15, %c0_11] : memref<64x512xbf16, #tpu.memory_space<vmem>>, vector<16x512xbf16>
    %17 = arith.extf %16 : vector<16x512xbf16> to vector<16x512xf32>
    %c0_12 = arith.constant 0 : index
    %c0_13 = arith.constant 0 : index
    %18 = vector.load %arg10[%c0_12, %c0_13] : memref<16x128xf32, #tpu.memory_space<vmem>>, vector<16x128xf32>
    %19 = arith.truncf %18 : vector<16x128xf32> to vector<16x128xbf16>
    %c0_14 = arith.constant 0 : index
    %c0_15 = arith.constant 0 : index
    %20 = vector.load %arg5[%c0_14, %c0_15] : memref<128x512xbf16, #tpu.memory_space<vmem>>, vector<128x512xbf16>
    %cst_16 = arith.constant dense<0.000000e+00> : vector<16x512xf32>
    %21 = tpu.matmul %19, %20, %cst_16 {dimension_numbers = #tpu.dot_dimension_numbers<[1], [0], [0], [1], [0, 0, 1, 1], [], []>} : vector<16x128xbf16>, vector<128x512xbf16>, vector<16x512xf32> -> vector<16x512xf32>
    %22 = arith.addf %17, %21 : vector<16x512xf32>
    %23 = vector.extract_strided_slice %22 {offsets = [0, 0], sizes = [16, 128], strides = [1, 1]} : vector<16x512xf32> to vector<16x128xf32>
    %cst_17 = arith.constant 5.000000e-01 : f32
    %24 = vector.broadcast %cst_17 : f32 to vector<16x128xf32>
    %25 = arith.mulf %24, %23 : vector<16x128xf32>
    %26 = math.tanh %25 : vector<16x128xf32>
    %cst_18 = arith.constant 5.000000e-01 : f32
    %27 = vector.broadcast %cst_18 : f32 to vector<16x128xf32>
    %28 = arith.mulf %27, %26 : vector<16x128xf32>
    %cst_19 = arith.constant 5.000000e-01 : f32
    %29 = vector.broadcast %cst_19 : f32 to vector<16x128xf32>
    %30 = arith.addf %28, %29 : vector<16x128xf32>
    %31 = vector.extract_strided_slice %22 {offsets = [0, 128], sizes = [16, 128], strides = [1, 1]} : vector<16x512xf32> to vector<16x128xf32>
    %cst_20 = arith.constant 5.000000e-01 : f32
    %32 = vector.broadcast %cst_20 : f32 to vector<16x128xf32>
    %33 = arith.mulf %32, %31 : vector<16x128xf32>
    %34 = math.tanh %33 : vector<16x128xf32>
    %cst_21 = arith.constant 5.000000e-01 : f32
    %35 = vector.broadcast %cst_21 : f32 to vector<16x128xf32>
    %36 = arith.mulf %35, %34 : vector<16x128xf32>
    %cst_22 = arith.constant 5.000000e-01 : f32
    %37 = vector.broadcast %cst_22 : f32 to vector<16x128xf32>
    %38 = arith.addf %36, %37 : vector<16x128xf32>
    %39 = vector.extract_strided_slice %22 {offsets = [0, 256], sizes = [16, 128], strides = [1, 1]} : vector<16x512xf32> to vector<16x128xf32>
    %40 = math.tanh %39 : vector<16x128xf32>
    %41 = vector.extract_strided_slice %22 {offsets = [0, 384], sizes = [16, 128], strides = [1, 1]} : vector<16x512xf32> to vector<16x128xf32>
    %cst_23 = arith.constant 5.000000e-01 : f32
    %42 = vector.broadcast %cst_23 : f32 to vector<16x128xf32>
    %43 = arith.mulf %42, %41 : vector<16x128xf32>
    %44 = math.tanh %43 : vector<16x128xf32>
    %cst_24 = arith.constant 5.000000e-01 : f32
    %45 = vector.broadcast %cst_24 : f32 to vector<16x128xf32>
    %46 = arith.mulf %45, %44 : vector<16x128xf32>
    %cst_25 = arith.constant 5.000000e-01 : f32
    %47 = vector.broadcast %cst_25 : f32 to vector<16x128xf32>
    %48 = arith.addf %46, %47 : vector<16x128xf32>
    %c0_26 = arith.constant 0 : index
    %c0_27 = arith.constant 0 : index
    %49 = vector.load %arg10[%c0_26, %c0_27] : memref<16x128xf32, #tpu.memory_space<vmem>>, vector<16x128xf32>
    %c0_28 = arith.constant 0 : index
    %c0_29 = arith.constant 0 : index
    %50 = vector.load %arg11[%c0_28, %c0_29] : memref<16x128xf32, #tpu.memory_space<vmem>>, vector<16x128xf32>
    %51 = arith.mulf %38, %50 : vector<16x128xf32>
    %52 = arith.mulf %30, %40 : vector<16x128xf32>
    %53 = arith.addf %51, %52 : vector<16x128xf32>
    %54 = math.tanh %53 : vector<16x128xf32>
    %55 = arith.mulf %48, %54 : vector<16x128xf32>
    %56 = arith.addi %0, %c0_i32_10 : i32
    %57 = vector.broadcast %56 : i32 to vector<16x1xi32>
    %58 = arith.cmpi slt, %57, %12 : vector<16x1xi32>
    %59 = vector.shape_cast %58 : vector<16x1xi1> to vector<16x1xi1>
    %60 = vector.broadcast %59 : vector<16x1xi1> to vector<16x128xi1>
    %61 = arith.select %60, %55, %49 : vector<16x128xi1>, vector<16x128xf32>
    %c0_30 = arith.constant 0 : index
    %c0_31 = arith.constant 0 : index
    %62 = vector.load %arg10[%c0_30, %c0_31] : memref<16x128xf32, #tpu.memory_space<vmem>>, vector<16x128xf32>
    tpu.vector_store %arg10[%c0_30, %c0_31], %61 {strides = array<i32>} : memref<16x128xf32, #tpu.memory_space<vmem>>, vector<16x128xf32>,
    %63 = arith.select %60, %53, %50 : vector<16x128xi1>, vector<16x128xf32>
    %c0_32 = arith.constant 0 : index
    %c0_33 = arith.constant 0 : index
    %64 = vector.load %arg11[%c0_32, %c0_33] : memref<16x128xf32, #tpu.memory_space<vmem>>, vector<16x128xf32>
    tpu.vector_store %arg11[%c0_32, %c0_33], %63 {strides = array<i32>} : memref<16x128xf32, #tpu.memory_space<vmem>>, vector<16x128xf32>,
    %cst_34 = arith.constant 0.000000e+00 : f32
    %65 = vector.broadcast %cst_34 : f32 to vector<16x128xf32>
    %66 = arith.select %60, %55, %65 : vector<16x128xi1>, vector<16x128xf32>
    %67 = arith.truncf %66 : vector<16x128xf32> to vector<16x128xbf16>
    %68 = arith.index_cast %14 : i32 to index
    %c0_35 = arith.constant 0 : index
    %69 = vector.load %arg13[%68, %c0_35] : memref<64x128xbf16, #tpu.memory_space<vmem>>, vector<16x128xbf16>
    tpu.vector_store %arg13[%68, %c0_35], %67 {strides = array<i32>} : memref<64x128xbf16, #tpu.memory_space<vmem>>, vector<16x128xbf16>,
    %c1_i32 = arith.constant 1 : i32
    %c16_i32_36 = arith.constant 16 : i32
    %70 = arith.muli %c1_i32, %c16_i32_36 : i32
    %71 = tpu.assume_multiple %70, 16 : i32
    %72 = arith.index_cast %71 : i32 to index
    %c0_37 = arith.constant 0 : index
    %73 = vector.load %arg12[%72, %c0_37] : memref<64x512xbf16, #tpu.memory_space<vmem>>, vector<16x512xbf16>
    %74 = arith.extf %73 : vector<16x512xbf16> to vector<16x512xf32>
    %c0_38 = arith.constant 0 : index
    %c0_39 = arith.constant 0 : index
    %75 = vector.load %arg10[%c0_38, %c0_39] : memref<16x128xf32, #tpu.memory_space<vmem>>, vector<16x128xf32>
    %76 = arith.truncf %75 : vector<16x128xf32> to vector<16x128xbf16>
    %c0_40 = arith.constant 0 : index
    %c0_41 = arith.constant 0 : index
    %77 = vector.load %arg5[%c0_40, %c0_41] : memref<128x512xbf16, #tpu.memory_space<vmem>>, vector<128x512xbf16>
    %cst_42 = arith.constant dense<0.000000e+00> : vector<16x512xf32>
    %78 = tpu.matmul %76, %77, %cst_42 {dimension_numbers = #tpu.dot_dimension_numbers<[1], [0], [0], [1], [0, 0, 1, 1], [], []>} : vector<16x128xbf16>, vector<128x512xbf16>, vector<16x512xf32> -> vector<16x512xf32>
    %79 = arith.addf %74, %78 : vector<16x512xf32>
    %80 = vector.extract_strided_slice %79 {offsets = [0, 0], sizes = [16, 128], strides = [1, 1]} : vector<16x512xf32> to vector<16x128xf32>
    %cst_43 = arith.constant 5.000000e-01 : f32
    %81 = vector.broadcast %cst_43 : f32 to vector<16x128xf32>
    %82 = arith.mulf %81, %80 : vector<16x128xf32>
    %83 = math.tanh %82 : vector<16x128xf32>
    %cst_44 = arith.constant 5.000000e-01 : f32
    %84 = vector.broadcast %cst_44 : f32 to vector<16x128xf32>
    %85 = arith.mulf %84, %83 : vector<16x128xf32>
    %cst_45 = arith.constant 5.000000e-01 : f32
    %86 = vector.broadcast %cst_45 : f32 to vector<16x128xf32>
    %87 = arith.addf %85, %86 : vector<16x128xf32>
    %88 = vector.extract_strided_slice %79 {offsets = [0, 128], sizes = [16, 128], strides = [1, 1]} : vector<16x512xf32> to vector<16x128xf32>
    %cst_46 = arith.constant 5.000000e-01 : f32
    %89 = vector.broadcast %cst_46 : f32 to vector<16x128xf32>
    %90 = arith.mulf %89, %88 : vector<16x128xf32>
    %91 = math.tanh %90 : vector<16x128xf32>
    %cst_47 = arith.constant 5.000000e-01 : f32
    %92 = vector.broadcast %cst_47 : f32 to vector<16x128xf32>
    %93 = arith.mulf %92, %91 : vector<16x128xf32>
    %cst_48 = arith.constant 5.000000e-01 : f32
    %94 = vector.broadcast %cst_48 : f32 to vector<16x128xf32>
    %95 = arith.addf %93, %94 : vector<16x128xf32>
    %96 = vector.extract_strided_slice %79 {offsets = [0, 256], sizes = [16, 128], strides = [1, 1]} : vector<16x512xf32> to vector<16x128xf32>
    %97 = math.tanh %96 : vector<16x128xf32>
    %98 = vector.extract_strided_slice %79 {offsets = [0, 384], sizes = [16, 128], strides = [1, 1]} : vector<16x512xf32> to vector<16x128xf32>
    %cst_49 = arith.constant 5.000000e-01 : f32
    %99 = vector.broadcast %cst_49 : f32 to vector<16x128xf32>
    %100 = arith.mulf %99, %98 : vector<16x128xf32>
    %101 = math.tanh %100 : vector<16x128xf32>
    %cst_50 = arith.constant 5.000000e-01 : f32
    %102 = vector.broadcast %cst_50 : f32 to vector<16x128xf32>
    %103 = arith.mulf %102, %101 : vector<16x128xf32>
    %cst_51 = arith.constant 5.000000e-01 : f32
    %104 = vector.broadcast %cst_51 : f32 to vector<16x128xf32>
    %105 = arith.addf %103, %104 : vector<16x128xf32>
    %c0_52 = arith.constant 0 : index
    %c0_53 = arith.constant 0 : index
    %106 = vector.load %arg10[%c0_52, %c0_53] : memref<16x128xf32, #tpu.memory_space<vmem>>, vector<16x128xf32>
    %c0_54 = arith.constant 0 : index
    %c0_55 = arith.constant 0 : index
    %107 = vector.load %arg11[%c0_54, %c0_55] : memref<16x128xf32, #tpu.memory_space<vmem>>, vector<16x128xf32>
    %108 = arith.mulf %95, %107 : vector<16x128xf32>
    %109 = arith.mulf %87, %97 : vector<16x128xf32>
    %110 = arith.addf %108, %109 : vector<16x128xf32>
    %111 = math.tanh %110 : vector<16x128xf32>
    %112 = arith.mulf %105, %111 : vector<16x128xf32>
    %113 = arith.addi %0, %c1_i32 : i32
    %114 = vector.broadcast %113 : i32 to vector<16x1xi32>
    %115 = arith.cmpi slt, %114, %12 : vector<16x1xi32>
    %116 = vector.shape_cast %115 : vector<16x1xi1> to vector<16x1xi1>
    %117 = vector.broadcast %116 : vector<16x1xi1> to vector<16x128xi1>
    %118 = arith.select %117, %112, %106 : vector<16x128xi1>, vector<16x128xf32>
    %c0_56 = arith.constant 0 : index
    %c0_57 = arith.constant 0 : index
    %119 = vector.load %arg10[%c0_56, %c0_57] : memref<16x128xf32, #tpu.memory_space<vmem>>, vector<16x128xf32>
    tpu.vector_store %arg10[%c0_56, %c0_57], %118 {strides = array<i32>} : memref<16x128xf32, #tpu.memory_space<vmem>>, vector<16x128xf32>,
    %120 = arith.select %117, %110, %107 : vector<16x128xi1>, vector<16x128xf32>
    %c0_58 = arith.constant 0 : index
    %c0_59 = arith.constant 0 : index
    %121 = vector.load %arg11[%c0_58, %c0_59] : memref<16x128xf32, #tpu.memory_space<vmem>>, vector<16x128xf32>
    tpu.vector_store %arg11[%c0_58, %c0_59], %120 {strides = array<i32>} : memref<16x128xf32, #tpu.memory_space<vmem>>, vector<16x128xf32>,
    %cst_60 = arith.constant 0.000000e+00 : f32
    %122 = vector.broadcast %cst_60 : f32 to vector<16x128xf32>
    %123 = arith.select %117, %112, %122 : vector<16x128xi1>, vector<16x128xf32>
    %124 = arith.truncf %123 : vector<16x128xf32> to vector<16x128xbf16>
    %125 = arith.index_cast %71 : i32 to index
    %c0_61 = arith.constant 0 : index
    %126 = vector.load %arg13[%125, %c0_61] : memref<64x128xbf16, #tpu.memory_space<vmem>>, vector<16x128xbf16>
    tpu.vector_store %arg13[%125, %c0_61], %124 {strides = array<i32>} : memref<64x128xbf16, #tpu.memory_space<vmem>>, vector<16x128xbf16>,
    %c2_i32 = arith.constant 2 : i32
    %c16_i32_62 = arith.constant 16 : i32
    %127 = arith.muli %c2_i32, %c16_i32_62 : i32
    %128 = tpu.assume_multiple %127, 16 : i32
    %129 = arith.index_cast %128 : i32 to index
    %c0_63 = arith.constant 0 : index
    %130 = vector.load %arg12[%129, %c0_63] : memref<64x512xbf16, #tpu.memory_space<vmem>>, vector<16x512xbf16>
    %131 = arith.extf %130 : vector<16x512xbf16> to vector<16x512xf32>
    %c0_64 = arith.constant 0 : index
    %c0_65 = arith.constant 0 : index
    %132 = vector.load %arg10[%c0_64, %c0_65] : memref<16x128xf32, #tpu.memory_space<vmem>>, vector<16x128xf32>
    %133 = arith.truncf %132 : vector<16x128xf32> to vector<16x128xbf16>
    %c0_66 = arith.constant 0 : index
    %c0_67 = arith.constant 0 : index
    %134 = vector.load %arg5[%c0_66, %c0_67] : memref<128x512xbf16, #tpu.memory_space<vmem>>, vector<128x512xbf16>
    %cst_68 = arith.constant dense<0.000000e+00> : vector<16x512xf32>
    %135 = tpu.matmul %133, %134, %cst_68 {dimension_numbers = #tpu.dot_dimension_numbers<[1], [0], [0], [1], [0, 0, 1, 1], [], []>} : vector<16x128xbf16>, vector<128x512xbf16>, vector<16x512xf32> -> vector<16x512xf32>
    %136 = arith.addf %131, %135 : vector<16x512xf32>
    %137 = vector.extract_strided_slice %136 {offsets = [0, 0], sizes = [16, 128], strides = [1, 1]} : vector<16x512xf32> to vector<16x128xf32>
    %cst_69 = arith.constant 5.000000e-01 : f32
    %138 = vector.broadcast %cst_69 : f32 to vector<16x128xf32>
    %139 = arith.mulf %138, %137 : vector<16x128xf32>
    %140 = math.tanh %139 : vector<16x128xf32>
    %cst_70 = arith.constant 5.000000e-01 : f32
    %141 = vector.broadcast %cst_70 : f32 to vector<16x128xf32>
    %142 = arith.mulf %141, %140 : vector<16x128xf32>
    %cst_71 = arith.constant 5.000000e-01 : f32
    %143 = vector.broadcast %cst_71 : f32 to vector<16x128xf32>
    %144 = arith.addf %142, %143 : vector<16x128xf32>
    %145 = vector.extract_strided_slice %136 {offsets = [0, 128], sizes = [16, 128], strides = [1, 1]} : vector<16x512xf32> to vector<16x128xf32>
    %cst_72 = arith.constant 5.000000e-01 : f32
    %146 = vector.broadcast %cst_72 : f32 to vector<16x128xf32>
    %147 = arith.mulf %146, %145 : vector<16x128xf32>
    %148 = math.tanh %147 : vector<16x128xf32>
    %cst_73 = arith.constant 5.000000e-01 : f32
    %149 = vector.broadcast %cst_73 : f32 to vector<16x128xf32>
    %150 = arith.mulf %149, %148 : vector<16x128xf32>
    %cst_74 = arith.constant 5.000000e-01 : f32
    %151 = vector.broadcast %cst_74 : f32 to vector<16x128xf32>
    %152 = arith.addf %150, %151 : vector<16x128xf32>
    %153 = vector.extract_strided_slice %136 {offsets = [0, 256], sizes = [16, 128], strides = [1, 1]} : vector<16x512xf32> to vector<16x128xf32>
    %154 = math.tanh %153 : vector<16x128xf32>
    %155 = vector.extract_strided_slice %136 {offsets = [0, 384], sizes = [16, 128], strides = [1, 1]} : vector<16x512xf32> to vector<16x128xf32>
    %cst_75 = arith.constant 5.000000e-01 : f32
    %156 = vector.broadcast %cst_75 : f32 to vector<16x128xf32>
    %157 = arith.mulf %156, %155 : vector<16x128xf32>
    %158 = math.tanh %157 : vector<16x128xf32>
    %cst_76 = arith.constant 5.000000e-01 : f32
    %159 = vector.broadcast %cst_76 : f32 to vector<16x128xf32>
    %160 = arith.mulf %159, %158 : vector<16x128xf32>
    %cst_77 = arith.constant 5.000000e-01 : f32
    %161 = vector.broadcast %cst_77 : f32 to vector<16x128xf32>
    %162 = arith.addf %160, %161 : vector<16x128xf32>
    %c0_78 = arith.constant 0 : index
    %c0_79 = arith.constant 0 : index
    %163 = vector.load %arg10[%c0_78, %c0_79] : memref<16x128xf32, #tpu.memory_space<vmem>>, vector<16x128xf32>
    %c0_80 = arith.constant 0 : index
    %c0_81 = arith.constant 0 : index
    %164 = vector.load %arg11[%c0_80, %c0_81] : memref<16x128xf32, #tpu.memory_space<vmem>>, vector<16x128xf32>
    %165 = arith.mulf %152, %164 : vector<16x128xf32>
    %166 = arith.mulf %144, %154 : vector<16x128xf32>
    %167 = arith.addf %165, %166 : vector<16x128xf32>
    %168 = math.tanh %167 : vector<16x128xf32>
    %169 = arith.mulf %162, %168 : vector<16x128xf32>
    %170 = arith.addi %0, %c2_i32 : i32
    %171 = vector.broadcast %170 : i32 to vector<16x1xi32>
    %172 = arith.cmpi slt, %171, %12 : vector<16x1xi32>
    %173 = vector.shape_cast %172 : vector<16x1xi1> to vector<16x1xi1>
    %174 = vector.broadcast %173 : vector<16x1xi1> to vector<16x128xi1>
    %175 = arith.select %174, %169, %163 : vector<16x128xi1>, vector<16x128xf32>
    %c0_82 = arith.constant 0 : index
    %c0_83 = arith.constant 0 : index
    %176 = vector.load %arg10[%c0_82, %c0_83] : memref<16x128xf32, #tpu.memory_space<vmem>>, vector<16x128xf32>
    tpu.vector_store %arg10[%c0_82, %c0_83], %175 {strides = array<i32>} : memref<16x128xf32, #tpu.memory_space<vmem>>, vector<16x128xf32>,
    %177 = arith.select %174, %167, %164 : vector<16x128xi1>, vector<16x128xf32>
    %c0_84 = arith.constant 0 : index
    %c0_85 = arith.constant 0 : index
    %178 = vector.load %arg11[%c0_84, %c0_85] : memref<16x128xf32, #tpu.memory_space<vmem>>, vector<16x128xf32>
    tpu.vector_store %arg11[%c0_84, %c0_85], %177 {strides = array<i32>} : memref<16x128xf32, #tpu.memory_space<vmem>>, vector<16x128xf32>,
    %cst_86 = arith.constant 0.000000e+00 : f32
    %179 = vector.broadcast %cst_86 : f32 to vector<16x128xf32>
    %180 = arith.select %174, %169, %179 : vector<16x128xi1>, vector<16x128xf32>
    %181 = arith.truncf %180 : vector<16x128xf32> to vector<16x128xbf16>
    %182 = arith.index_cast %128 : i32 to index
    %c0_87 = arith.constant 0 : index
    %183 = vector.load %arg13[%182, %c0_87] : memref<64x128xbf16, #tpu.memory_space<vmem>>, vector<16x128xbf16>
    tpu.vector_store %arg13[%182, %c0_87], %181 {strides = array<i32>} : memref<64x128xbf16, #tpu.memory_space<vmem>>, vector<16x128xbf16>,
    %c3_i32 = arith.constant 3 : i32
    %c16_i32_88 = arith.constant 16 : i32
    %184 = arith.muli %c3_i32, %c16_i32_88 : i32
    %185 = tpu.assume_multiple %184, 16 : i32
    %186 = arith.index_cast %185 : i32 to index
    %c0_89 = arith.constant 0 : index
    %187 = vector.load %arg12[%186, %c0_89] : memref<64x512xbf16, #tpu.memory_space<vmem>>, vector<16x512xbf16>
    %188 = arith.extf %187 : vector<16x512xbf16> to vector<16x512xf32>
    %c0_90 = arith.constant 0 : index
    %c0_91 = arith.constant 0 : index
    %189 = vector.load %arg10[%c0_90, %c0_91] : memref<16x128xf32, #tpu.memory_space<vmem>>, vector<16x128xf32>
    %190 = arith.truncf %189 : vector<16x128xf32> to vector<16x128xbf16>
    %c0_92 = arith.constant 0 : index
    %c0_93 = arith.constant 0 : index
    %191 = vector.load %arg5[%c0_92, %c0_93] : memref<128x512xbf16, #tpu.memory_space<vmem>>, vector<128x512xbf16>
    %cst_94 = arith.constant dense<0.000000e+00> : vector<16x512xf32>
    %192 = tpu.matmul %190, %191, %cst_94 {dimension_numbers = #tpu.dot_dimension_numbers<[1], [0], [0], [1], [0, 0, 1, 1], [], []>} : vector<16x128xbf16>, vector<128x512xbf16>, vector<16x512xf32> -> vector<16x512xf32>
    %193 = arith.addf %188, %192 : vector<16x512xf32>
    %194 = vector.extract_strided_slice %193 {offsets = [0, 0], sizes = [16, 128], strides = [1, 1]} : vector<16x512xf32> to vector<16x128xf32>
    %cst_95 = arith.constant 5.000000e-01 : f32
    %195 = vector.broadcast %cst_95 : f32 to vector<16x128xf32>
    %196 = arith.mulf %195, %194 : vector<16x128xf32>
    %197 = math.tanh %196 : vector<16x128xf32>
    %cst_96 = arith.constant 5.000000e-01 : f32
    %198 = vector.broadcast %cst_96 : f32 to vector<16x128xf32>
    %199 = arith.mulf %198, %197 : vector<16x128xf32>
    %cst_97 = arith.constant 5.000000e-01 : f32
    %200 = vector.broadcast %cst_97 : f32 to vector<16x128xf32>
    %201 = arith.addf %199, %200 : vector<16x128xf32>
    %202 = vector.extract_strided_slice %193 {offsets = [0, 128], sizes = [16, 128], strides = [1, 1]} : vector<16x512xf32> to vector<16x128xf32>
    %cst_98 = arith.constant 5.000000e-01 : f32
    %203 = vector.broadcast %cst_98 : f32 to vector<16x128xf32>
    %204 = arith.mulf %203, %202 : vector<16x128xf32>
    %205 = math.tanh %204 : vector<16x128xf32>
    %cst_99 = arith.constant 5.000000e-01 : f32
    %206 = vector.broadcast %cst_99 : f32 to vector<16x128xf32>
    %207 = arith.mulf %206, %205 : vector<16x128xf32>
    %cst_100 = arith.constant 5.000000e-01 : f32
    %208 = vector.broadcast %cst_100 : f32 to vector<16x128xf32>
    %209 = arith.addf %207, %208 : vector<16x128xf32>
    %210 = vector.extract_strided_slice %193 {offsets = [0, 256], sizes = [16, 128], strides = [1, 1]} : vector<16x512xf32> to vector<16x128xf32>
    %211 = math.tanh %210 : vector<16x128xf32>
    %212 = vector.extract_strided_slice %193 {offsets = [0, 384], sizes = [16, 128], strides = [1, 1]} : vector<16x512xf32> to vector<16x128xf32>
    %cst_101 = arith.constant 5.000000e-01 : f32
    %213 = vector.broadcast %cst_101 : f32 to vector<16x128xf32>
    %214 = arith.mulf %213, %212 : vector<16x128xf32>
    %215 = math.tanh %214 : vector<16x128xf32>
    %cst_102 = arith.constant 5.000000e-01 : f32
    %216 = vector.broadcast %cst_102 : f32 to vector<16x128xf32>
    %217 = arith.mulf %216, %215 : vector<16x128xf32>
    %cst_103 = arith.constant 5.000000e-01 : f32
    %218 = vector.broadcast %cst_103 : f32 to vector<16x128xf32>
    %219 = arith.addf %217, %218 : vector<16x128xf32>
    %c0_104 = arith.constant 0 : index
    %c0_105 = arith.constant 0 : index
    %220 = vector.load %arg10[%c0_104, %c0_105] : memref<16x128xf32, #tpu.memory_space<vmem>>, vector<16x128xf32>
    %c0_106 = arith.constant 0 : index
    %c0_107 = arith.constant 0 : index
    %221 = vector.load %arg11[%c0_106, %c0_107] : memref<16x128xf32, #tpu.memory_space<vmem>>, vector<16x128xf32>
    %222 = arith.mulf %209, %221 : vector<16x128xf32>
    %223 = arith.mulf %201, %211 : vector<16x128xf32>
    %224 = arith.addf %222, %223 : vector<16x128xf32>
    %225 = math.tanh %224 : vector<16x128xf32>
    %226 = arith.mulf %219, %225 : vector<16x128xf32>
    %227 = arith.addi %0, %c3_i32 : i32
    %228 = vector.broadcast %227 : i32 to vector<16x1xi32>
    %229 = arith.cmpi slt, %228, %12 : vector<16x1xi32>
    %230 = vector.shape_cast %229 : vector<16x1xi1> to vector<16x1xi1>
    %231 = vector.broadcast %230 : vector<16x1xi1> to vector<16x128xi1>
    %232 = arith.select %231, %226, %220 : vector<16x128xi1>, vector<16x128xf32>
    %c0_108 = arith.constant 0 : index
    %c0_109 = arith.constant 0 : index
    %233 = vector.load %arg10[%c0_108, %c0_109] : memref<16x128xf32, #tpu.memory_space<vmem>>, vector<16x128xf32>
    tpu.vector_store %arg10[%c0_108, %c0_109], %232 {strides = array<i32>} : memref<16x128xf32, #tpu.memory_space<vmem>>, vector<16x128xf32>,
    %234 = arith.select %231, %224, %221 : vector<16x128xi1>, vector<16x128xf32>
    %c0_110 = arith.constant 0 : index
    %c0_111 = arith.constant 0 : index
    %235 = vector.load %arg11[%c0_110, %c0_111] : memref<16x128xf32, #tpu.memory_space<vmem>>, vector<16x128xf32>
    tpu.vector_store %arg11[%c0_110, %c0_111], %234 {strides = array<i32>} : memref<16x128xf32, #tpu.memory_space<vmem>>, vector<16x128xf32>,
    %cst_112 = arith.constant 0.000000e+00 : f32
    %236 = vector.broadcast %cst_112 : f32 to vector<16x128xf32>
    %237 = arith.select %231, %226, %236 : vector<16x128xi1>, vector<16x128xf32>
    %238 = arith.truncf %237 : vector<16x128xf32> to vector<16x128xbf16>
    %239 = arith.index_cast %185 : i32 to index
    %c0_113 = arith.constant 0 : index
    %240 = vector.load %arg13[%239, %c0_113] : memref<64x128xbf16, #tpu.memory_space<vmem>>, vector<16x128xbf16>
    tpu.vector_store %arg13[%239, %c0_113], %238 {strides = array<i32>} : memref<64x128xbf16, #tpu.memory_space<vmem>>, vector<16x128xbf16>,
    %c4_i32_114 = arith.constant 4 : i32
    %c0_115 = arith.constant 0 : index
    %c0_116 = arith.constant 0 : index
    %241 = vector.load %arg13[%c0_115, %c0_116] : memref<64x128xbf16, #tpu.memory_space<vmem>>, vector<64x128xbf16>
    %c0_117 = arith.constant 0 : index
    %c0_118 = arith.constant 0 : index
    %242 = vector.load %arg7[%c0_117, %c0_118] : memref<128x128xbf16, #tpu.memory_space<vmem>>, vector<128x128xbf16>
    %cst_119 = arith.constant dense<0.000000e+00> : vector<64x128xf32>
    %243 = tpu.matmul %241, %242, %cst_119 {dimension_numbers = #tpu.dot_dimension_numbers<[1], [0], [0], [1], [0, 0, 1, 1], [], []>} : vector<64x128xbf16>, vector<128x128xbf16>, vector<64x128xf32> -> vector<64x128xf32>
    %c0_120 = arith.constant 0 : index
    %c0_121 = arith.constant 0 : index
    %244 = vector.load %arg8[%c0_120, %c0_121] : memref<1x128xf32, #tpu.memory_space<vmem>>, vector<1x128xf32>
    %245 = vector.broadcast %244 : vector<1x128xf32> to vector<64x128xf32>
    %246 = arith.addf %243, %245 : vector<64x128xf32>
    %247 = tpu.iota {dimensions = array<i32: 0>} : vector<64x1xi32>
    %c0_122 = arith.constant 0 : index
    %248 = memref.load %arg1[%c0_122] : memref<1xi32, #tpu.memory_space<smem>>
    %249 = arith.subi %248, %0 : i32
    %c16_i32_123 = arith.constant 16 : i32
    %250 = arith.muli %249, %c16_i32_123 : i32
    %251 = vector.broadcast %250 : i32 to vector<64x1xi32>
    %252 = arith.cmpi slt, %247, %251 : vector<64x1xi32>
    %cst_124 = arith.constant 0.000000e+00 : f32
    %253 = vector.shape_cast %252 : vector<64x1xi1> to vector<64x1xi1>
    %254 = vector.broadcast %253 : vector<64x1xi1> to vector<64x128xi1>
    %255 = vector.broadcast %cst_124 : f32 to vector<64x128xf32>
    %256 = arith.select %254, %246, %255 : vector<64x128xi1>, vector<64x128xf32>
    %c0_125 = arith.constant 0 : index
    %c0_126 = arith.constant 0 : index
    %257 = vector.load %arg9[%c0_125, %c0_126] : memref<64x128xf32, #tpu.memory_space<vmem>>, vector<64x128xf32>
    tpu.vector_store %arg9[%c0_125, %c0_126], %256 {strides = array<i32>} : memref<64x128xf32, #tpu.memory_space<vmem>>, vector<64x128xf32>,
    return
  }
  func.func @transform_0(%arg0: i32, %arg1: memref<1xi32, #tpu.memory_space<smem>>) -> (i32, i32) {
    %c0_i32 = arith.constant 0 : i32
    %c0_i32_0 = arith.constant 0 : i32
    %c0_i32_1 = arith.constant 0 : i32
    return %c0_i32, %c0_i32_0 : i32, i32
  }
  func.func @transform_1(%arg0: i32, %arg1: memref<1xi32, #tpu.memory_space<smem>>) -> (i32, i32) {
    %c0_i32 = arith.constant 0 : i32
    %c0_i32_0 = arith.constant 0 : i32
    return %arg0, %c0_i32 : i32, i32
  }
  func.func @transform_2(%arg0: i32, %arg1: memref<1xi32, #tpu.memory_space<smem>>) -> (i32, i32) {
    %c0_i32 = arith.constant 0 : i32
    %c0_i32_0 = arith.constant 0 : i32
    %c0_i32_1 = arith.constant 0 : i32
    return %c0_i32, %c0_i32_0 : i32, i32
  }
  func.func @transform_3(%arg0: i32, %arg1: memref<1xi32, #tpu.memory_space<smem>>) -> (i32, i32) {
    %c0_i32 = arith.constant 0 : i32
    %c0_i32_0 = arith.constant 0 : i32
    %c0_i32_1 = arith.constant 0 : i32
    return %c0_i32, %c0_i32_0 : i32, i32
  }
  func.func @transform_4(%arg0: i32, %arg1: memref<1xi32, #tpu.memory_space<smem>>) -> (i32, i32) {
    %c0_i32 = arith.constant 0 : i32
    %c0_i32_0 = arith.constant 0 : i32
    %c0_i32_1 = arith.constant 0 : i32
    return %c0_i32, %c0_i32_0 : i32, i32
  }
  func.func @transform_5(%arg0: i32, %arg1: memref<1xi32, #tpu.memory_space<smem>>) -> (i32, i32) {
    %c0_i32 = arith.constant 0 : i32
    %c0_i32_0 = arith.constant 0 : i32
    %c0_i32_1 = arith.constant 0 : i32
    return %c0_i32, %c0_i32_0 : i32, i32
  }
  func.func @transform_6(%arg0: i32, %arg1: memref<1xi32, #tpu.memory_space<smem>>) -> (i32, i32) {
    %c0_i32 = arith.constant 0 : i32
    %c0_i32_0 = arith.constant 0 : i32
    %c0_i32_1 = arith.constant 0 : i32
    return %c0_i32, %c0_i32_0 : i32, i32
  }
  func.func @transform_7(%arg0: i32, %arg1: memref<1xi32, #tpu.memory_space<smem>>) -> (i32, i32) {
    %c0_i32 = arith.constant 0 : i32
    %c0_i32_0 = arith.constant 0 : i32
    return %arg0, %c0_i32 : i32, i32
  }
}

</mosaic_0001>

<bundles_post_ra>
// kernel: tpu_custom_call.1
= control target key start
LH: loop header
LB: loop body
LE: loop exit
PB: predicated region body
PF: predicated region fallthrough
CT: control target
= control target key end

     0   :  { %s4163_s0 = inlined_call_operand.<no memory space> [shape: s32[1], index: 0, kind: input, shape index: {}]   ;;  %s4164_s1 = inlined_call_operand.vmem [shape: s32[16,1], index: 1, kind: input, shape index: {}]   ;;  %s4165_s2 = inlined_call_operand.hbm [shape: bf16[192,128], index: 2, kind: input, shape index: {}]   ;;  %s4166_s3 = inlined_call_operand.hbm [shape: bf16[128,512], index: 3, kind: input, shape index: {}]   ;;  %s4167_s4 = inlined_call_operand.hbm [shape: bf16[128,512], index: 4, kind: input, shape index: {}]   ;;  %s4168_s5 = inlined_call_operand.vmem [shape: f32[1,512], index: 5, kind: input, shape index: {}]   ;;  %s4169_s6 = inlined_call_operand.hbm [shape: bf16[128,128], index: 6, kind: input, shape index: {}]   ;;  %s4170_s7 = inlined_call_operand.vmem [shape: f32[1,128], index: 7, kind: input, shape index: {}]   ;;  %s4171_s8 = inlined_call_operand.hbm [shape: f32[192,128], index: 8, kind: output, shape index: {}]  }
   0x1   :  { %13 = sst [smem:[#allocation7]] %s4163_s0 }
   0x2   :  { %14 = vsyncpa [#allocation9], 0 }
   0x3   :  { %16 = vsyncpa [#allocation9 + $0x1], 0 }
   0x4   :  { %17 = vsyncpa [#allocation12], 0 }
   0x5   :  { %18 = vsyncpa [#allocation15], 0 }
   0x6   :  { %19 = vsyncpa [#allocation10], 0 }
   0x7   :  { %21 = vsyncpa [#allocation10 + $0x1], 0  ;;  %s3387_s29 = smov 0   ;;  %s3389_s30 = smov 0  }
   0x8   :  { %s3391_s9 = smov 0   ;;  %s3393_s10 = smov 0  }
   0x9 LB: > { %s3408_s0 = sadd.s32 4294967295, %s3324_s10   ;;  %s2567_s11 = sadd.s32 4294967294, %s3324_s10   ;;  %s3324_s10 = sphi %s3393_s10, %s4197_s10   ;;  %s3320_s9 = sphi %s3391_s9, %s4196_s9   ;;  %s3316_s30 = sphi %s3389_s30, %s4195_s30   ;;  %s3312_s29 = sphi %s3387_s29, %s4194_s29  }
   0xa   : > { %p68_p0 = scmp.ne.s32.totalorder %s3316_s30, %s3312_s29  ;;  %p4172_p1 = scmp.eq.s32.totalorder %s3408_s0, 0 }
   0xb   : > { %p203_p3 = scmp.eq.s32.totalorder %s2567_s11, 2  ;;  %p2568_p5 = scmp.ge.s32.totalorder %s3324_s10, 1 }
   0xc   : > { %p3417_p4 = por %p4172_p1, %p68_p0  ;;  %p210_p7 = scmp.lt.s32.totalorder %s3324_s10, 4 }
   0xd   : > { %p3422_p6 = por %p203_p3, %p68_p0  ;;  %s3326_s15 = smov [#allocation11]  }
   0xe   : > { %s4176_s12 = scalar_select %p3417_p4, 1, 0 }
   0xf   : > { %s4177_s13 = scalar_select %p3422_p6, 1, 0 }
  0x10   : > { %p3428_p9 = pnand %p2568_p5, %p210_p7  ;;  %s225_s16 = sshll.u32 %s3326_s15, 4  ;;  %s3432_s16 = int_to_ptr.vmem [resolvable:$true] %s225_s16 }
  0x11   : > { %4178 = sst [smem:[#allocation21_spill]] %s4177_s13  ;;  %s3327_s18 = smov [#allocation13]  }
  0x12   : > { %s4179_s14 = scalar_select %p3428_p9, 1, 0 }
  0x13   : > { %p2829_p10 = pneg %p3428_p9  ;;  %s238_s19 = sshll.u32 %s3327_s18, 4  ;;  %s3442_s19 = int_to_ptr.vmem [resolvable:$true] %s238_s19 }
  0x14   : > { %s3328_s20 = smov [#allocation14]   ;;  %s3136_s24 = scalar_lea.hbm %s4166_s3, 4096 }
  0x15   : > { %p3438_p11 = pnand %p2829_p10, %p4172_p1  ;;  %s3444_s21 = sshll.u32 %s3328_s20, 4  ;;  %s255_s21 = int_to_ptr.vmem [resolvable:$true] %s3444_s21 }
  0x16   : > { %p3137_p12 = scmp.ne.s32.totalorder %s4166_s3, %s3136_s24  ;;  %p3143_p5 = scmp.lt.u32.totalorder %s3136_s24, %s4166_s3 }
  0x17   : > { %p3454_p13 = pneg %p3438_p11 }
  0x19   : > { %p3139_p0 = pnand %p3454_p13, %p3137_p12 }
  0x1b   : > { %p3140_p3 = pneg %p3139_p0 }
  0x1d   : > { %p3145_p7 = pnand %p3143_p5, %p3140_p3 }
  0x1f   : > { %3148 = shalt.err (!%p3145_p7)
}
  0x20   : > { %s3149_s15 = scalar_lea.vmem %s3432_s16, 4096  ;;  %p3157_p2 = scmp.lt.s32.totalorder %s3432_s16, %s3432_s16 }
  0x21   : > { %p3150_p10 = scmp.ne.s32.totalorder %s3432_s16, %s3149_s15  ;;  %p3158_p6 = scmp.lt.s32.totalorder %s3149_s15, %s3149_s15 }
  0x23   : > { %p3152_p8 = pnand %p3150_p10, %p3454_p13  ;;  %p3159_p12 = por %p3158_p6, %p3157_p2 }
  0x25   : > { %p3153_p1 = pneg %p3152_p8 }
  0x27   : > { %p3160_p0 = pnand %p3159_p12, %p3153_p1 }
  0x29   : > { %3163 = shalt.err (!%p3160_p0)
}
  0x2a   : > { %s3329_s18 = smov 256   ;;  %s3330_s20 = smov 16  }
  0x2b   : > { %2832 = dma.hbm_to_vmem [thread:$0]  (!%p3438_p11), %s4166_s3, 4096, %s3432_s16, [#allocation12], %s3329_s18, %s3329_s18, %s3330_s20  }
  0x2c   : > { %s3164_s26 = scalar_lea.hbm %s4167_s4, 4096 }
  0x2d   : > { %p3165_p2 = scmp.ne.s32.totalorder %s4167_s4, %s3164_s26  ;;  %p3171_p8 = scmp.lt.u32.totalorder %s3164_s26, %s4167_s4 }
  0x2f   : > { %p3167_p1 = pnand %p3165_p2, %p3454_p13 }
  0x31   : > { %p3168_p6 = pneg %p3167_p1 }
  0x33   : > { %p3173_p3 = pnand %p3171_p8, %p3168_p6 }
  0x35   : > { %3176 = shalt.err (!%p3173_p3)
}
  0x36   : > { %s3177_s16 = scalar_lea.vmem %s3442_s19, 4096  ;;  %p3185_p12 = scmp.lt.s32.totalorder %s3442_s19, %s3442_s19 }
  0x37   : > { %p3178_p5 = scmp.ne.s32.totalorder %s3442_s19, %s3177_s16  ;;  %p3186_p0 = scmp.lt.s32.totalorder %s3177_s16, %s3177_s16 }
  0x39   : > { %p3180_p7 = pnand %p3178_p5, %p3454_p13  ;;  %p3187_p2 = por %p3186_p0, %p3185_p12 }
  0x3b   : > { %p3181_p10 = pneg %p3180_p7 }
  0x3d   : > { %p3188_p1 = pnand %p3187_p2, %p3181_p10 }
  0x3f   : > { %3191 = shalt.err (!%p3188_p1)
}
  0x40   : > { %2835 = dma.hbm_to_vmem [thread:$0]  (!%p3438_p11), %s4167_s4, 4096, %s3442_s19, [#allocation12], %s3329_s18, %s3329_s18, %s3330_s20  }
  0x41   : > { %s3192_s25 = scalar_lea.hbm %s4169_s6, 1024 }
  0x42   : > { %p3193_p6 = scmp.ne.s32.totalorder %s4169_s6, %s3192_s25  ;;  %p3199_p5 = scmp.lt.u32.totalorder %s3192_s25, %s4169_s6 }
  0x44   : > { %p3195_p8 = pnand %p3193_p6, %p3454_p13 }
  0x46   : > { %p3196_p3 = pneg %p3195_p8 }
  0x48   : > { %p3201_p7 = pnand %p3199_p5, %p3196_p3 }
  0x4a   : > { %3204 = shalt.err (!%p3201_p7)
}
  0x4b   : > { %s3205_s16 = scalar_lea.vmem %s255_s21, 1024  ;;  %p3213_p2 = scmp.lt.s32.totalorder %s255_s21, %s255_s21 }
  0x4c   : > { %p3206_p10 = scmp.ne.s32.totalorder %s255_s21, %s3205_s16  ;;  %p3214_p1 = scmp.lt.s32.totalorder %s3205_s16, %s3205_s16 }
  0x4e   : > { %p3208_p12 = pnand %p3206_p10, %p3454_p13  ;;  %p3215_p4 = por %p3214_p1, %p3213_p2 }
  0x50   : > { %p3209_p0 = pneg %p3208_p12 }
  0x52   : > { %p3216_p9 = pnand %p3215_p4, %p3209_p0 }
  0x54   : > { %3219 = shalt.err (!%p3216_p9)
}
  0x55   : > { %s3331_s19 = smov 64   ;;  %s3332_s27 = smov 4  }
  0x56   : > { %2838 = dma.hbm_to_vmem [thread:$0]  (!%p3438_p11), %s4169_s6, 1024, %s255_s21, [#allocation15], %s3331_s19, %s3331_s19, %s3332_s27  }
  0x57   : > { %s3521_s13 = sadd.s32 1, %s3324_s10   ;;  %s55_s23 = sadd.s32 1, %s3320_s9 }
  0x58   : > { %s52_s22 = ssub.s32 %s3324_s10, %s3521_s13  ;;  %p62_p9 = scmp.ne.s32.totalorder %s3320_s9, %s3316_s30 }
  0x59   : > { %p53_p4 = scmp.eq.s32.totalorder %s52_s22, 0  ;;  %p63_p13 = scmp.eq.s32.totalorder %s3324_s10, 0 }
  0x5a   : > { %p2850_p6 = scmp.lt.s32.totalorder %s3324_s10, 3  ;;  %p4182_p3 = scmp.eq.s32.totalorder %s3408_s0, 2 }
  0x5b   : > { %s3531_s24 = scalar_select %p53_p4, %s3320_s9, %s55_s23  }
  0x5c   : > { %p64_p8 = por %p63_p13, %p62_p9  ;;  %p3535_p5 = por %p4182_p3, %p62_p9 }
  0x5d   : > { %s271_s25 = sand.u32 1, %s3320_s9   ;;  %s2763_s26 = sshll.u32 %s3324_s10, 9 }
  0x5e   : > { %s2573_s21 = sshll.u32 %s271_s25, 5  ;;  %s3544_s15 = scalar_lea.hbm %s4165_s2, %s2763_s26 }
  0x5f   : > { %s275_s16 = scalar_lea.vmem [#allocation8], %s2573_s21  ;;  %p3546_p11 = pnand %p2850_p6, %p64_p8 }
  0x60   : > { %s282_s18 = sshll.u32 %s275_s16, 4  ;;  %s3552_s22 = scalar_lea.sflag [#allocation9], %s271_s25  ;;  %s3550_s18 = int_to_ptr.vmem [resolvable:$true] %s282_s18 }
  0x61   : > { %s3220_s23 = scalar_lea.hbm %s3544_s15, 512  ;;  %p3222_p10 = pneg %p3546_p11 }
  0x62   : > { %p3221_p7 = scmp.ne.s32.totalorder %s3544_s15, %s3220_s23  ;;  %s3225_s28 = scalar_lea.hbm %s4165_s2, 1536 }
  0x63   : > { %p3226_p2 = scmp.lt.u32.totalorder %s3544_s15, %s4165_s2  ;;  %p3227_p1 = scmp.lt.u32.totalorder %s3225_s28, %s3220_s23 }
  0x64   : > { %p3223_p12 = pnand %p3222_p10, %p3221_p7  ;;  %p3229_p9 = scmp.lt.u32.totalorder %s3220_s23, %s3544_s15 }
  0x65   : > { %p3228_p4 = por %p3227_p1, %p3226_p2 }
  0x66   : > { %p3224_p0 = pneg %p3223_p12 }
  0x67   : > { %p3230_p13 = por %p3229_p9, %p3228_p4 }
  0x69   : > { %p3231_p6 = pnand %p3230_p13, %p3224_p0 }
  0x6b   : > { %3234 = shalt.err (!%p3231_p6)
}
  0x6c   : > { %s3235_s25 = scalar_lea.vmem %s3550_s18, 512  ;;  %s3333_s26 = smov [#allocation8]  }
  0x6d   : > { %p3236_p8 = scmp.ne.s32.totalorder %s3550_s18, %s3235_s25  ;;  %s3240_s21 = sshll.u32 %s3333_s26, 4  ;;  %s3241_s21 = int_to_ptr.vmem [resolvable:$false] %s3240_s21 }
  0x6e   : > { %s3242_s11 = scalar_lea.vmem %s3241_s21, 1024  ;;  %p3243_p12 = scmp.lt.s32.totalorder %s3550_s18, %s3241_s21 }
  0x6f   : > { %p3238_p3 = pnand %p3236_p8, %p3222_p10  ;;  %p3244_p2 = scmp.lt.s32.totalorder %s3242_s11, %s3235_s25 }
  0x71   : > { %p3239_p7 = pneg %p3238_p3  ;;  %p3245_p1 = por %p3244_p2, %p3243_p12 }
  0x73   : > { %p3246_p4 = pnand %p3245_p1, %p3239_p7 }
  0x75   : > { %3249 = shalt.err (!%p3246_p4)
}
  0x76   : > { %2842 = dma.hbm_to_vmem [thread:$0]  (!%p3546_p11), %s3544_s15, 512, %s3550_s18, %s3552_s22, %s3331_s19, %s3331_s19, %s3332_s27  }
  0x77   : > { %p4185_p10 = scmp.ne.s32.totalorder %s4179_s14, 0 }
  0x78   : > { %s3586_s23 = sand.u32 (!%p4185_p10), 1, %s3316_s30   ;;  %p4186_p0 = scmp.ne.s32.totalorder (!%p4185_p10), %s4176_s12, 0 }
  0x79   : > { %294 = sbr.rel (%p4185_p10) target bundleno = 1488 (0x5d0), region = 48  ;;  %s2577_s28 = sshll.u32 (!%p4185_p10), %s3586_s23, 5 }
  0x7a   : > { %s297_s16 = scalar_lea.sflag (!%p4185_p10), [#allocation9], %s3586_s23  ;;  %s3590_s25 = scalar_lea.vmem (!%p4185_p10), [#allocation8], %s2577_s28 }
  0x80   : > { %3295 = dma.done.wait (%p4186_p0), %s297_s16, 512  }
  0x81   : > { %3297 = vsyncadd (%p4186_p0), %s297_s16, 4294966784  ;;  %p4187_p11 = scmp.eq.s32.totalorder %s3408_s0, 0 }
  0x83   : > { %3299 = dma.done.wait (%p4187_p11), [#allocation12], 8192   ;;  %p4188_p9 = pmov %p4187_p11 }
  0x85   : > { %3301 = vsyncadd (%p4188_p9), [#allocation12], 4294959104  ;;  %p4189_p13 = pmov %p4188_p9 }
  0x86   : > { %p4190_p6 = pmov %p4188_p9 }
  0x87   : > { %3303 = dma.done.wait (%p4189_p13), [#allocation15], 1024  }
  0x88   : > { %3305 = vsyncadd (%p4190_p6), [#allocation15], 4294966272  ;;  %s2581_s14 = sshll.u32 %s3586_s23, 6  ;;  %s3606_s19 = sshll.u32 %s3408_s0, 2 }
  0x89   : > { %s3608_s27 = scalar_lea.vmem [#allocation16], %s2581_s14  ;;  %p4191_p8 = scmp.ne.s32.totalorder %s3408_s0, 0 }
  0x8a   : > { %v3334_v0 = vmov (!%p4191_p8), 0.0  }
  0x8b   : > { %350 = sbr.rel (%p4191_p8) target bundleno = 146 (0x92), region = 68  ;;  %351 = vst [vmem:[#allocation2] sm:$0xff] (!%p4191_p8), %v3334_v0  ;;  %352 = vst [vmem:[#allocation2 + $0x8] sm:$0xff] (!%p4191_p8), %v3334_v0 }
  0x8c   : > { %353 = vst [vmem:[#allocation3] sm:$0xff] (!%p4191_p8), %v3334_v0  ;;  %354 = vst [vmem:[#allocation3 + $0x8] sm:$0xff] (!%p4191_p8), %v3334_v0 }
  0x92 PF: > { %v2900_v1 = vld [vmem:[#allocation11 + $0x4] ss:$16 sps:$4 sm:$0xff]   ;;  %v2902_v2 = vld [vmem:[#allocation11] ss:$16 sps:$4 sm:$0xff]   ;;  %v3335_v3 = vmov 0   ;;  %v3667_v37 = vld [vmem:[#allocation2 + $0x8] sm:$0xff]  ;;  %v1123_v48 = vstv %s3606_s19 }
  0x93   : > { %633 = vmatprep.mubr.bf16.mxu1 %v3335_v3  ;;  %1023 = vmatprep.mubr.bf16.mxu0 %v3335_v3  ;;  %v2903_v4 = vld [vmem:[#allocation11 + $0x24] ss:$16 sps:$4 sm:$0xff]   ;;  %v2905_v5 = vld [vmem:[#allocation11 + $0x20] ss:$16 sps:$4 sm:$0xff]   ;;  %v2948_v32 = vld [vmem:[#allocation11 + $0xc] ss:$16 sps:$4 sm:$0xff]  }
  0x94   : > { %601 = vmatprep.subr.bf16.mxu1 %v2900_v1  ;;  %2898 = vset.pattern.permute.xlu0 %v3335_v3  ;;  %v3615_v6 = vld [vmem:[#allocation13 + $0x4] ss:$16 sps:$4 sm:$0xff]   ;;  %v3617_v7 = vld [vmem:[#allocation13] ss:$16 sps:$4 sm:$0xff]   ;;  %v2946_v38 = vld [vmem:[#allocation11 + $0x8] ss:$16 sps:$4 sm:$0xff]  }
  0x95   : > { %602 = vmatpush1.bf16.msra.mxu1 %v2902_v2  ;;  %2899 = vset.pattern.permute.xlu1 %v3335_v3  ;;  %v2909_v8 = vld [vmem:[#allocation11 + $0x44] ss:$16 sps:$4 sm:$0xff]   ;;  %v3624_v10 = vld [vmem:[#allocation13 + $0x20] ss:$16 sps:$4 sm:$0xff]   ;;  %v2954_v39 = vld [vmem:[#allocation11 + $0x2c] ss:$16 sps:$4 sm:$0xff]  }
  0x96   : > { %603 = vmatprep.subr.bf16.mxu1 %v2903_v4  ;;  %991 = vmatprep.subr.bf16.mxu0 %v3615_v6  ;;  %v3622_v9 = vld [vmem:[#allocation13 + $0x24] ss:$16 sps:$4 sm:$0xff]   ;;  %v2911_v11 = vld [vmem:[#allocation11 + $0x40] ss:$16 sps:$4 sm:$0xff]   ;;  %v2952_v41 = vld [vmem:[#allocation11 + $0x28] ss:$16 sps:$4 sm:$0xff]  }
  0x97   : > { %992 = vmatpush1.bf16.msra.mxu0 %v3617_v7  ;;  %v2915_v12 = vld [vmem:[#allocation11 + $0x64] ss:$16 sps:$4 sm:$0xff]   ;;  %v3630_v14 = vld [vmem:[#allocation13 + $0x40] ss:$16 sps:$4 sm:$0xff]   ;;  %v2958_v42 = vld [vmem:[#allocation11 + $0x4c] ss:$16 sps:$4 sm:$0xff]  }
  0x98   : > { %993 = vmatprep.subr.bf16.mxu0 %v3622_v9  ;;  %v3627_v13 = vld [vmem:[#allocation13 + $0x44] ss:$16 sps:$4 sm:$0xff]   ;;  %v2917_v15 = vld [vmem:[#allocation11 + $0x60] ss:$16 sps:$4 sm:$0xff]   ;;  %v3680_v43 = vld [vmem:[%s3590_s25 + $0x8] sm:$0xff]   ;;  %s1490_s12 = sadd.s32 1, %s3606_s19 }
  0x99   : > { %604 = vmatpush1.bf16.msra.mxu1 %v2905_v5  ;;  %v3633_v16 = vld [vmem:[#allocation13 + $0x64] ss:$16 sps:$4 sm:$0xff]   ;;  %v3636_v18 = vld [vmem:[#allocation13 + $0x60] ss:$16 sps:$4 sm:$0xff]   ;;  %v2956_v44 = vld [vmem:[#allocation11 + $0x48] ss:$16 sps:$4 sm:$0xff]   ;;  %v1491_v49 = vstv %s1490_s12 }
  0x9a   : > { %605 = vmatprep.subr.bf16.mxu1 %v2909_v8  ;;  %v2921_v17 = vld [vmem:[#allocation11 + $0x84] ss:$16 sps:$4 sm:$0xff]   ;;  %v2923_v19 = vld [vmem:[#allocation11 + $0x80] ss:$16 sps:$4 sm:$0xff]   ;;  %v2961_v45 = vld [vmem:[#allocation11 + $0x6c] ss:$16 sps:$4 sm:$0xff]  }
  0x9b   : > { %994 = vmatpush1.bf16.msra.mxu0 %v3624_v10  ;;  %v3639_v20 = vld [vmem:[#allocation13 + $0x84] ss:$16 sps:$4 sm:$0xff]   ;;  %v3642_v22 = vld [vmem:[#allocation13 + $0x80] ss:$16 sps:$4 sm:$0xff]   ;;  %v2959_v46 = vld [vmem:[#allocation11 + $0x68] ss:$16 sps:$4 sm:$0xff]  }
  0x9c   : > { %995 = vmatprep.subr.bf16.mxu0 %v3627_v13  ;;  %v2927_v21 = vld [vmem:[#allocation11 + $0xa4] ss:$16 sps:$4 sm:$0xff]   ;;  %v2929_v23 = vld [vmem:[#allocation11 + $0xa0] ss:$16 sps:$4 sm:$0xff]   ;;  %v2965_v47 = vld [vmem:[#allocation11 + $0x8c] ss:$16 sps:$4 sm:$0xff]  }
  0x9d   : > { %606 = vmatpush1.bf16.msra.mxu1 %v2911_v11  ;;  %v3645_v24 = vld [vmem:[#allocation13 + $0xa4] ss:$16 sps:$4 sm:$0xff]   ;;  %v3648_v26 = vld [vmem:[#allocation13 + $0xa0] ss:$16 sps:$4 sm:$0xff]   ;;  %s1859_s15 = sadd.s32 2, %s3606_s19  ;;  %v780_v53 = vld [vmem:[%s4164_s1 + $0x8] sm:$0xff] }
  0x9e   : > { %607 = vmatprep.subr.bf16.mxu1 %v2915_v12  ;;  %v2933_v25 = vld [vmem:[#allocation11 + $0xc4] ss:$16 sps:$4 sm:$0xff]   ;;  %v2935_v27 = vld [vmem:[#allocation11 + $0xc0] ss:$16 sps:$4 sm:$0xff]   ;;  %v2963_v51 = vld [vmem:[#allocation11 + $0x88] ss:$16 sps:$4 sm:$0xff]   ;;  %vm1125_vm2 = vcmp.lt.s32.totalorder %v1123_v48, %v780_v53  ;;  %v1860_v58 = vstv %s1859_s15  ;;  %vm1493_vm3 = vcmp.lt.s32.totalorder %v1491_v49, %v780_v53 }
  0x9f   : > { %996 = vmatpush1.bf16.msra.mxu0 %v3630_v14  ;;  %v3651_v28 = vld [vmem:[#allocation13 + $0xc4] ss:$16 sps:$4 sm:$0xff]   ;;  %v2941_v30 = vld [vmem:[#allocation11 + $0xe0] ss:$16 sps:$4 sm:$0xff]   ;;  %v2968_v54 = vld [vmem:[#allocation11 + $0xac] ss:$16 sps:$4 sm:$0xff]   ;;  %vm1862_vm5 = vcmp.lt.s32.totalorder %v1860_v58, %v780_v53 }
  0xa0   : > { %997 = vmatprep.subr.bf16.mxu0 %v3633_v16  ;;  %v2939_v29 = vld [vmem:[#allocation11 + $0xe4] ss:$16 sps:$4 sm:$0xff]   ;;  %v3654_v31 = vld [vmem:[#allocation13 + $0xc0] ss:$16 sps:$4 sm:$0xff]   ;;  %s2228_s21 = sadd.s32 3, %s3606_s19  ;;  %v1127_v60 = vsel %vm1125_vm2, 1, %v3335_v3 }
  0xa1   : > { %608 = vmatpush1.bf16.msra.mxu1 %v2917_v15  ;;  %v3657_v33 = vld [vmem:[#allocation13 + $0xe4] ss:$16 sps:$4 sm:$0xff]   ;;  %v3662_v35 = vld [vmem:[#allocation13 + $0xe0] ss:$16 sps:$4 sm:$0xff]   ;;  %v2966_v55 = vld [vmem:[#allocation11 + $0xa8] ss:$16 sps:$4 sm:$0xff]   ;;  %v2229_v62 = vstv %s2228_s21 }
  0xa2   : > { %609 = vmatprep.subr.bf16.mxu1 %v2921_v17  ;;  %v3660_v34 = vld [vmem:[%s3590_s25] sm:$0xff]   ;;  %v3692_v50 = vld [vmem:[%s3590_s25 + $0x10] sm:$0xff]   ;;  %v2972_v59 = vld [vmem:[#allocation11 + $0xcc] ss:$16 sps:$4 sm:$0xff]   ;;  %v1495_v0 = vsel %vm1493_vm3, 1, %v3335_v3  ;;  %vm2231_vm6 = vcmp.lt.s32.totalorder %v2229_v62, %v780_v53  ;;  %v1864_v5 = vsel %vm1862_vm5, 1, %v3335_v3 }
  0xa3   : > { %998 = vmatpush1.bf16.msra.mxu0 %v3636_v18  ;;  %v3664_v36 = vld [vmem:[#allocation2] sm:$0xff]  ;;  %v3710_v61 = vld [vmem:[%s3590_s25 + $0x18] sm:$0xff]   ;;  %s4068_s16 = sld [smem:[#allocation7]]  ;;  %s2764_s15 = sshll.u32 %s3408_s0, 10 }
  0xa4   : > { %999 = vmatprep.subr.bf16.mxu0 %v3639_v20  ;;  %v3672_v40 = vpack.c.bf16 %v3667_v37, %v3664_v36  ;;  %v779_v52 = vld [vmem:[%s4164_s1] sm:$0xff]  ;;  %v2970_v63 = vld [vmem:[#allocation11 + $0xc8] ss:$16 sps:$4 sm:$0xff]   ;;  %v2975_v1 = vld [vmem:[#allocation11 + $0xec] ss:$16 sps:$4 sm:$0xff]   ;;  %s2462_s18 = sshll.u32 %s3608_s27, 4  ;;  %s4115_s0 = scalar_lea.hbm %s4171_s8, %s2764_s15  ;;  %s4117_s18 = int_to_ptr.vmem [resolvable:$true] %s2462_s18 }
  0xa5   : > { %610 = vmatpush1.bf16.msra.mxu1 %v2923_v19  ;;  %vm1124_vm0 = vcmp.lt.s32.totalorder %v1123_v48, %v779_v52  ;;  %vm1492_vm1 = vcmp.lt.s32.totalorder %v1491_v49, %v779_v52  ;;  %vm1861_vm4 = vcmp.lt.s32.totalorder %v1860_v58, %v779_v52  ;;  %vm2230_vm7 = vcmp.lt.s32.totalorder %v2229_v62, %v779_v52  ;;  %v2973_v4 = vld [vmem:[#allocation11 + $0xe8] ss:$16 sps:$4 sm:$0xff]   ;;  %v3739_v12 = vld [vmem:[#allocation13 + $0x4c] ss:$16 sps:$4 sm:$0xff]   ;;  %s2449_s26 = scalar_lea.sflag [#allocation10], %s3586_s23  ;;  %s3250_s21 = scalar_lea.vmem %s4117_s18, 1024 }
  0xa6   : > { %611 = vmatprep.subr.bf16.mxu1 %v2927_v21  ;;  %v1126_v56 = vsel %vm1124_vm0, 1, %v3335_v3  ;;  %v1494_v57 = vsel %vm1492_vm1, 1, %v3335_v3  ;;  %v1863_v2 = vsel %vm1861_vm4, 1, %v3335_v3  ;;  %v2232_v8 = vsel %vm2230_vm7, 1, %v3335_v3  ;;  %v3735_v11 = vld [vmem:[#allocation13 + $0x28] ss:$16 sps:$4 sm:$0xff]   ;;  %p3251_p3 = scmp.ne.s32.totalorder %s4117_s18, %s3250_s21 }
  0xa7   : > { %1000 = vmatpush1.bf16.msra.mxu0 %v3642_v22  ;;  %1129 = vperm.xlu0 %2898, %v1126_v56   ;;  %v3751_v15 = vld [vmem:[#allocation13 + $0x68] ss:$16 sps:$4 sm:$0xff]   ;;  %s3336_s11 = smov [#allocation16]  }
  0xa8   : > { %1001 = vmatprep.subr.bf16.mxu0 %v3645_v24  ;;  %1497 = vperm.xlu1 %2899, %v1494_v57   ;;  %v3758_v17 = vld [vmem:[#allocation13 + $0x88] ss:$16 sps:$4 sm:$0xff]   ;;  %p3252_p7 = pnand %p3251_p3, %p3535_p5  ;;  %s3254_s28 = sshll.u32 %s3336_s11, 4  ;;  %s3255_s28 = int_to_ptr.vmem [resolvable:$false] %s3254_s28 }
  0xa9   : > { %612 = vmatpush1.bf16.msra.mxu1 %v2929_v23  ;;  %v3765_v19 = vld [vmem:[#allocation13 + $0xa8] ss:$16 sps:$4 sm:$0xff]   ;;  %s2405_s25 = ssub.s32 %s4068_s16, %s3606_s19  ;;  %s3256_s16 = scalar_lea.vmem %s3255_s28, 2048 }
  0xaa   : > { %613 = vmatprep.subr.bf16.mxu1 %v2933_v25  ;;  %v3772_v21 = vld [vmem:[#allocation13 + $0xc8] ss:$16 sps:$4 sm:$0xff]   ;;  %s2757_s14 = sshll.u32 %s2405_s25, 4  ;;  %p3253_p12 = pneg %p3252_p7 }
  0xab   : > { %1002 = vmatpush1.bf16.msra.mxu0 %v3648_v26  ;;  %1132 = vperm.xlu0 %2898, %v1127_v60   ;;  %v3779_v23 = vld [vmem:[#allocation13 + $0xe8] ss:$16 sps:$4 sm:$0xff]   ;;  %p3257_p2 = scmp.lt.s32.totalorder %s4117_s18, %s3255_s28  ;;  %p3258_p1 = scmp.lt.s32.totalorder %s3256_s16, %s3250_s21 }
  0xac   : > { %1003 = vmatprep.subr.bf16.mxu0 %v3651_v28  ;;  %1500 = vperm.xlu1 %2899, %v1495_v0  }
  0xad   : > { %614 = vmatpush1.bf16.msra.mxu1 %v2935_v27  ;;  %v395_v27 = vld [vmem:[%s4168_s5] sm:$0xf]  ;;  %p3259_p4 = por %p3258_p1, %p3257_p2 }
  0xae   : > { %615 = vmatprep.subr.bf16.mxu1 %v2939_v29 }
  0xaf   : > { %1004 = vmatpush1.bf16.msra.mxu0 %v3654_v31  ;;  %1866 = vperm.xlu0 %2898, %v1863_v2   ;;  %p3260_p10 = pnand %p3259_p4, %p3253_p12 }
  0xb0   : > { %1005 = vmatprep.subr.bf16.mxu0 %v3657_v33  ;;  %1869 = vperm.xlu1 %2899, %v1864_v5  }
  0xb1   : > { %616 = vmatpush1.bf16.msra.mxu1 %v2941_v30 }
  0xb2   : > { %674 = vmatprep.subr.bf16.mxu1 %v2948_v32 }
  0xb3   : > { %1006 = vmatpush1.bf16.msra.mxu0 %v3662_v35  ;;  %2235 = vperm.xlu0 %2898, %v2232_v8  }
  0xb4   : > { %634 = vmatmul.mubr.bf16.vlgmr.msra.gmra.mrb[0].mxu1 %v3660_v34  ;;  %1358 = vmatprep.subr.bf16.mxu0 %v3615_v6  ;;  %v3719_v6 = vld [vmem:[#allocation13 + $0xc] ss:$16 sps:$4 sm:$0xff]  }
  0xb5   : > { %675 = vmatpush1.bf16.msra.mxu1 %v2946_v38  ;;  %643 = vmatprep.mubr.bf16.mxu1 %v3335_v3 }
  0xb6   : > { %676 = vmatprep.subr.bf16.mxu1 %v2954_v39  ;;  %1024 = vmatmul.mubr.bf16.vlgmr.msra.gmra.mrb[0].mxu0 %v3672_v40 }
  0xb7   : > { %1359 = vmatpush1.bf16.msra.mxu0 %v3617_v7  ;;  %1390 = vmatprep.mubr.bf16.mxu0 %v3335_v3  ;;  %v2233_v7 = vsel %vm2231_vm6, 1, %v3335_v3 }
  0xb8   : > { %1360 = vmatprep.subr.bf16.mxu0 %v3622_v9  ;;  %v3724_v9 = vld [vmem:[#allocation13 + $0x8] ss:$16 sps:$4 sm:$0xff]   ;;  %2238 = vperm.xlu1 %2899, %v2233_v7  }
  0xb9   : > { %677 = vmatpush1.bf16.msra.mxu1 %v2952_v41 }
  0xba   : > { %678 = vmatprep.subr.bf16.mxu1 %v2958_v42 }
  0xbb   : > { %1361 = vmatpush1.bf16.msra.mxu0 %v3624_v10  ;;  %v3730_v10 = vld [vmem:[#allocation13 + $0x2c] ss:$16 sps:$4 sm:$0xff]  }
  0xbc   : > { %644 = vmatmul.mubr.bf16.gmra.mrb[4].mxu1 %v3680_v43  ;;  %1362 = vmatprep.subr.bf16.mxu0 %v3627_v13  ;;  %v3744_v13 = vld [vmem:[#allocation13 + $0x48] ss:$16 sps:$4 sm:$0xff]  }
  0xbd   : > { %679 = vmatpush1.bf16.msra.mxu1 %v2956_v44  ;;  %653 = vmatprep.mubr.bf16.mxu1 %v3335_v3 }
  0xbe   : > { %680 = vmatprep.subr.bf16.mxu1 %v2961_v45 }
  0xbf   : > { %1363 = vmatpush1.bf16.msra.mxu0 %v3630_v14  ;;  %v3747_v14 = vld [vmem:[#allocation13 + $0x6c] ss:$16 sps:$4 sm:$0xff]  }
  0xc0   : > { %1364 = vmatprep.subr.bf16.mxu0 %v3633_v16  ;;  %v3755_v16 = vld [vmem:[#allocation13 + $0x8c] ss:$16 sps:$4 sm:$0xff]  }
  0xc1   : > { %681 = vmatpush1.bf16.msra.mxu1 %v2959_v46 }
  0xc2   : > { %682 = vmatprep.subr.bf16.mxu1 %v2965_v47 }
  0xc3   : > { %1365 = vmatpush1.bf16.msra.mxu0 %v3636_v18  ;;  %v3761_v18 = vld [vmem:[#allocation13 + $0xac] ss:$16 sps:$4 sm:$0xff]  }
  0xc4   : > { %654 = vmatmul.mubr.bf16.gmra.mrb[8].mxu1 %v3692_v50  ;;  %1366 = vmatprep.subr.bf16.mxu0 %v3639_v20  ;;  %v3769_v20 = vld [vmem:[#allocation13 + $0xcc] ss:$16 sps:$4 sm:$0xff]  }
  0xc5   : > { %683 = vmatpush1.bf16.msra.mxu1 %v2963_v51  ;;  %663 = vmatprep.mubr.bf16.mxu1 %v3335_v3 }
  0xc6   : > { %684 = vmatprep.subr.bf16.mxu1 %v2968_v54 }
  0xc7   : > { %1367 = vmatpush1.bf16.msra.mxu0 %v3642_v22  ;;  %v3775_v22 = vld [vmem:[#allocation13 + $0xec] ss:$16 sps:$4 sm:$0xff]  }
  0xc8   : > { %1368 = vmatprep.subr.bf16.mxu0 %v3645_v24  ;;  %v397_v24 = vlaneseq }
  0xc9   : > { %685 = vmatpush1.bf16.msra.mxu1 %v2966_v55 }
  0xca   : > { %686 = vmatprep.subr.bf16.mxu1 %v2972_v59  ;;  %v3803_v25 = vshrl.u32 %v397_v24, 7 }
  0xcb   : > { %1369 = vmatpush1.bf16.msra.mxu0 %v3648_v26 }
  0xcc   : > { %664 = vmatmul.mubr.bf16.gmra.mrb[12].mxu1 %v3710_v61  ;;  %1370 = vmatprep.subr.bf16.mxu0 %v3651_v28  ;;  %v399_v26 = vsub.s32 0, %v3803_v25  ;;  %v403_v28 = vsub.s32 1, %v3803_v25 }
  0xcd   : > { %687 = vmatpush1.bf16.msra.mxu1 %v2970_v63  ;;  %706 = vmatprep.mubr.bf16.mxu1 %v3335_v3 }
  0xce   : > { %688 = vmatprep.subr.bf16.mxu1 %v2975_v1  ;;  %v400_v29 = vrot.slane %v395_v27, %v399_v26 }
  0xcf   : > { %1371 = vmatpush1.bf16.msra.mxu0 %v3654_v31  ;;  %v404_v31 = vrot.slane %v395_v27, %v403_v28 }
  0xd0   : > { %1372 = vmatprep.subr.bf16.mxu0 %v3657_v33 }
  0xd1   : > { %689 = vmatpush1.bf16.msra.mxu1 %v2973_v4 }
  0xd2   : > { %1034 = vmatprep.subr.bf16.mxu1 %v3719_v6 }
  0xd3   : > { %1373 = vmatpush1.bf16.msra.mxu0 %v3662_v35 }
  0xd4   : > { %707 = vmatmul.mubr.bf16.vlgmr.msra.gmra.mrb[16].mxu1 %v3660_v34 }
  0xd5   : > { %1035 = vmatpush1.bf16.msra.mxu1 %v3724_v9  ;;  %716 = vmatprep.mubr.bf16.mxu1 %v3335_v3 }
  0xd6   : > { %1036 = vmatprep.subr.bf16.mxu1 %v3730_v10 }
  0xd9   : > { %1037 = vmatpush1.bf16.msra.mxu1 %v3735_v11 }
  0xda   : > { %1038 = vmatprep.subr.bf16.mxu1 %v3739_v12 }
  0xdc   : > { %717 = vmatmul.mubr.bf16.gmra.mrb[20].mxu1 %v3680_v43 }
  0xdd   : > { %1039 = vmatpush1.bf16.msra.mxu1 %v3744_v13  ;;  %726 = vmatprep.mubr.bf16.mxu1 %v3335_v3 }
  0xde   : > { %1040 = vmatprep.subr.bf16.mxu1 %v3747_v14 }
  0xe1   : > { %1041 = vmatpush1.bf16.msra.mxu1 %v3751_v15 }
  0xe2   : > { %1042 = vmatprep.subr.bf16.mxu1 %v3755_v16 }
  0xe4   : > { %727 = vmatmul.mubr.bf16.gmra.mrb[24].mxu1 %v3692_v50 }
  0xe5   : > { %1043 = vmatpush1.bf16.msra.mxu1 %v3758_v17  ;;  %736 = vmatprep.mubr.bf16.mxu1 %v3335_v3 }
  0xe6   : > { %1044 = vmatprep.subr.bf16.mxu1 %v3761_v18 }
  0xe9   : > { %1045 = vmatpush1.bf16.msra.mxu1 %v3765_v19 }
  0xea   : > { %1046 = vmatprep.subr.bf16.mxu1 %v3769_v20 }
  0xec   : > { %737 = vmatmul.mubr.bf16.gmra.mrb[28].mxu1 %v3710_v61 }
  0xed   : > { %1047 = vmatpush1.bf16.msra.mxu1 %v3772_v21  ;;  %1066 = vmatprep.mubr.bf16.mxu1 %v3335_v3 }
  0xee   : > { %1048 = vmatprep.subr.bf16.mxu1 %v3775_v22 }
  0xf1   : > { %1049 = vmatpush1.bf16.msra.mxu1 %v3779_v23 }
  0xf2   : > { %1401 = vmatprep.subr.bf16.mxu1 %v3719_v6 }
  0xf4   : > { %1067 = vmatmul.mubr.bf16.vlgmr.msra.gmra.mrb[32].mxu1 %v3672_v40 }
  0xf5   : > { %1402 = vmatpush1.bf16.msra.mxu1 %v3724_v9  ;;  %1433 = vmatprep.mubr.bf16.mxu1 %v3335_v3 }
  0xf6   : > { %1403 = vmatprep.subr.bf16.mxu1 %v3730_v10 }
  0xf9   : > { %1404 = vmatpush1.bf16.msra.mxu1 %v3735_v11 }
  0xfa   : > { %1405 = vmatprep.subr.bf16.mxu1 %v3739_v12 }
  0xfd   : > { %1406 = vmatpush1.bf16.msra.mxu1 %v3744_v13 }
  0xfe   : > { %1407 = vmatprep.subr.bf16.mxu1 %v3747_v14 }
 0x101   : > { %1408 = vmatpush1.bf16.msra.mxu1 %v3751_v15 }
 0x102   : > { %1409 = vmatprep.subr.bf16.mxu1 %v3755_v16 }
 0x105   : > { %1410 = vmatpush1.bf16.msra.mxu1 %v3758_v17 }
 0x106   : > { %1411 = vmatprep.subr.bf16.mxu1 %v3761_v18 }
 0x109   : > { %1412 = vmatpush1.bf16.msra.mxu1 %v3765_v19 }
 0x10a   : > { %1413 = vmatprep.subr.bf16.mxu1 %v3769_v20 }
 0x10d   : > { %1414 = vmatpush1.bf16.msra.mxu1 %v3772_v21 }
 0x10e   : > { %1415 = vmatprep.subr.bf16.mxu1 %v3775_v22 }
 0x111   : > { %1416 = vmatpush1.bf16.msra.mxu1 %v3779_v23 }
 0x112   : > { %1770 = vmatprep.subr.bf16.mxu1 %v3719_v6 }
 0x187   : > { %v635_v30 = vpop.f32.mrb[0].mxu1 }
 0x188   : > { %v637_v32 = vpop.f32.mrb[1].mxu1  ;;  %v636_v34 = vadd.f32 %v635_v30, %v400_v29 }
 0x189   : > { %v639_v33 = vpop.f32.mrb[2].mxu1  ;;  %v1025_v39 = vpop.f32.mrb[0].mxu0  ;;  %v638_v40 = vadd.f32 %v637_v32, %v404_v31 }
 0x18a   : > { %v640_v35 = vadd.f32 %v639_v33, %v400_v29  ;;  %v641_v38 = vpop.f32.mrb[3].mxu1  ;;  %v1027_v42 = vpop.f32.mrb[1].mxu0 }
 0x18b   : > { %v642_v41 = vadd.f32 %v641_v38, %v404_v31  ;;  %v1029_v44 = vpop.f32.mrb[2].mxu0 }
 0x18c   : > { %v747_v43 = vpack.c.bf16 %v640_v35, %v636_v34  ;;  %v1031_v46 = vpop.f32.mrb[3].mxu0 }
 0x18d   : > { %v748_v45 = vpack.c.bf16 %v642_v41, %v638_v40  ;;  %v407_v40 = vsub.s32 2, %v3803_v25 }
 0x18e   : > { %v788_v47 = vunpack.c.l.bf16 %v747_v43  ;;  %v792_v48 = vunpack.c.h.bf16 %v747_v43 }
 0x18f   : > { %v789_v49 = vunpack.c.l.bf16 %v748_v45  ;;  %v645_v50 = vpop.f32.mrb[4].mxu1  ;;  %v793_v51 = vunpack.c.h.bf16 %v748_v45  ;;  %v408_v45 = vrot.slane %v395_v27, %v407_v40 }
 0x190   : > { %v3810_v52 = vadd.f32 %v1025_v39, %v788_v47  ;;  %v646_v53 = vadd.f32 %v645_v50, %v400_v29  ;;  %v3812_v54 = vadd.f32 %v1029_v44, %v792_v48  ;;  %v647_v55 = vpop.f32.mrb[5].mxu1 }
 0x191   : > { %v1078_v56 = vadd.f32 %v1027_v42, %v789_v49  ;;  %v648_v57 = vadd.f32 %v647_v55, %v404_v31  ;;  %v3814_v58 = vadd.f32 %v1031_v46, %v793_v51  ;;  %v649_v59 = vpop.f32.mrb[6].mxu1  ;;  %v411_v42 = vsub.s32 3, %v3803_v25 }
 0x192   : > { %v650_v60 = vadd.f32 %v649_v59, %v400_v29  ;;  %v651_v61 = vpop.f32.mrb[7].mxu1  ;;  %v1085_v40 = vmul.f32 0.5, %v3810_v52 }
 0x193   : > { %v652_v62 = vadd.f32 %v651_v61, %v404_v31  ;;  %v412_v47 = vrot.slane %v395_v27, %v411_v42  ;;  %v1094_v42 = vmul.f32 0.5, %v3814_v58 }
 0x194   : > { %v3816_v63 = vpack.c.bf16 %v650_v60, %v646_v53 }
 0x195   : > { %v3818_v0 = vpack.c.bf16 %v652_v62, %v648_v57 }
 0x197   : > { %v655_v1 = vpop.f32.mrb[8].mxu1 }
 0x198   : > { %v656_v2 = vadd.f32 %v655_v1, %v400_v29  ;;  %v657_v4 = vpop.f32.mrb[9].mxu1 }
 0x199   : > { %v658_v5 = vadd.f32 %v657_v4, %v404_v31  ;;  %v659_v6 = vpop.f32.mrb[10].mxu1 }
 0x19a   : > { %v660_v7 = vadd.f32 %v659_v6, %v400_v29  ;;  %v661_v8 = vpop.f32.mrb[11].mxu1 }
 0x19b   : > { %v662_v24 = vadd.f32 %v661_v8, %v404_v31 }
 0x19c   : > { %v3820_v26 = vpack.c.bf16 %v660_v7, %v656_v2 }
 0x19d   : > { %v3822_v28 = vpack.c.bf16 %v662_v24, %v658_v5 }
 0x19f   : > { %v665_v30 = vpop.f32.mrb[12].mxu1 }
 0x1a0   : > { %v666_v32 = vadd.f32 %v665_v30, %v400_v29  ;;  %v667_v33 = vpop.f32.mrb[13].mxu1 }
 0x1a1   : > { %v668_v34 = vadd.f32 %v667_v33, %v404_v31  ;;  %v669_v35 = vpop.f32.mrb[14].mxu1 }
 0x1a2   : > { %v670_v38 = vadd.f32 %v669_v35, %v400_v29  ;;  %v671_v39 = vpop.f32.mrb[15].mxu1 }
 0x1a3   : > { %v672_v41 = vadd.f32 %v671_v39, %v404_v31 }
 0x1a4   : > { %v3826_v43 = vpack.c.bf16 %v670_v38, %v666_v32  ;;  %v1093_v38 = vmul.f32 0.5, %v1078_v56 }
 0x1a5   : > { %v3828_v44 = vpack.c.bf16 %v672_v41, %v668_v34 }
 0x1a6   : > { %3056 = vtanh.f32 %v1093_v38 }
 0x1a7   : > { %v708_v46 = vpop.f32.mrb[16].mxu1  ;;  %3058 = vtanh.f32 %v1085_v40 }
 0x1a8   : > { %v710_v48 = vpop.f32.mrb[17].mxu1  ;;  %v709_v50 = vadd.f32 %v708_v46, %v408_v45  ;;  %3060 = vtanh.f32 %v1094_v42 }
 0x1a9   : > { %v712_v49 = vpop.f32.mrb[18].mxu1  ;;  %v711_v55 = vadd.f32 %v710_v48, %v412_v47  ;;  %v1086_v48 = vmul.f32 0.5, %v3812_v54 }
 0x1aa   : > { %v713_v51 = vadd.f32 %v712_v49, %v408_v45  ;;  %v714_v53 = vpop.f32.mrb[19].mxu1 }
 0x1ab   : > { %v715_v29 = vadd.f32 %v714_v53, %v412_v47  ;;  %3062 = vtanh.f32 %v1086_v48 }
 0x1ac   : > { %v749_v57 = vpack.c.bf16 %v713_v51, %v709_v50 }
 0x1ad   : > { %v750_v59 = vpack.c.bf16 %v715_v29, %v711_v55 }
 0x1ae   : > { %v794_v54 = vunpack.c.h.bf16 %v749_v57 }
 0x1af   : > { %v718_v60 = vpop.f32.mrb[20].mxu1 }
 0x1b0   : > { %v719_v31 = vadd.f32 %v718_v60, %v408_v45  ;;  %v720_v61 = vpop.f32.mrb[21].mxu1 }
 0x1b1   : > { %v721_v62 = vadd.f32 %v720_v61, %v412_v47  ;;  %v722_v1 = vpop.f32.mrb[22].mxu1  ;;  %v791_v61 = vunpack.c.l.bf16 %v750_v59 }
 0x1b2   : > { %v723_v2 = vadd.f32 %v722_v1, %v408_v45  ;;  %v724_v4 = vpop.f32.mrb[23].mxu1 }
 0x1b3   : > { %v725_v5 = vadd.f32 %v724_v4, %v412_v47 }
 0x1b4   : > { %v3830_v6 = vpack.c.bf16 %v723_v2, %v719_v31  ;;  %v790_v31 = vunpack.c.l.bf16 %v749_v57  ;;  %v3845_v57 = vld [vmem:[#allocation3] sm:$0xff] }
 0x1b5   : > { %v3832_v27 = vpack.c.bf16 %v725_v5, %v721_v62  ;;  %v795_v5 = vunpack.c.h.bf16 %v750_v59 }
 0x1b7   : > { %v728_v7 = vpop.f32.mrb[24].mxu1 }
 0x1b8   : > { %v729_v8 = vadd.f32 %v728_v7, %v408_v45  ;;  %v730_v24 = vpop.f32.mrb[25].mxu1  ;;  %v3057_v7 = vpop.eup %3056 }
 0x1b9   : > { %v731_v30 = vadd.f32 %v730_v24, %v412_v47  ;;  %v732_v32 = vpop.f32.mrb[26].mxu1  ;;  %v3059_v24 = vpop.eup %3058 }
 0x1ba   : > { %v733_v33 = vadd.f32 %v732_v32, %v408_v45  ;;  %v734_v34 = vpop.f32.mrb[27].mxu1  ;;  %v1097_v32 = vmul.f32 0.5, %v3057_v7 }
 0x1bb   : > { %v735_v35 = vadd.f32 %v734_v34, %v412_v47 }
 0x1bc   : > { %v3834_v39 = vpack.c.bf16 %v733_v33, %v729_v8  ;;  %v1099_v42 = vadd.f32 0.5, %v1097_v32 }
 0x1bd   : > { %v3837_v41 = vpack.c.bf16 %v735_v35, %v731_v30  ;;  %v3061_v30 = vpop.eup %3060  ;;  %v1089_v35 = vmul.f32 0.5, %v3059_v24 }
 0x1be   : > { %v3063_v34 = vpop.eup %3062  ;;  %v1098_v38 = vmul.f32 0.5, %v3061_v30 }
 0x1bf   : > { %v738_v46 = vpop.f32.mrb[28].mxu1  ;;  %v1091_v59 = vadd.f32 0.5, %v1089_v35 }
 0x1c0   : > { %v739_v49 = vadd.f32 %v738_v46, %v408_v45  ;;  %v740_v50 = vpop.f32.mrb[29].mxu1  ;;  %v1090_v46 = vmul.f32 0.5, %v3063_v34  ;;  %v1100_v48 = vadd.f32 0.5, %v1098_v38  ;;  %v1157_v38 = vunpack.c.l.bf16 %v3830_v6 }
 0x1c1   : > { %v741_v51 = vadd.f32 %v740_v50, %v412_v47  ;;  %v742_v53 = vpop.f32.mrb[30].mxu1  ;;  %v3847_v50 = vld [vmem:[#allocation3 + $0x8] sm:$0xff] }
 0x1c2   : > { %v743_v55 = vadd.f32 %v742_v53, %v408_v45  ;;  %v744_v56 = vpop.f32.mrb[31].mxu1  ;;  %v1113_v53 = vmul.f32 %v3845_v57, %v1099_v42 }
 0x1c3   : > { %v745_v29 = vadd.f32 %v744_v56, %v412_v47 }
 0x1c4   : > { %v3841_v60 = vpack.c.bf16 %v743_v55, %v739_v49 }
 0x1c5   : > { %v3843_v52 = vpack.c.bf16 %v745_v29, %v741_v51  ;;  %v1092_v51 = vadd.f32 0.5, %v1090_v46  ;;  %v1156_v46 = vunpack.c.l.bf16 %v3818_v0 }
 0x1c7   : > { %v1068_v58 = vpop.f32.mrb[32].mxu1 }
 0x1c8   : > { %v1079_v62 = vadd.f32 %v1068_v58, %v790_v31  ;;  %v1070_v1 = vpop.f32.mrb[33].mxu1  ;;  %v1114_v31 = vmul.f32 %v3847_v50, %v1100_v48 }
 0x1c9   : > { %v1080_v2 = vadd.f32 %v1070_v1, %v791_v61  ;;  %v1072_v4 = vpop.f32.mrb[34].mxu1 }
 0x1ca   : > { %3064 = vtanh.f32 %v1079_v62  ;;  %v1083_v8 = vadd.f32 %v1072_v4, %v794_v54  ;;  %v1074_v45 = vpop.f32.mrb[35].mxu1 }
 0x1cb   : > { %v1084_v47 = vadd.f32 %v1074_v45, %v795_v5  ;;  %v1103_v33 = vmul.f32 0.5, %v1080_v2  ;;  %v3857_v2 = vpop.permute.xlu0 %1129 }
 0x1cc   : > { %3066 = vtanh.f32 %v1083_v8  ;;  %vm1134_vm8 = vcmp.eq.s32.totalorder %v3857_v2, 1  ;;  %v3053_v2 = vld [vmem:[#allocation14 + $0x28] sm:$0xff]  }
 0x1cd   : > { %v1104_v40 = vmul.f32 0.5, %v1084_v47  ;;  %3068 = vtanh.f32 %v1103_v33 }
 0x1cf   : > { %3070 = vtanh.f32 %v1104_v40  ;;  %v3861_v24 = vpop.permute.xlu0 %1132 }
 0x1d0   : > { %vm1135_vm9 = vcmp.eq.s32.totalorder %v3861_v24, 1  ;;  %v3054_v24 = vld [vmem:[#allocation14 + $0x30] sm:$0xff]  }
 0x1d1   : > { %vm2765_vm14 = vmpackc.low %vm1135_vm9, %vm1134_vm8 }
 0x1d4   : > { %v3065_v49 = vpop.eup %3064 }
 0x1d5   : > { %v1115_v55 = vmul.f32 %v3065_v49, %v1091_v59  ;;  %v1158_v59 = vunpack.c.l.bf16 %v3832_v27 }
 0x1d6   : > { %v3067_v56 = vpop.eup %3066 }
 0x1d7   : > { %v3850_v29 = vadd.f32 %v1115_v55, %v1113_v53  ;;  %v1116_v58 = vmul.f32 %v3067_v56, %v1092_v51  ;;  %v3069_v62 = vpop.eup %3068  ;;  %v1159_v55 = vunpack.c.h.bf16 %v3816_v63  ;;  %v1161_v56 = vunpack.c.h.bf16 %v3830_v6 }
 0x1d8   : > { %v1107_v54 = vmul.f32 0.5, %v3069_v62 }
 0x1d9   : > { %3072 = vtanh.f32 %v3850_v29  ;;  %v3854_v61 = vadd.f32 %v1116_v58, %v1114_v31  ;;  %v3071_v1 = vpop.eup %3070 }
 0x1da   : > { %v1108_v4 = vmul.f32 0.5, %v3071_v1  ;;  %v1109_v5 = vadd.f32 0.5, %v1107_v54  ;;  %v1160_v54 = vunpack.c.h.bf16 %v3818_v0 }
 0x1db   : > { %3074 = vtanh.f32 %v3854_v61 }
 0x1dc   : > { %v1110_v8 = vadd.f32 0.5, %v1108_v4  ;;  %v1162_v4 = vunpack.c.h.bf16 %v3832_v27 }
 0x1e3   : > { %v3073_v7 = vpop.eup %3072 }
 0x1e4   : > { %v3859_v45 = vmul.f32 %v3073_v7, %v1109_v5 }
 0x1e5   : > { %v3075_v47 = vpop.eup %3074 }
 0x1e6   : > { %v3863_v30 = vmul.f32 %v3075_v47, %v1110_v8  ;;  %v3871_v32 = vsel %vm1134_vm8, %v3859_v45, %v3664_v36  ;;  %v3002_v36 = vld [vmem:[#allocation13 + $0x4] ss:$16 sps:$4 sm:$0xff]  }
 0x1e7   : > { %1727 = vmatprep.subr.bf16.mxu0 %v3002_v36 }
 0x1e8   : > { %v3877_v33 = vsel %vm1135_vm9, %v3863_v30, %v3667_v37  ;;  %v2766_v34 = vpack.c.bf16 %v3863_v30, %v3859_v45  ;;  %v3900_v37 = vld [vmem:[#allocation13] ss:$16 sps:$4 sm:$0xff]   ;;  %v1893_v45 = vunpack.c.l.bf16 %v3826_v43  ;;  %v1895_v30 = vunpack.c.l.bf16 %v3841_v60 }
 0x1e9   : > { %v1165_v35 = vpack.c.bf16 %v3877_v33, %v3871_v32 }
 0x1eb   : > { %1391 = vmatmul.mubr.bf16.vlgmr.msra.gmra.mrb[4].mxu0 %v1165_v35  ;;  %1434 = vmatmul.mubr.bf16.vlgmr.msra.gmra.mrb[36].mxu1 %v1165_v35 }
 0x1ec   : > { %1771 = vmatpush1.bf16.msra.mxu1 %v3724_v9  ;;  %1759 = vmatprep.mubr.bf16.mxu0 %v3335_v3  ;;  %v3903_v9 = vld [vmem:[#allocation13 + $0x24] ss:$16 sps:$4 sm:$0xff]  }
 0x1ed   : > { %1772 = vmatprep.subr.bf16.mxu1 %v3730_v10  ;;  %1802 = vmatprep.mubr.bf16.mxu1 %v3335_v3  ;;  %v3905_v10 = vld [vmem:[#allocation13 + $0x20] ss:$16 sps:$4 sm:$0xff]  }
 0x1ee   : > { %1728 = vmatpush1.bf16.msra.mxu0 %v3900_v37 }
 0x1ef   : > { %1729 = vmatprep.subr.bf16.mxu0 %v3903_v9 }
 0x1f0   : > { %1773 = vmatpush1.bf16.msra.mxu1 %v3735_v11  ;;  %v3909_v11 = vld [vmem:[#allocation13 + $0x44] ss:$16 sps:$4 sm:$0xff]  }
 0x1f1   : > { %1774 = vmatprep.subr.bf16.mxu1 %v3739_v12  ;;  %v3911_v12 = vld [vmem:[#allocation13 + $0x40] ss:$16 sps:$4 sm:$0xff]  }
 0x1f2   : > { %1730 = vmatpush1.bf16.msra.mxu0 %v3905_v10 }
 0x1f3   : > { %1731 = vmatprep.subr.bf16.mxu0 %v3909_v11 }
 0x1f4   : > { %1775 = vmatpush1.bf16.msra.mxu1 %v3744_v13  ;;  %v3915_v13 = vld [vmem:[#allocation13 + $0x64] ss:$16 sps:$4 sm:$0xff]  }
 0x1f5   : > { %1776 = vmatprep.subr.bf16.mxu1 %v3747_v14  ;;  %v3917_v14 = vld [vmem:[#allocation13 + $0x60] ss:$16 sps:$4 sm:$0xff]  }
 0x1f6   : > { %1732 = vmatpush1.bf16.msra.mxu0 %v3911_v12 }
 0x1f7   : > { %1733 = vmatprep.subr.bf16.mxu0 %v3915_v13 }
 0x1f8   : > { %1777 = vmatpush1.bf16.msra.mxu1 %v3751_v15  ;;  %v3921_v15 = vld [vmem:[#allocation13 + $0x84] ss:$16 sps:$4 sm:$0xff]  }
 0x1f9   : > { %1778 = vmatprep.subr.bf16.mxu1 %v3755_v16  ;;  %v3923_v16 = vld [vmem:[#allocation13 + $0x80] ss:$16 sps:$4 sm:$0xff]  }
 0x1fa   : > { %1734 = vmatpush1.bf16.msra.mxu0 %v3917_v14 }
 0x1fb   : > { %1735 = vmatprep.subr.bf16.mxu0 %v3921_v15 }
 0x1fc   : > { %1779 = vmatpush1.bf16.msra.mxu1 %v3758_v17  ;;  %v3927_v17 = vld [vmem:[#allocation13 + $0xa4] ss:$16 sps:$4 sm:$0xff]  }
 0x1fd   : > { %1780 = vmatprep.subr.bf16.mxu1 %v3761_v18  ;;  %v3929_v18 = vld [vmem:[#allocation13 + $0xa0] ss:$16 sps:$4 sm:$0xff]  }
 0x1fe   : > { %1736 = vmatpush1.bf16.msra.mxu0 %v3923_v16 }
 0x1ff   : > { %1737 = vmatprep.subr.bf16.mxu0 %v3927_v17 }
 0x200   : > { %1781 = vmatpush1.bf16.msra.mxu1 %v3765_v19  ;;  %v3933_v19 = vld [vmem:[#allocation13 + $0xc4] ss:$16 sps:$4 sm:$0xff]  }
 0x201   : > { %1782 = vmatprep.subr.bf16.mxu1 %v3769_v20  ;;  %v3935_v20 = vld [vmem:[#allocation13 + $0xc0] ss:$16 sps:$4 sm:$0xff]  }
 0x202   : > { %1738 = vmatpush1.bf16.msra.mxu0 %v3929_v18 }
 0x203   : > { %1739 = vmatprep.subr.bf16.mxu0 %v3933_v19 }
 0x204   : > { %1783 = vmatpush1.bf16.msra.mxu1 %v3772_v21  ;;  %v3939_v21 = vld [vmem:[#allocation13 + $0xe4] ss:$16 sps:$4 sm:$0xff]  }
 0x205   : > { %1784 = vmatprep.subr.bf16.mxu1 %v3775_v22  ;;  %v3941_v22 = vld [vmem:[#allocation13 + $0xe0] ss:$16 sps:$4 sm:$0xff]  }
 0x206   : > { %1740 = vmatpush1.bf16.msra.mxu0 %v3935_v20 }
 0x207   : > { %1741 = vmatprep.subr.bf16.mxu0 %v3939_v21 }
 0x208   : > { %1785 = vmatpush1.bf16.msra.mxu1 %v3779_v23  ;;  %v1155_v23 = vunpack.c.l.bf16 %v3816_v63 }
 0x20a   : > { %1742 = vmatpush1.bf16.msra.mxu0 %v3941_v22 }
 0x20b   : > { %2096 = vmatprep.subr.bf16.mxu0 %v3002_v36 }
 0x2be   : > { %v1392_v40 = vpop.f32.mrb[4].mxu0  ;;  %v1435_v42 = vpop.f32.mrb[36].mxu1 }
 0x2bf   : > { %v1444_v48 = vadd.f32 %v1392_v40, %v1155_v23  ;;  %v1446_v49 = vadd.f32 %v1435_v42, %v1157_v38  ;;  %v1394_v51 = vpop.f32.mrb[5].mxu0  ;;  %v1437_v53 = vpop.f32.mrb[37].mxu1 }
 0x2c0   : > { %v1445_v31 = vadd.f32 %v1394_v51, %v1156_v46  ;;  %v1447_v58 = vadd.f32 %v1437_v53, %v1158_v59  ;;  %v1396_v62 = vpop.f32.mrb[6].mxu0  ;;  %v1439_v1 = vpop.f32.mrb[38].mxu1 }
 0x2c1   : > { %v1452_v5 = vmul.f32 0.5, %v1444_v48  ;;  %v1448_v7 = vadd.f32 %v1396_v62, %v1159_v55  ;;  %v1450_v8 = vadd.f32 %v1439_v1, %v1161_v56  ;;  %v1398_v47 = vpop.f32.mrb[7].mxu0  ;;  %v1441_v35 = vpop.f32.mrb[39].mxu1 }
 0x2c2   : > { %v1460_v36 = vmul.f32 0.5, %v1445_v31  ;;  %v1449_v23 = vadd.f32 %v1398_v47, %v1160_v54  ;;  %v1451_v38 = vadd.f32 %v1441_v35, %v1162_v4  ;;  %v1470_v40 = vmul.f32 0.5, %v1447_v58  ;;  %v3953_v55 = vpop.permute.xlu1 %1497 }
 0x2c3   : > { %3076 = vtanh.f32 %v1452_v5  ;;  %v1453_v63 = vmul.f32 0.5, %v1448_v7  ;;  %vm1502_vm10 = vcmp.eq.s32.totalorder %v3953_v55, 1  ;;  %v1141_v35 = vsel %vm1135_vm9, %v3854_v61, %v3847_v50 }
 0x2c4   : > { %3078 = vtanh.f32 %v1460_v36  ;;  %v1461_v6 = vmul.f32 0.5, %v1449_v23  ;;  %v1471_v59 = vmul.f32 0.5, %v1451_v38  ;;  %v1896_v55 = vunpack.c.l.bf16 %v3843_v52 }
 0x2c5   : > { %3080 = vtanh.f32 %v1453_v63 }
 0x2c6   : > { %3082 = vtanh.f32 %v1446_v49  ;;  %v1140_v49 = vsel %vm1134_vm8, %v3850_v29, %v3845_v57  ;;  %v3964_v36 = vpop.permute.xlu1 %1500 }
 0x2c7   : > { %3084 = vtanh.f32 %v1461_v6  ;;  %vm1503_vm11 = vcmp.eq.s32.totalorder %v3964_v36, 1 }
 0x2c8   : > { %3086 = vtanh.f32 %v1450_v8  ;;  %vm2768_vm15 = vmpackc.low %vm1503_vm11, %vm1502_vm10 }
 0x2c9   : > { %3088 = vtanh.f32 %v1470_v40 }
 0x2ca   : > { %3090 = vtanh.f32 %v1471_v59 }
 0x2cd   : > { %v3077_v0 = vpop.eup %3076 }
 0x2ce   : > { %v3079_v42 = vpop.eup %3078  ;;  %v1456_v27 = vmul.f32 0.5, %v3077_v0 }
 0x2cf   : > { %v1464_v46 = vmul.f32 0.5, %v3079_v42  ;;  %v3081_v48 = vpop.eup %3080 }
 0x2d0   : > { %v1458_v51 = vadd.f32 0.5, %v1456_v27  ;;  %v3083_v53 = vpop.eup %3082  ;;  %v1457_v31 = vmul.f32 0.5, %v3081_v48 }
 0x2d1   : > { %v1466_v56 = vadd.f32 0.5, %v1464_v46  ;;  %v3085_v62 = vpop.eup %3084 }
 0x2d2   : > { %v1482_v58 = vmul.f32 %v3083_v53, %v1458_v51  ;;  %v1459_v54 = vadd.f32 0.5, %v1457_v31  ;;  %v1465_v4 = vmul.f32 0.5, %v3085_v62  ;;  %v3087_v5 = vpop.eup %3086  ;;  %v1526_v31 = vunpack.c.l.bf16 %v3834_v39 }
 0x2d3   : > { %v1480_v1 = vmul.f32 %v1466_v56, %v1140_v49  ;;  %v3089_v23 = vpop.eup %3088 }
 0x2d4   : > { %v1467_v8 = vadd.f32 0.5, %v1465_v4  ;;  %v1483_v47 = vmul.f32 %v3087_v5, %v1459_v54  ;;  %v1474_v6 = vmul.f32 0.5, %v3089_v23  ;;  %v3091_v40 = vpop.eup %3090 }
 0x2d5   : > { %v1484_v7 = vadd.f32 %v1482_v58, %v1480_v1  ;;  %v1475_v61 = vmul.f32 0.5, %v3091_v40  ;;  %v1525_v58 = vunpack.c.l.bf16 %v3822_v28  ;;  %v1527_v1 = vunpack.c.l.bf16 %v3837_v41 }
 0x2d6   : > { %v1481_v29 = vmul.f32 %v1467_v8, %v1141_v35  ;;  %v1476_v50 = vadd.f32 0.5, %v1474_v6  ;;  %v1528_v8 = vunpack.c.h.bf16 %v3820_v26  ;;  %v1529_v6 = vunpack.c.h.bf16 %v3822_v28 }
 0x2d7   : > { %3092 = vtanh.f32 %v1484_v7  ;;  %v3968_v57 = vsel %vm1502_vm10, %v1484_v7, %v1140_v49  ;;  %v1477_v27 = vadd.f32 0.5, %v1475_v61  ;;  %v1531_v40 = vunpack.c.h.bf16 %v3837_v41 }
 0x2d8   : > { %v1485_v38 = vadd.f32 %v1483_v47, %v1481_v29  ;;  %v1530_v47 = vunpack.c.h.bf16 %v3834_v39 }
 0x2da   : > { %3094 = vtanh.f32 %v1485_v38  ;;  %v3973_v63 = vsel %vm1503_vm11, %v1485_v38, %v1141_v35 }
 0x2e1   : > { %v3093_v0 = vpop.eup %3092 }
 0x2e2   : > { %v3975_v42 = vmul.f32 %v3093_v0, %v1476_v50 }
 0x2e4   : > { %v3095_v46 = vpop.eup %3094  ;;  %v3983_v48 = vsel %vm1502_vm10, %v3975_v42, %v3871_v32  ;;  %v3024_v32 = vld [vmem:[#allocation13 + $0x8] ss:$16 sps:$4 sm:$0xff]  }
 0x2e5   : > { %v3977_v59 = vmul.f32 %v3095_v46, %v1477_v27 }
 0x2e7   : > { %v3989_v51 = vsel %vm1503_vm11, %v3977_v59, %v3877_v33  ;;  %v2769_v53 = vpack.c.bf16 %v3977_v59, %v3975_v42  ;;  %v3029_v33 = vld [vmem:[#allocation13 + $0x2c] ss:$16 sps:$4 sm:$0xff]   ;;  %v1899_v42 = vunpack.c.h.bf16 %v3841_v60 }
 0x2e8   : > { %v1534_v56 = vpack.c.bf16 %v3989_v51, %v3983_v48 }
 0x2ea   : > { %1760 = vmatmul.mubr.bf16.vlgmr.msra.gmra.mrb[8].mxu0 %v1534_v56  ;;  %1803 = vmatmul.mubr.bf16.vlgmr.msra.gmra.mrb[40].mxu1 %v1534_v56 }
 0x2eb   : > { %2097 = vmatpush1.bf16.msra.mxu0 %v3900_v37  ;;  %2128 = vmatprep.mubr.bf16.mxu0 %v3335_v3  ;;  %v3027_v37 = vld [vmem:[#allocation13 + $0x28] ss:$16 sps:$4 sm:$0xff]  }
 0x2ec   : > { %2098 = vmatprep.subr.bf16.mxu0 %v3903_v9  ;;  %2171 = vmatprep.mubr.bf16.mxu1 %v3335_v3  ;;  %v3026_v3 = vld [vmem:[#allocation13 + $0xc] ss:$16 sps:$4 sm:$0xff]  }
 0x2ed   : > { %2139 = vmatprep.subr.bf16.mxu1 %v3026_v3  ;;  %v3032_v9 = vld [vmem:[#allocation13 + $0x4c] ss:$16 sps:$4 sm:$0xff]  }
 0x2ee   : > { %2140 = vmatpush1.bf16.msra.mxu1 %v3024_v32 }
 0x2ef   : > { %2099 = vmatpush1.bf16.msra.mxu0 %v3905_v10  ;;  %2141 = vmatprep.subr.bf16.mxu1 %v3029_v33  ;;  %v3030_v10 = vld [vmem:[#allocation13 + $0x48] ss:$16 sps:$4 sm:$0xff]  }
 0x2f0   : > { %2100 = vmatprep.subr.bf16.mxu0 %v3909_v11  ;;  %v3035_v11 = vld [vmem:[#allocation13 + $0x6c] ss:$16 sps:$4 sm:$0xff]  }
 0x2f2   : > { %2142 = vmatpush1.bf16.msra.mxu1 %v3027_v37 }
 0x2f3   : > { %2101 = vmatpush1.bf16.msra.mxu0 %v3911_v12  ;;  %2143 = vmatprep.subr.bf16.mxu1 %v3032_v9  ;;  %v3033_v12 = vld [vmem:[#allocation13 + $0x68] ss:$16 sps:$4 sm:$0xff]  }
 0x2f4   : > { %2102 = vmatprep.subr.bf16.mxu0 %v3915_v13  ;;  %v3038_v13 = vld [vmem:[#allocation13 + $0x8c] ss:$16 sps:$4 sm:$0xff]  }
 0x2f6   : > { %2144 = vmatpush1.bf16.msra.mxu1 %v3030_v10 }
 0x2f7   : > { %2103 = vmatpush1.bf16.msra.mxu0 %v3917_v14  ;;  %2145 = vmatprep.subr.bf16.mxu1 %v3035_v11  ;;  %v3036_v14 = vld [vmem:[#allocation13 + $0x88] ss:$16 sps:$4 sm:$0xff]  }
 0x2f8   : > { %2104 = vmatprep.subr.bf16.mxu0 %v3921_v15  ;;  %v3041_v15 = vld [vmem:[#allocation13 + $0xac] ss:$16 sps:$4 sm:$0xff]  }
 0x2fa   : > { %2146 = vmatpush1.bf16.msra.mxu1 %v3033_v12 }
 0x2fb   : > { %2105 = vmatpush1.bf16.msra.mxu0 %v3923_v16  ;;  %2147 = vmatprep.subr.bf16.mxu1 %v3038_v13  ;;  %v3039_v16 = vld [vmem:[#allocation13 + $0xa8] ss:$16 sps:$4 sm:$0xff]  }
 0x2fc   : > { %2106 = vmatprep.subr.bf16.mxu0 %v3927_v17  ;;  %v3044_v17 = vld [vmem:[#allocation13 + $0xcc] ss:$16 sps:$4 sm:$0xff]  }
 0x2fe   : > { %2148 = vmatpush1.bf16.msra.mxu1 %v3036_v14 }
 0x2ff   : > { %2107 = vmatpush1.bf16.msra.mxu0 %v3929_v18  ;;  %2149 = vmatprep.subr.bf16.mxu1 %v3041_v15  ;;  %v3042_v18 = vld [vmem:[#allocation13 + $0xc8] ss:$16 sps:$4 sm:$0xff]  }
 0x300   : > { %2108 = vmatprep.subr.bf16.mxu0 %v3933_v19  ;;  %v3047_v19 = vld [vmem:[#allocation13 + $0xec] ss:$16 sps:$4 sm:$0xff]  }
 0x302   : > { %2150 = vmatpush1.bf16.msra.mxu1 %v3039_v16 }
 0x303   : > { %2109 = vmatpush1.bf16.msra.mxu0 %v3935_v20  ;;  %2151 = vmatprep.subr.bf16.mxu1 %v3044_v17  ;;  %v3045_v20 = vld [vmem:[#allocation13 + $0xe8] ss:$16 sps:$4 sm:$0xff]  }
 0x304   : > { %2110 = vmatprep.subr.bf16.mxu0 %v3939_v21  ;;  %v4012_v21 = vld [vmem:[#allocation14] sm:$0xff]  }
 0x306   : > { %2152 = vmatpush1.bf16.msra.mxu1 %v3042_v18 }
 0x307   : > { %2111 = vmatpush1.bf16.msra.mxu0 %v3941_v22  ;;  %2153 = vmatprep.subr.bf16.mxu1 %v3047_v19  ;;  %v1524_v22 = vunpack.c.l.bf16 %v3820_v26 }
 0x308   : > { %2789 = vmatprep.subr.bf16.mxu0 %v4012_v21 }
 0x30a   : > { %2154 = vmatpush1.bf16.msra.mxu1 %v3045_v20 }
 0x3bd   : > { %v1761_v62 = vpop.f32.mrb[8].mxu0  ;;  %v1804_v49 = vpop.f32.mrb[40].mxu1 }
 0x3be   : > { %v1813_v54 = vadd.f32 %v1761_v62, %v1524_v22  ;;  %v1815_v4 = vadd.f32 %v1804_v49, %v1526_v31  ;;  %v1763_v5 = vpop.f32.mrb[9].mxu0  ;;  %v1806_v7 = vpop.f32.mrb[41].mxu1 }
 0x3bf   : > { %v1814_v35 = vadd.f32 %v1763_v5, %v1525_v58  ;;  %v1816_v29 = vadd.f32 %v1806_v7, %v1527_v1  ;;  %v1765_v23 = vpop.f32.mrb[10].mxu0  ;;  %v1808_v38 = vpop.f32.mrb[42].mxu1 }
 0x3c0   : > { %v1821_v50 = vmul.f32 0.5, %v1813_v54  ;;  %v1817_v61 = vadd.f32 %v1765_v23, %v1528_v8  ;;  %v1819_v0 = vadd.f32 %v1808_v38, %v1530_v47  ;;  %v1767_v27 = vpop.f32.mrb[11].mxu0  ;;  %v1810_v46 = vpop.f32.mrb[43].mxu1 }
 0x3c1   : > { %v1829_v56 = vmul.f32 0.5, %v1814_v35  ;;  %v1818_v3 = vadd.f32 %v1767_v27, %v1529_v6  ;;  %v1820_v32 = vadd.f32 %v1810_v46, %v1531_v40  ;;  %v1839_v33 = vmul.f32 0.5, %v1816_v29  ;;  %v1867_v31 = vpop.permute.xlu0 %1866  ;;  %v1870_v5 = vpop.permute.xlu1 %1869  ;;  %v3049_v46 = vld [vmem:[#allocation14 + $0x8] sm:$0xff]  }
 0x3c2   : > { %3096 = vtanh.f32 %v1821_v50  ;;  %v1822_v26 = vmul.f32 0.5, %v1817_v61  ;;  %vm1871_vm12 = vcmp.eq.s32.totalorder %v1867_v31, 1  ;;  %vm1872_vm13 = vcmp.eq.s32.totalorder %v1870_v5, 1 }
 0x3c3   : > { %3098 = vtanh.f32 %v1829_v56  ;;  %v1830_v39 = vmul.f32 0.5, %v1818_v3  ;;  %v1840_v10 = vmul.f32 0.5, %v1820_v32  ;;  %v3052_v56 = vld [vmem:[#allocation14 + $0x20] sm:$0xff]   ;;  %vm2771_vm0 = vmpackc.low %vm1872_vm13, %vm1871_vm12  ;;  %v1894_v32 = vunpack.c.l.bf16 %v3828_v44 }
 0x3c4   : > { %3100 = vtanh.f32 %v1822_v26 }
 0x3c5   : > { %3102 = vtanh.f32 %v1815_v4 }
 0x3c6   : > { %3104 = vtanh.f32 %v1830_v39 }
 0x3c7   : > { %3106 = vtanh.f32 %v1819_v0 }
 0x3c8   : > { %3108 = vtanh.f32 %v1839_v33 }
 0x3c9   : > { %3110 = vtanh.f32 %v1840_v10  ;;  %v1900_v10 = vunpack.c.h.bf16 %v3843_v52 }
 0x3cc   : > { %v3097_v28 = vpop.eup %3096 }
 0x3cd   : > { %v3099_v37 = vpop.eup %3098  ;;  %v1825_v41 = vmul.f32 0.5, %v3097_v28  ;;  %v1897_v28 = vunpack.c.h.bf16 %v3826_v43 }
 0x3ce   : > { %v1833_v9 = vmul.f32 0.5, %v3099_v37  ;;  %v3101_v11 = vpop.eup %3100 }
 0x3cf   : > { %v1827_v12 = vadd.f32 0.5, %v1825_v41  ;;  %v3103_v13 = vpop.eup %3102  ;;  %v1826_v15 = vmul.f32 0.5, %v3101_v11 }
 0x3d0   : > { %v1835_v14 = vadd.f32 0.5, %v1833_v9  ;;  %v3105_v16 = vpop.eup %3104  ;;  %v1898_v9 = vunpack.c.h.bf16 %v3828_v44 }
 0x3d1   : > { %v1851_v17 = vmul.f32 %v3103_v13, %v1827_v12  ;;  %v1828_v19 = vadd.f32 0.5, %v1826_v15  ;;  %v1834_v20 = vmul.f32 0.5, %v3105_v16  ;;  %v3107_v22 = vpop.eup %3106 }
 0x3d2   : > { %v1849_v18 = vmul.f32 %v1835_v14, %v3968_v57  ;;  %v3109_v4 = vpop.eup %3108 }
 0x3d3   : > { %v1836_v49 = vadd.f32 0.5, %v1834_v20  ;;  %v1852_v58 = vmul.f32 %v3107_v22, %v1828_v19  ;;  %v1843_v47 = vmul.f32 0.5, %v3109_v4  ;;  %v3111_v35 = vpop.eup %3110 }
 0x3d4   : > { %v1853_v62 = vadd.f32 %v1851_v17, %v1849_v18  ;;  %v1844_v23 = vmul.f32 0.5, %v3111_v35 }
 0x3d5   : > { %v1850_v54 = vmul.f32 %v1836_v49, %v3973_v63  ;;  %v1845_v29 = vadd.f32 0.5, %v1843_v47  ;;  %v2236_v47 = vpop.permute.xlu0 %2235 }
 0x3d6   : > { %3112 = vtanh.f32 %v1853_v62  ;;  %v4026_v1 = vsel %vm1871_vm12, %v1853_v62, %v3968_v57  ;;  %v1846_v40 = vadd.f32 0.5, %v1844_v23  ;;  %vm2240_vm1 = vcmp.eq.s32.totalorder %v2236_v47, 1 }
 0x3d7   : > { %v1854_v7 = vadd.f32 %v1852_v58, %v1850_v54 }
 0x3d9   : > { %3114 = vtanh.f32 %v1854_v7  ;;  %v4031_v8 = vsel %vm1872_vm13, %v1854_v7, %v3973_v63 }
 0x3e0   : > { %v3113_v38 = vpop.eup %3112 }
 0x3e1   : > { %v1857_v6 = vmul.f32 %v3113_v38, %v1845_v29 }
 0x3e3   : > { %v3115_v57 = vpop.eup %3114  ;;  %v4035_v61 = vsel %vm1871_vm12, %v1857_v6, %v3983_v48  ;;  %v3050_v48 = vld [vmem:[#allocation14 + $0x10] sm:$0xff]  }
 0x3e4   : > { %v1858_v50 = vmul.f32 %v3115_v57, %v1846_v40 }
 0x3e6   : > { %v4039_v0 = vsel %vm1872_vm13, %v1858_v50, %v3989_v51  ;;  %v2772_v27 = vpack.c.bf16 %v1858_v50, %v1857_v6  ;;  %v3051_v51 = vld [vmem:[#allocation14 + $0x18] sm:$0xff]   ;;  %v2239_v50 = vpop.permute.xlu1 %2238 }
 0x3e7   : > { %v1903_v63 = vpack.c.bf16 %v4039_v0, %v4035_v61  ;;  %vm2241_vm2 = vcmp.eq.s32.totalorder %v2239_v50, 1 }
 0x3e8   : > { %vm2774_vm7 = vmpackc.low %vm2241_vm2, %vm2240_vm1 }
 0x3e9   : > { %2129 = vmatmul.mubr.bf16.vlgmr.msra.gmra.mrb[12].mxu0 %v1903_v63  ;;  %2172 = vmatmul.mubr.bf16.vlgmr.msra.gmra.mrb[44].mxu1 %v1903_v63 }
 0x3ea   : > { %2790 = vmatpush3.bf16.msra.mxu0 %v4012_v21  ;;  %2805 = vmatprep.mubr.msk.bf16.mxu0 %vm2765_vm14, %v2766_v34  ;;  %v3055_v21 = vld [vmem:[#allocation14 + $0x38] sm:$0xff]  }
 0x3eb   : > { %2791 = vmatprep.subr.bf16.mxu0 %v3049_v46 }
 0x3ee   : > { %2792 = vmatpush3.bf16.msra.mxu0 %v3049_v46 }
 0x3ef   : > { %2793 = vmatprep.subr.bf16.mxu0 %v3050_v48 }
 0x3f2   : > { %2794 = vmatpush3.bf16.msra.mxu0 %v3050_v48 }
 0x3f3   : > { %2795 = vmatprep.subr.bf16.mxu0 %v3051_v51 }
 0x3f6   : > { %2796 = vmatpush3.bf16.msra.mxu0 %v3051_v51  ;;  %v2398_v51 = vadd.s32 16, %v3803_v25 }
 0x3f7   : > { %2797 = vmatprep.subr.bf16.mxu0 %v3052_v56 }
 0x3fa   : > { %2798 = vmatpush3.bf16.msra.mxu0 %v3052_v56 }
 0x3fb   : > { %2799 = vmatprep.subr.bf16.mxu0 %v3053_v2 }
 0x3fe   : > { %2800 = vmatpush3.bf16.msra.mxu0 %v3053_v2  ;;  %v4079_v2 = vstv %s2757_s14 }
 0x3ff   : > { %2801 = vmatprep.subr.bf16.mxu0 %v3054_v24  ;;  %vm2410_vm3 = vcmp.lt.s32.totalorder %v2398_v51, %v4079_v2  ;;  %vm2408_vm4 = vcmp.lt.s32.totalorder %v3803_v25, %v4079_v2 }
 0x402   : > { %2802 = vmatpush3.bf16.msra.mxu0 %v3054_v24 }
 0x403   : > { %2803 = vmatprep.subr.bf16.mxu0 %v3055_v21 }
 0x406   : > { %2804 = vmatpush3.bf16.msra.mxu0 %v3055_v21  ;;  %v2399_v21 = vadd.s32 24, %v3803_v25 }
 0x408   : > { %vm2411_vm5 = vcmp.lt.s32.totalorder %v2399_v21, %v4079_v2 }
 0x409   : > { %2806 = vmatmul.mubr.msk.bf16.vlgmr.msra.gmra.mrb[16].mxu0 %vm2768_vm15, %v2769_v53 }
 0x40a   : > { %2809 = vmatprep.mubr.msk.bf16.mxu0 %vm2771_vm0, %v2772_v27 }
 0x4bc   : > { %v2130_v34 = vpop.f32.mrb[12].mxu0  ;;  %v2173_v3 = vpop.f32.mrb[44].mxu1 }
 0x4bd   : > { %v2182_v36 = vadd.f32 %v2130_v34, %v1893_v45  ;;  %v2184_v26 = vadd.f32 %v2173_v3, %v1895_v30  ;;  %v2132_v39 = vpop.f32.mrb[13].mxu0  ;;  %v2175_v33 = vpop.f32.mrb[45].mxu1  ;;  %v2397_v30 = vadd.s32 8, %v3803_v25 }
 0x4be   : > { %v2183_v59 = vadd.f32 %v2132_v39, %v1894_v32  ;;  %v2185_v53 = vadd.f32 %v2175_v33, %v1896_v55  ;;  %v2134_v37 = vpop.f32.mrb[14].mxu0  ;;  %v2177_v41 = vpop.f32.mrb[46].mxu1 }
 0x4bf   : > { %v2190_v11 = vmul.f32 0.5, %v2182_v36  ;;  %v2186_v12 = vadd.f32 %v2134_v37, %v1897_v28  ;;  %v2188_v13 = vadd.f32 %v2177_v41, %v1899_v42  ;;  %v2136_v14 = vpop.f32.mrb[15].mxu0  ;;  %v2179_v15 = vpop.f32.mrb[47].mxu1  ;;  %vm2409_vm6 = vcmp.lt.s32.totalorder %v2397_v30, %v4079_v2 }
 0x4c0   : > { %v2198_v16 = vmul.f32 0.5, %v2183_v59  ;;  %v2187_v17 = vadd.f32 %v2136_v14, %v1898_v9  ;;  %v2189_v18 = vadd.f32 %v2179_v15, %v1900_v10  ;;  %v2208_v19 = vmul.f32 0.5, %v2185_v53 }
 0x4c1   : > { %3116 = vtanh.f32 %v2190_v11  ;;  %v2191_v43 = vmul.f32 0.5, %v2186_v12 }
 0x4c2   : > { %3118 = vtanh.f32 %v2198_v16  ;;  %v2199_v60 = vmul.f32 0.5, %v2187_v17  ;;  %v2209_v31 = vmul.f32 0.5, %v2189_v18  ;;  %v2400_v16 = vadd.s32 32, %v3803_v25 }
 0x4c3   : > { %3120 = vtanh.f32 %v2191_v43  ;;  %v2403_v17 = vadd.s32 56, %v3803_v25  ;;  %v2401_v18 = vadd.s32 40, %v3803_v25 }
 0x4c4   : > { %3122 = vtanh.f32 %v2184_v26  ;;  %vm2412_vm9 = vcmp.lt.s32.totalorder %v2400_v16, %v4079_v2 }
 0x4c5   : > { %3124 = vtanh.f32 %v2199_v60  ;;  %vm2415_vm10 = vcmp.lt.s32.totalorder %v2403_v17, %v4079_v2  ;;  %vm2413_vm11 = vcmp.lt.s32.totalorder %v2401_v18, %v4079_v2 }
 0x4c6   : > { %3126 = vtanh.f32 %v2188_v13 }
 0x4c7   : > { %3128 = vtanh.f32 %v2208_v19 }
 0x4c8   : > { %3130 = vtanh.f32 %v2209_v31 }
 0x4cb   : > { %v3117_v44 = vpop.eup %3116 }
 0x4cc   : > { %v3119_v52 = vpop.eup %3118  ;;  %v2194_v20 = vmul.f32 0.5, %v3117_v44 }
 0x4cd   : > { %v2202_v22 = vmul.f32 0.5, %v3119_v52  ;;  %v3121_v62 = vpop.eup %3120 }
 0x4ce   : > { %v2196_v49 = vadd.f32 0.5, %v2194_v20  ;;  %v3123_v58 = vpop.eup %3122  ;;  %v2195_v4 = vmul.f32 0.5, %v3121_v62 }
 0x4cf   : > { %v2204_v54 = vadd.f32 0.5, %v2202_v22  ;;  %v3125_v5 = vpop.eup %3124 }
 0x4d0   : > { %v2220_v7 = vmul.f32 %v3123_v58, %v2196_v49  ;;  %v2197_v29 = vadd.f32 0.5, %v2195_v4  ;;  %v2203_v23 = vmul.f32 0.5, %v3125_v5  ;;  %v3127_v38 = vpop.eup %3126 }
 0x4d1   : > { %v2218_v35 = vmul.f32 %v2204_v54, %v4026_v1  ;;  %v3129_v46 = vpop.eup %3128 }
 0x4d2   : > { %v2205_v40 = vadd.f32 0.5, %v2203_v23  ;;  %v2221_v57 = vmul.f32 %v3127_v38, %v2197_v29  ;;  %v2212_v24 = vmul.f32 0.5, %v3129_v46  ;;  %v3131_v45 = vpop.eup %3130 }
 0x4d3   : > { %v2222_v6 = vadd.f32 %v2220_v7, %v2218_v35  ;;  %v2213_v55 = vmul.f32 0.5, %v3131_v45 }
 0x4d4   : > { %v2219_v63 = vmul.f32 %v2205_v40, %v4031_v8 }
 0x4d5   : > { %3132 = vtanh.f32 %v2222_v6  ;;  %v2246_v27 = vsel %vm2240_vm1, %v2222_v6, %v4026_v1  ;;  %v2748_v1 = vld [vmem:[%s4170_s7] ss:$0 sm:$0xff]  ;;  %v2215_v10 = vadd.f32 0.5, %v2213_v55 }
 0x4d6   : > { %2248 = vst [vmem:[#allocation3] sm:$0xff] %v2246_v27  ;;  %v2223_v48 = vadd.f32 %v2221_v57, %v2219_v63 }
 0x4d8   : > { %3134 = vtanh.f32 %v2223_v48  ;;  %v2247_v56 = vsel %vm2241_vm2, %v2223_v48, %v4031_v8  ;;  %v2214_v8 = vadd.f32 0.5, %v2212_v24 }
 0x4d9   : > { %2249 = vst [vmem:[#allocation3 + $0x8] sm:$0xff] %v2247_v56 }
 0x4dc   : > { %v2807_v34 = vpop.f32.mrb[16].mxu0 }
 0x4dd   : > { %v2373_v3 = vadd.f32 %v2807_v34, %v2748_v1  ;;  %v2364_v32 = vpop.f32.mrb[17].mxu0 }
 0x4de   : > { %v2365_v36 = vadd.f32 %v2748_v1, %v2364_v32  ;;  %v2808_v26 = vpop.f32.mrb[18].mxu0 }
 0x4df   : > { %v3133_v39 = vpop.eup %3132  ;;  %v2434_v33 = vsel %vm2410_vm3, %v2373_v3, 0.0  ;;  %v2376_v28 = vadd.f32 %v2808_v26, %v2748_v1  ;;  %v2367_v42 = vpop.f32.mrb[19].mxu0 }
 0x4e0   : > { %v2226_v59 = vmul.f32 %v3133_v39, %v2214_v8  ;;  %2442 = vst [vmem:[%s3608_s27 + $0x10] sm:$0xff] %v2434_v33  ;;  %v2432_v53 = vsel %vm2408_vm4, %v2365_v36, 0.0  ;;  %v2368_v37 = vadd.f32 %v2748_v1, %v2367_v42 }
 0x4e1   : > { %2440 = vst [vmem:[%s3608_s27] sm:$0xff] %v2432_v53  ;;  %v2435_v41 = vsel %vm2411_vm5, %v2376_v28, 0.0 }
 0x4e2   : > { %v2242_v9 = vsel %vm2240_vm1, %v2226_v59, %v4035_v61  ;;  %2443 = vst [vmem:[%s3608_s27 + $0x18] sm:$0xff] %v2435_v41  ;;  %v2433_v11 = vsel %vm2409_vm6, %v2368_v37, 0.0  ;;  %v3135_v12 = vpop.eup %3134  ;;  %v2402_v61 = vadd.s32 48, %v3803_v25 }
 0x4e3   : > { %2244 = vst [vmem:[#allocation2] sm:$0xff] %v2242_v9  ;;  %2441 = vst [vmem:[%s3608_s27 + $0x8] sm:$0xff] %v2433_v11  ;;  %v2227_v13 = vmul.f32 %v3135_v12, %v2215_v10 }
 0x4e4   : > { %vm2414_vm8 = vcmp.lt.s32.totalorder %v2402_v61, %v4079_v2 }
 0x4e5   : > { %v2243_v14 = vsel %vm2241_vm2, %v2227_v13, %v4039_v0  ;;  %v2775_v15 = vpack.c.bf16 %v2227_v13, %v2226_v59 }
 0x4e6   : > { %2245 = vst [vmem:[#allocation2 + $0x8] sm:$0xff] %v2243_v14 }
 0x4e7   : > { %2810 = vmatmul.mubr.msk.bf16.gmra.mrb[20].mxu0 %vm2774_vm7, %v2775_v15 }
 0x5ba   : > { %v2811_v43 = vpop.f32.mrb[20].mxu0 }
 0x5bb   : > { %v2389_v60 = vadd.f32 %v2811_v43, %v2748_v1  ;;  %v2380_v0 = vpop.f32.mrb[21].mxu0 }
 0x5bc   : > { %v2381_v19 = vadd.f32 %v2748_v1, %v2380_v0  ;;  %v2812_v44 = vpop.f32.mrb[22].mxu0 }
 0x5bd   : > { %v2438_v52 = vsel %vm2414_vm8, %v2389_v60, 0.0  ;;  %v2392_v20 = vadd.f32 %v2812_v44, %v2748_v1  ;;  %v2383_v25 = vpop.f32.mrb[23].mxu0 }
 0x5be   : > { %2446 = vst [vmem:[%s3608_s27 + $0x30] sm:$0xff] %v2438_v52  ;;  %v2436_v22 = vsel %vm2412_vm9, %v2381_v19, 0.0  ;;  %v2384_v31 = vadd.f32 %v2748_v1, %v2383_v25 }
 0x5bf   : > { %2444 = vst [vmem:[%s3608_s27 + $0x20] sm:$0xff] %v2436_v22  ;;  %v2439_v62 = vsel %vm2415_vm10, %v2392_v20, 0.0 }
 0x5c0   : > { %2447 = vst [vmem:[%s3608_s27 + $0x38] sm:$0xff] %v2439_v62  ;;  %v2437_v49 = vsel %vm2413_vm11, %v2384_v31, 0.0 }
 0x5c1   : > { %2445 = vst [vmem:[%s3608_s27 + $0x28] sm:$0xff] %v2437_v49 }
 0x5c2   : > { %3263 = shalt.err (!%p3260_p10)
}
 0x5c3   : > { %s3264_s27 = scalar_lea.hbm %s4115_s0, 1024  ;;  %s3268_s19 = scalar_lea.hbm %s4171_s8, 3072 }
 0x5c4   : > { %p3265_p0 = scmp.ne.s32.totalorder %s4115_s0, %s3264_s27  ;;  %p3269_p13 = scmp.lt.u32.totalorder %s4115_s0, %s4171_s8 }
 0x5c5   : > { %p3270_p6 = scmp.lt.u32.totalorder %s3268_s19, %s3264_s27  ;;  %p3272_p3 = scmp.lt.u32.totalorder %s3264_s27, %s4115_s0 }
 0x5c6   : > { %p3266_p11 = pnand %p3265_p0, %p3535_p5 }
 0x5c7   : > { %p3271_p8 = por %p3270_p6, %p3269_p13 }
 0x5c8   : > { %p3267_p9 = pneg %p3266_p11 }
 0x5c9   : > { %p3273_p7 = por %p3272_p3, %p3271_p8 }
 0x5cb   : > { %p3274_p12 = pnand %p3273_p7, %p3267_p9 }
 0x5cd   : > { %3277 = shalt.err (!%p3274_p12)
}
 0x5ce   : > { %s3337_s20 = smov 128   ;;  %s3338_s22 = smov 8  }
 0x5cf   : > { %2827 = dma.vmem_to_hbm [thread:$0]  (%p3535_p5), %s4117_s18, 1024, %s4115_s0, %s2449_s26, %s3337_s20, %s3337_s20, %s3338_s22  }
 0x5d0 PF: > { %s4192_s21 = sld [smem:[#allocation21_spill]]  ;;  %p2854_p2 = scmp.ge.s32.totalorder %s3324_s10, 2 }
 0x5d1   : > { %s2477_s11 = sand.u32 1, %s3312_s29  }
 0x5d2   : > { %s2478_s28 = scalar_lea.sflag [#allocation10], %s2477_s11 }
 0x5d6   : > { %p4193_p1 = scmp.ne.s32.totalorder %s4192_s21, 0 }
 0x5d8   : > { %p2844_p4 = pnand %p2854_p2, %p4193_p1 }
 0x5da   : > { %3307 = dma.done.wait (!%p2844_p4), %s2478_s28, 1024  }
 0x5db   : > { %3309 = vsyncadd (!%p2844_p4), %s2478_s28, 4294966272  ;;  %p24_p10 = scmp.ge.s32.totalorder %s3521_s13, 5   ;;  %s4194_s29 = smov %s3316_s30 }
 0x5dc   : > { %s4195_s30 = smov %s3320_s9  ;;  %s4196_s9 = smov %s3531_s24 }
 0x5dd   : > { %s4197_s10 = smov %s3521_s13  ;;  %26 = sbr.rel (!%p24_p10) target bundleno = 9 (0x9), region = 116 }
 0x5e4   :  { %2483 = vsyncpa [#allocation9], 1 }
 0x5e5   :  { %2485 = vsyncpa [#allocation9 + $0x1], 1 }
 0x5e6   :  { %2486 = vsyncpa [#allocation12], 1 }
 0x5e7   :  { %2487 = vsyncpa [#allocation15], 1 }
 0x5e8   :  { %2488 = vsyncpa [#allocation10], 1 }
 0x5e9   :  { %2490 = vsyncpa [#allocation10 + $0x1], 1 }

// kernel: tpu_custom_call.1
= control target key start
LH: loop header
LB: loop body
LE: loop exit
PB: predicated region body
PF: predicated region fallthrough
CT: control target
= control target key end

     0   :  { %s4163_s0 = inlined_call_operand.<no memory space> [shape: s32[1], index: 0, kind: input, shape index: {}]   ;;  %s4164_s1 = inlined_call_operand.vmem [shape: s32[16,1], index: 1, kind: input, shape index: {}]   ;;  %s4165_s2 = inlined_call_operand.hbm [shape: bf16[192,128], index: 2, kind: input, shape index: {}]   ;;  %s4166_s3 = inlined_call_operand.hbm [shape: bf16[128,512], index: 3, kind: input, shape index: {}]   ;;  %s4167_s4 = inlined_call_operand.hbm [shape: bf16[128,512], index: 4, kind: input, shape index: {}]   ;;  %s4168_s5 = inlined_call_operand.vmem [shape: f32[1,512], index: 5, kind: input, shape index: {}]   ;;  %s4169_s6 = inlined_call_operand.hbm [shape: bf16[128,128], index: 6, kind: input, shape index: {}]   ;;  %s4170_s7 = inlined_call_operand.vmem [shape: f32[1,128], index: 7, kind: input, shape index: {}]   ;;  %s4171_s8 = inlined_call_operand.hbm [shape: f32[192,128], index: 8, kind: output, shape index: {}]  }
   0x1   :  { %13 = sst [smem:[#allocation7]] %s4163_s0 }
   0x2   :  { %14 = vsyncpa [#allocation9], 0 }
   0x3   :  { %16 = vsyncpa [#allocation9 + $0x1], 0 }
   0x4   :  { %17 = vsyncpa [#allocation12], 0 }
   0x5   :  { %18 = vsyncpa [#allocation15], 0 }
   0x6   :  { %19 = vsyncpa [#allocation10], 0 }
   0x7   :  { %21 = vsyncpa [#allocation10 + $0x1], 0  ;;  %s3387_s29 = smov 0   ;;  %s3389_s30 = smov 0  }
   0x8   :  { %s3391_s9 = smov 0   ;;  %s3393_s10 = smov 0  }
   0x9 LB: > { %s3408_s0 = sadd.s32 4294967295, %s3324_s10   ;;  %s2567_s11 = sadd.s32 4294967294, %s3324_s10   ;;  %s3324_s10 = sphi %s3393_s10, %s4197_s10   ;;  %s3320_s9 = sphi %s3391_s9, %s4196_s9   ;;  %s3316_s30 = sphi %s3389_s30, %s4195_s30   ;;  %s3312_s29 = sphi %s3387_s29, %s4194_s29  }
   0xa   : > { %p68_p0 = scmp.ne.s32.totalorder %s3316_s30, %s3312_s29  ;;  %p4172_p1 = scmp.eq.s32.totalorder %s3408_s0, 0 }
   0xb   : > { %p203_p3 = scmp.eq.s32.totalorder %s2567_s11, 2  ;;  %p2568_p5 = scmp.ge.s32.totalorder %s3324_s10, 1 }
   0xc   : > { %p3417_p4 = por %p4172_p1, %p68_p0  ;;  %p210_p7 = scmp.lt.s32.totalorder %s3324_s10, 4 }
   0xd   : > { %p3422_p6 = por %p203_p3, %p68_p0  ;;  %s3326_s15 = smov [#allocation11]  }
   0xe   : > { %s4176_s12 = scalar_select %p3417_p4, 1, 0 }
   0xf   : > { %s4177_s13 = scalar_select %p3422_p6, 1, 0 }
  0x10   : > { %p3428_p9 = pnand %p2568_p5, %p210_p7  ;;  %s225_s16 = sshll.u32 %s3326_s15, 4  ;;  %s3432_s16 = int_to_ptr.vmem [resolvable:$true] %s225_s16 }
  0x11   : > { %4178 = sst [smem:[#allocation21_spill]] %s4177_s13  ;;  %s3327_s18 = smov [#allocation13]  }
  0x12   : > { %s4179_s14 = scalar_select %p3428_p9, 1, 0 }
  0x13   : > { %p2829_p10 = pneg %p3428_p9  ;;  %s238_s19 = sshll.u32 %s3327_s18, 4  ;;  %s3442_s19 = int_to_ptr.vmem [resolvable:$true] %s238_s19 }
  0x14   : > { %s3328_s20 = smov [#allocation14]   ;;  %s3136_s24 = scalar_lea.hbm %s4166_s3, 4096 }
  0x15   : > { %p3438_p11 = pnand %p2829_p10, %p4172_p1  ;;  %s3444_s21 = sshll.u32 %s3328_s20, 4  ;;  %s255_s21 = int_to_ptr.vmem [resolvable:$true] %s3444_s21 }
  0x16   : > { %p3137_p12 = scmp.ne.s32.totalorder %s4166_s3, %s3136_s24  ;;  %p3143_p5 = scmp.lt.u32.totalorder %s3136_s24, %s4166_s3 }
  0x17   : > { %p3454_p13 = pneg %p3438_p11 }
  0x19   : > { %p3139_p0 = pnand %p3454_p13, %p3137_p12 }
  0x1b   : > { %p3140_p3 = pneg %p3139_p0 }
  0x1d   : > { %p3145_p7 = pnand %p3143_p5, %p3140_p3 }
  0x1f   : > { %3148 = shalt.err (!%p3145_p7)
}
  0x20   : > { %s3149_s15 = scalar_lea.vmem %s3432_s16, 4096  ;;  %p3157_p2 = scmp.lt.s32.totalorder %s3432_s16, %s3432_s16 }
  0x21   : > { %p3150_p10 = scmp.ne.s32.totalorder %s3432_s16, %s3149_s15  ;;  %p3158_p6 = scmp.lt.s32.totalorder %s3149_s15, %s3149_s15 }
  0x23   : > { %p3152_p8 = pnand %p3150_p10, %p3454_p13  ;;  %p3159_p12 = por %p3158_p6, %p3157_p2 }
  0x25   : > { %p3153_p1 = pneg %p3152_p8 }
  0x27   : > { %p3160_p0 = pnand %p3159_p12, %p3153_p1 }
  0x29   : > { %3163 = shalt.err (!%p3160_p0)
}
  0x2a   : > { %s3329_s18 = smov 256   ;;  %s3330_s20 = smov 16  }
  0x2b   : > { %2832 = dma.hbm_to_vmem [thread:$0]  (!%p3438_p11), %s4166_s3, 4096, %s3432_s16, [#allocation12], %s3329_s18, %s3329_s18, %s3330_s20  }
  0x2c   : > { %s3164_s26 = scalar_lea.hbm %s4167_s4, 4096 }
  0x2d   : > { %p3165_p2 = scmp.ne.s32.totalorder %s4167_s4, %s3164_s26  ;;  %p3171_p8 = scmp.lt.u32.totalorder %s3164_s26, %s4167_s4 }
  0x2f   : > { %p3167_p1 = pnand %p3165_p2, %p3454_p13 }
  0x31   : > { %p3168_p6 = pneg %p3167_p1 }
  0x33   : > { %p3173_p3 = pnand %p3171_p8, %p3168_p6 }
  0x35   : > { %3176 = shalt.err (!%p3173_p3)
}
  0x36   : > { %s3177_s16 = scalar_lea.vmem %s3442_s19, 4096  ;;  %p3185_p12 = scmp.lt.s32.totalorder %s3442_s19, %s3442_s19 }
  0x37   : > { %p3178_p5 = scmp.ne.s32.totalorder %s3442_s19, %s3177_s16  ;;  %p3186_p0 = scmp.lt.s32.totalorder %s3177_s16, %s3177_s16 }
  0x39   : > { %p3180_p7 = pnand %p3178_p5, %p3454_p13  ;;  %p3187_p2 = por %p3186_p0, %p3185_p12 }
  0x3b   : > { %p3181_p10 = pneg %p3180_p7 }
  0x3d   : > { %p3188_p1 = pnand %p3187_p2, %p3181_p10 }
  0x3f   : > { %3191 = shalt.err (!%p3188_p1)
}
  0x40   : > { %2835 = dma.hbm_to_vmem [thread:$0]  (!%p3438_p11), %s4167_s4, 4096, %s3442_s19, [#allocation12], %s3329_s18, %s3329_s18, %s3330_s20  }
  0x41   : > { %s3192_s25 = scalar_lea.hbm %s4169_s6, 1024 }
  0x42   : > { %p3193_p6 = scmp.ne.s32.totalorder %s4169_s6, %s3192_s25  ;;  %p3199_p5 = scmp.lt.u32.totalorder %s3192_s25, %s4169_s6 }
  0x44   : > { %p3195_p8 = pnand %p3193_p6, %p3454_p13 }
  0x46   : > { %p3196_p3 = pneg %p3195_p8 }
  0x48   : > { %p3201_p7 = pnand %p3199_p5, %p3196_p3 }
  0x4a   : > { %3204 = shalt.err (!%p3201_p7)
}
  0x4b   : > { %s3205_s16 = scalar_lea.vmem %s255_s21, 1024  ;;  %p3213_p2 = scmp.lt.s32.totalorder %s255_s21, %s255_s21 }
  0x4c   : > { %p3206_p10 = scmp.ne.s32.totalorder %s255_s21, %s3205_s16  ;;  %p3214_p1 = scmp.lt.s32.totalorder %s3205_s16, %s3205_s16 }
  0x4e   : > { %p3208_p12 = pnand %p3206_p10, %p3454_p13  ;;  %p3215_p4 = por %p3214_p1, %p3213_p2 }
  0x50   : > { %p3209_p0 = pneg %p3208_p12 }
  0x52   : > { %p3216_p9 = pnand %p3215_p4, %p3209_p0 }
  0x54   : > { %3219 = shalt.err (!%p3216_p9)
}
  0x55   : > { %s3331_s19 = smov 64   ;;  %s3332_s27 = smov 4  }
  0x56   : > { %2838 = dma.hbm_to_vmem [thread:$0]  (!%p3438_p11), %s4169_s6, 1024, %s255_s21, [#allocation15], %s3331_s19, %s3331_s19, %s3332_s27  }
  0x57   : > { %s3521_s13 = sadd.s32 1, %s3324_s10   ;;  %s55_s23 = sadd.s32 1, %s3320_s9 }
  0x58   : > { %s52_s22 = ssub.s32 %s3324_s10, %s3521_s13  ;;  %p62_p9 = scmp.ne.s32.totalorder %s3320_s9, %s3316_s30 }
  0x59   : > { %p53_p4 = scmp.eq.s32.totalorder %s52_s22, 0  ;;  %p63_p13 = scmp.eq.s32.totalorder %s3324_s10, 0 }
  0x5a   : > { %p2850_p6 = scmp.lt.s32.totalorder %s3324_s10, 3  ;;  %p4182_p3 = scmp.eq.s32.totalorder %s3408_s0, 2 }
  0x5b   : > { %s3531_s24 = scalar_select %p53_p4, %s3320_s9, %s55_s23  }
  0x5c   : > { %p64_p8 = por %p63_p13, %p62_p9  ;;  %p3535_p5 = por %p4182_p3, %p62_p9 }
  0x5d   : > { %s271_s25 = sand.u32 1, %s3320_s9   ;;  %s2763_s26 = sshll.u32 %s3324_s10, 9 }
  0x5e   : > { %s2573_s21 = sshll.u32 %s271_s25, 5  ;;  %s3544_s15 = scalar_lea.hbm %s4165_s2, %s2763_s26 }
  0x5f   : > { %s275_s16 = scalar_lea.vmem [#allocation8], %s2573_s21  ;;  %p3546_p11 = pnand %p2850_p6, %p64_p8 }
  0x60   : > { %s282_s18 = sshll.u32 %s275_s16, 4  ;;  %s3552_s22 = scalar_lea.sflag [#allocation9], %s271_s25  ;;  %s3550_s18 = int_to_ptr.vmem [resolvable:$true] %s282_s18 }
  0x61   : > { %s3220_s23 = scalar_lea.hbm %s3544_s15, 512  ;;  %p3222_p10 = pneg %p3546_p11 }
  0x62   : > { %p3221_p7 = scmp.ne.s32.totalorder %s3544_s15, %s3220_s23  ;;  %s3225_s28 = scalar_lea.hbm %s4165_s2, 1536 }
  0x63   : > { %p3226_p2 = scmp.lt.u32.totalorder %s3544_s15, %s4165_s2  ;;  %p3227_p1 = scmp.lt.u32.totalorder %s3225_s28, %s3220_s23 }
  0x64   : > { %p3223_p12 = pnand %p3222_p10, %p3221_p7  ;;  %p3229_p9 = scmp.lt.u32.totalorder %s3220_s23, %s3544_s15 }
  0x65   : > { %p3228_p4 = por %p3227_p1, %p3226_p2 }
  0x66   : > { %p3224_p0 = pneg %p3223_p12 }
  0x67   : > { %p3230_p13 = por %p3229_p9, %p3228_p4 }
  0x69   : > { %p3231_p6 = pnand %p3230_p13, %p3224_p0 }
  0x6b   : > { %3234 = shalt.err (!%p3231_p6)
}
  0x6c   : > { %s3235_s25 = scalar_lea.vmem %s3550_s18, 512  ;;  %s3333_s26 = smov [#allocation8]  }
  0x6d   : > { %p3236_p8 = scmp.ne.s32.totalorder %s3550_s18, %s3235_s25  ;;  %s3240_s21 = sshll.u32 %s3333_s26, 4  ;;  %s3241_s21 = int_to_ptr.vmem [resolvable:$false] %s3240_s21 }
  0x6e   : > { %s3242_s11 = scalar_lea.vmem %s3241_s21, 1024  ;;  %p3243_p12 = scmp.lt.s32.totalorder %s3550_s18, %s3241_s21 }
  0x6f   : > { %p3238_p3 = pnand %p3236_p8, %p3222_p10  ;;  %p3244_p2 = scmp.lt.s32.totalorder %s3242_s11, %s3235_s25 }
  0x71   : > { %p3239_p7 = pneg %p3238_p3  ;;  %p3245_p1 = por %p3244_p2, %p3243_p12 }
  0x73   : > { %p3246_p4 = pnand %p3245_p1, %p3239_p7 }
  0x75   : > { %3249 = shalt.err (!%p3246_p4)
}
  0x76   : > { %2842 = dma.hbm_to_vmem [thread:$0]  (!%p3546_p11), %s3544_s15, 512, %s3550_s18, %s3552_s22, %s3331_s19, %s3331_s19, %s3332_s27  }
  0x77   : > { %p4185_p10 = scmp.ne.s32.totalorder %s4179_s14, 0 }
  0x78   : > { %s3586_s23 = sand.u32 (!%p4185_p10), 1, %s3316_s30   ;;  %p4186_p0 = scmp.ne.s32.totalorder (!%p4185_p10), %s4176_s12, 0 }
  0x79   : > { %294 = sbr.rel (%p4185_p10) target bundleno = 1488 (0x5d0), region = 48  ;;  %s2577_s28 = sshll.u32 (!%p4185_p10), %s3586_s23, 5 }
  0x7a   : > { %s297_s16 = scalar_lea.sflag (!%p4185_p10), [#allocation9], %s3586_s23  ;;  %s3590_s25 = scalar_lea.vmem (!%p4185_p10), [#allocation8], %s2577_s28 }
  0x80   : > { %3295 = dma.done.wait (%p4186_p0), %s297_s16, 512  }
  0x81   : > { %3297 = vsyncadd (%p4186_p0), %s297_s16, 4294966784  ;;  %p4187_p11 = scmp.eq.s32.totalorder %s3408_s0, 0 }
  0x83   : > { %3299 = dma.done.wait (%p4187_p11), [#allocation12], 8192   ;;  %p4188_p9 = pmov %p4187_p11 }
  0x85   : > { %3301 = vsyncadd (%p4188_p9), [#allocation12], 4294959104  ;;  %p4189_p13 = pmov %p4188_p9 }
  0x86   : > { %p4190_p6 = pmov %p4188_p9 }
  0x87   : > { %3303 = dma.done.wait (%p4189_p13), [#allocation15], 1024  }
  0x88   : > { %3305 = vsyncadd (%p4190_p6), [#allocation15], 4294966272  ;;  %s2581_s14 = sshll.u32 %s3586_s23, 6  ;;  %s3606_s19 = sshll.u32 %s3408_s0, 2 }
  0x89   : > { %s3608_s27 = scalar_lea.vmem [#allocation16], %s2581_s14  ;;  %p4191_p8 = scmp.ne.s32.totalorder %s3408_s0, 0 }
  0x8a   : > { %v3334_v0 = vmov (!%p4191_p8), 0.0  }
  0x8b   : > { %350 = sbr.rel (%p4191_p8) target bundleno = 146 (0x92), region = 68  ;;  %351 = vst [vmem:[#allocation2] sm:$0xff] (!%p4191_p8), %v3334_v0  ;;  %352 = vst [vmem:[#allocation2 + $0x8] sm:$0xff] (!%p4191_p8), %v3334_v0 }
  0x8c   : > { %353 = vst [vmem:[#allocation3] sm:$0xff] (!%p4191_p8), %v3334_v0  ;;  %354 = vst [vmem:[#allocation3 + $0x8] sm:$0xff] (!%p4191_p8), %v3334_v0 }
  0x92 PF: > { %v2900_v1 = vld [vmem:[#allocation11 + $0x4] ss:$16 sps:$4 sm:$0xff]   ;;  %v2902_v2 = vld [vmem:[#allocation11] ss:$16 sps:$4 sm:$0xff]   ;;  %v3335_v3 = vmov 0   ;;  %v3667_v37 = vld [vmem:[#allocation2 + $0x8] sm:$0xff]  ;;  %v1123_v48 = vstv %s3606_s19 }
  0x93   : > { %633 = vmatprep.mubr.bf16.mxu1 %v3335_v3  ;;  %1023 = vmatprep.mubr.bf16.mxu0 %v3335_v3  ;;  %v2903_v4 = vld [vmem:[#allocation11 + $0x24] ss:$16 sps:$4 sm:$0xff]   ;;  %v2905_v5 = vld [vmem:[#allocation11 + $0x20] ss:$16 sps:$4 sm:$0xff]   ;;  %v2948_v32 = vld [vmem:[#allocation11 + $0xc] ss:$16 sps:$4 sm:$0xff]  }
  0x94   : > { %601 = vmatprep.subr.bf16.mxu1 %v2900_v1  ;;  %2898 = vset.pattern.permute.xlu0 %v3335_v3  ;;  %v3615_v6 = vld [vmem:[#allocation13 + $0x4] ss:$16 sps:$4 sm:$0xff]   ;;  %v3617_v7 = vld [vmem:[#allocation13] ss:$16 sps:$4 sm:$0xff]   ;;  %v2946_v38 = vld [vmem:[#allocation11 + $0x8] ss:$16 sps:$4 sm:$0xff]  }
  0x95   : > { %602 = vmatpush1.bf16.msra.mxu1 %v2902_v2  ;;  %2899 = vset.pattern.permute.xlu1 %v3335_v3  ;;  %v2909_v8 = vld [vmem:[#allocation11 + $0x44] ss:$16 sps:$4 sm:$0xff]   ;;  %v3624_v10 = vld [vmem:[#allocation13 + $0x20] ss:$16 sps:$4 sm:$0xff]   ;;  %v2954_v39 = vld [vmem:[#allocation11 + $0x2c] ss:$16 sps:$4 sm:$0xff]  }
  0x96   : > { %603 = vmatprep.subr.bf16.mxu1 %v2903_v4  ;;  %991 = vmatprep.subr.bf16.mxu0 %v3615_v6  ;;  %v3622_v9 = vld [vmem:[#allocation13 + $0x24] ss:$16 sps:$4 sm:$0xff]   ;;  %v2911_v11 = vld [vmem:[#allocation11 + $0x40] ss:$16 sps:$4 sm:$0xff]   ;;  %v2952_v41 = vld [vmem:[#allocation11 + $0x28] ss:$16 sps:$4 sm:$0xff]  }
  0x97   : > { %992 = vmatpush1.bf16.msra.mxu0 %v3617_v7  ;;  %v2915_v12 = vld [vmem:[#allocation11 + $0x64] ss:$16 sps:$4 sm:$0xff]   ;;  %v3630_v14 = vld [vmem:[#allocation13 + $0x40] ss:$16 sps:$4 sm:$0xff]   ;;  %v2958_v42 = vld [vmem:[#allocation11 + $0x4c] ss:$16 sps:$4 sm:$0xff]  }
  0x98   : > { %993 = vmatprep.subr.bf16.mxu0 %v3622_v9  ;;  %v3627_v13 = vld [vmem:[#allocation13 + $0x44] ss:$16 sps:$4 sm:$0xff]   ;;  %v2917_v15 = vld [vmem:[#allocation11 + $0x60] ss:$16 sps:$4 sm:$0xff]   ;;  %v3680_v43 = vld [vmem:[%s3590_s25 + $0x8] sm:$0xff]   ;;  %s1490_s12 = sadd.s32 1, %s3606_s19 }
  0x99   : > { %604 = vmatpush1.bf16.msra.mxu1 %v2905_v5  ;;  %v3633_v16 = vld [vmem:[#allocation13 + $0x64] ss:$16 sps:$4 sm:$0xff]   ;;  %v3636_v18 = vld [vmem:[#allocation13 + $0x60] ss:$16 sps:$4 sm:$0xff]   ;;  %v2956_v44 = vld [vmem:[#allocation11 + $0x48] ss:$16 sps:$4 sm:$0xff]   ;;  %v1491_v49 = vstv %s1490_s12 }
  0x9a   : > { %605 = vmatprep.subr.bf16.mxu1 %v2909_v8  ;;  %v2921_v17 = vld [vmem:[#allocation11 + $0x84] ss:$16 sps:$4 sm:$0xff]   ;;  %v2923_v19 = vld [vmem:[#allocation11 + $0x80] ss:$16 sps:$4 sm:$0xff]   ;;  %v2961_v45 = vld [vmem:[#allocation11 + $0x6c] ss:$16 sps:$4 sm:$0xff]  }
  0x9b   : > { %994 = vmatpush1.bf16.msra.mxu0 %v3624_v10  ;;  %v3639_v20 = vld [vmem:[#allocation13 + $0x84] ss:$16 sps:$4 sm:$0xff]   ;;  %v3642_v22 = vld [vmem:[#allocation13 + $0x80] ss:$16 sps:$4 sm:$0xff]   ;;  %v2959_v46 = vld [vmem:[#allocation11 + $0x68] ss:$16 sps:$4 sm:$0xff]  }
  0x9c   : > { %995 = vmatprep.subr.bf16.mxu0 %v3627_v13  ;;  %v2927_v21 = vld [vmem:[#allocation11 + $0xa4] ss:$16 sps:$4 sm:$0xff]   ;;  %v2929_v23 = vld [vmem:[#allocation11 + $0xa0] ss:$16 sps:$4 sm:$0xff]   ;;  %v2965_v47 = vld [vmem:[#allocation11 + $0x8c] ss:$16 sps:$4 sm:$0xff]  }
  0x9d   : > { %606 = vmatpush1.bf16.msra.mxu1 %v2911_v11  ;;  %v3645_v24 = vld [vmem:[#allocation13 + $0xa4] ss:$16 sps:$4 sm:$0xff]   ;;  %v3648_v26 = vld [vmem:[#allocation13 + $0xa0] ss:$16 sps:$4 sm:$0xff]   ;;  %s1859_s15 = sadd.s32 2, %s3606_s19  ;;  %v780_v53 = vld [vmem:[%s4164_s1 + $0x8] sm:$0xff] }
  0x9e   : > { %607 = vmatprep.subr.bf16.mxu1 %v2915_v12  ;;  %v2933_v25 = vld [vmem:[#allocation11 + $0xc4] ss:$16 sps:$4 sm:$0xff]   ;;  %v2935_v27 = vld [vmem:[#allocation11 + $0xc0] ss:$16 sps:$4 sm:$0xff]   ;;  %v2963_v51 = vld [vmem:[#allocation11 + $0x88] ss:$16 sps:$4 sm:$0xff]   ;;  %vm1125_vm2 = vcmp.lt.s32.totalorder %v1123_v48, %v780_v53  ;;  %v1860_v58 = vstv %s1859_s15  ;;  %vm1493_vm3 = vcmp.lt.s32.totalorder %v1491_v49, %v780_v53 }
  0x9f   : > { %996 = vmatpush1.bf16.msra.mxu0 %v3630_v14  ;;  %v3651_v28 = vld [vmem:[#allocation13 + $0xc4] ss:$16 sps:$4 sm:$0xff]   ;;  %v2941_v30 = vld [vmem:[#allocation11 + $0xe0] ss:$16 sps:$4 sm:$0xff]   ;;  %v2968_v54 = vld [vmem:[#allocation11 + $0xac] ss:$16 sps:$4 sm:$0xff]   ;;  %vm1862_vm5 = vcmp.lt.s32.totalorder %v1860_v58, %v780_v53 }
  0xa0   : > { %997 = vmatprep.subr.bf16.mxu0 %v3633_v16  ;;  %v2939_v29 = vld [vmem:[#allocation11 + $0xe4] ss:$16 sps:$4 sm:$0xff]   ;;  %v3654_v31 = vld [vmem:[#allocation13 + $0xc0] ss:$16 sps:$4 sm:$0xff]   ;;  %s2228_s21 = sadd.s32 3, %s3606_s19  ;;  %v1127_v60 = vsel %vm1125_vm2, 1, %v3335_v3 }
  0xa1   : > { %608 = vmatpush1.bf16.msra.mxu1 %v2917_v15  ;;  %v3657_v33 = vld [vmem:[#allocation13 + $0xe4] ss:$16 sps:$4 sm:$0xff]   ;;  %v3662_v35 = vld [vmem:[#allocation13 + $0xe0] ss:$16 sps:$4 sm:$0xff]   ;;  %v2966_v55 = vld [vmem:[#allocation11 + $0xa8] ss:$16 sps:$4 sm:$0xff]   ;;  %v2229_v62 = vstv %s2228_s21 }
  0xa2   : > { %609 = vmatprep.subr.bf16.mxu1 %v2921_v17  ;;  %v3660_v34 = vld [vmem:[%s3590_s25] sm:$0xff]   ;;  %v3692_v50 = vld [vmem:[%s3590_s25 + $0x10] sm:$0xff]   ;;  %v2972_v59 = vld [vmem:[#allocation11 + $0xcc] ss:$16 sps:$4 sm:$0xff]   ;;  %v1495_v0 = vsel %vm1493_vm3, 1, %v3335_v3  ;;  %vm2231_vm6 = vcmp.lt.s32.totalorder %v2229_v62, %v780_v53  ;;  %v1864_v5 = vsel %vm1862_vm5, 1, %v3335_v3 }
  0xa3   : > { %998 = vmatpush1.bf16.msra.mxu0 %v3636_v18  ;;  %v3664_v36 = vld [vmem:[#allocation2] sm:$0xff]  ;;  %v3710_v61 = vld [vmem:[%s3590_s25 + $0x18] sm:$0xff]   ;;  %s4068_s16 = sld [smem:[#allocation7]]  ;;  %s2764_s15 = sshll.u32 %s3408_s0, 10 }
  0xa4   : > { %999 = vmatprep.subr.bf16.mxu0 %v3639_v20  ;;  %v3672_v40 = vpack.c.bf16 %v3667_v37, %v3664_v36  ;;  %v779_v52 = vld [vmem:[%s4164_s1] sm:$0xff]  ;;  %v2970_v63 = vld [vmem:[#allocation11 + $0xc8] ss:$16 sps:$4 sm:$0xff]   ;;  %v2975_v1 = vld [vmem:[#allocation11 + $0xec] ss:$16 sps:$4 sm:$0xff]   ;;  %s2462_s18 = sshll.u32 %s3608_s27, 4  ;;  %s4115_s0 = scalar_lea.hbm %s4171_s8, %s2764_s15  ;;  %s4117_s18 = int_to_ptr.vmem [resolvable:$true] %s2462_s18 }
  0xa5   : > { %610 = vmatpush1.bf16.msra.mxu1 %v2923_v19  ;;  %vm1124_vm0 = vcmp.lt.s32.totalorder %v1123_v48, %v779_v52  ;;  %vm1492_vm1 = vcmp.lt.s32.totalorder %v1491_v49, %v779_v52  ;;  %vm1861_vm4 = vcmp.lt.s32.totalorder %v1860_v58, %v779_v52  ;;  %vm2230_vm7 = vcmp.lt.s32.totalorder %v2229_v62, %v779_v52  ;;  %v2973_v4 = vld [vmem:[#allocation11 + $0xe8] ss:$16 sps:$4 sm:$0xff]   ;;  %v3739_v12 = vld [vmem:[#allocation13 + $0x4c] ss:$16 sps:$4 sm:$0xff]   ;;  %s2449_s26 = scalar_lea.sflag [#allocation10], %s3586_s23  ;;  %s3250_s21 = scalar_lea.vmem %s4117_s18, 1024 }
  0xa6   : > { %611 = vmatprep.subr.bf16.mxu1 %v2927_v21  ;;  %v1126_v56 = vsel %vm1124_vm0, 1, %v3335_v3  ;;  %v1494_v57 = vsel %vm1492_vm1, 1, %v3335_v3  ;;  %v1863_v2 = vsel %vm1861_vm4, 1, %v3335_v3  ;;  %v2232_v8 = vsel %vm2230_vm7, 1, %v3335_v3  ;;  %v3735_v11 = vld [vmem:[#allocation13 + $0x28] ss:$16 sps:$4 sm:$0xff]   ;;  %p3251_p3 = scmp.ne.s32.totalorder %s4117_s18, %s3250_s21 }
  0xa7   : > { %1000 = vmatpush1.bf16.msra.mxu0 %v3642_v22  ;;  %1129 = vperm.xlu0 %2898, %v1126_v56   ;;  %v3751_v15 = vld [vmem:[#allocation13 + $0x68] ss:$16 sps:$4 sm:$0xff]   ;;  %s3336_s11 = smov [#allocation16]  }
  0xa8   : > { %1001 = vmatprep.subr.bf16.mxu0 %v3645_v24  ;;  %1497 = vperm.xlu1 %2899, %v1494_v57   ;;  %v3758_v17 = vld [vmem:[#allocation13 + $0x88] ss:$16 sps:$4 sm:$0xff]   ;;  %p3252_p7 = pnand %p3251_p3, %p3535_p5  ;;  %s3254_s28 = sshll.u32 %s3336_s11, 4  ;;  %s3255_s28 = int_to_ptr.vmem [resolvable:$false] %s3254_s28 }
  0xa9   : > { %612 = vmatpush1.bf16.msra.mxu1 %v2929_v23  ;;  %v3765_v19 = vld [vmem:[#allocation13 + $0xa8] ss:$16 sps:$4 sm:$0xff]   ;;  %s2405_s25 = ssub.s32 %s4068_s16, %s3606_s19  ;;  %s3256_s16 = scalar_lea.vmem %s3255_s28, 2048 }
  0xaa   : > { %613 = vmatprep.subr.bf16.mxu1 %v2933_v25  ;;  %v3772_v21 = vld [vmem:[#allocation13 + $0xc8] ss:$16 sps:$4 sm:$0xff]   ;;  %s2757_s14 = sshll.u32 %s2405_s25, 4  ;;  %p3253_p12 = pneg %p3252_p7 }
  0xab   : > { %1002 = vmatpush1.bf16.msra.mxu0 %v3648_v26  ;;  %1132 = vperm.xlu0 %2898, %v1127_v60   ;;  %v3779_v23 = vld [vmem:[#allocation13 + $0xe8] ss:$16 sps:$4 sm:$0xff]   ;;  %p3257_p2 = scmp.lt.s32.totalorder %s4117_s18, %s3255_s28  ;;  %p3258_p1 = scmp.lt.s32.totalorder %s3256_s16, %s3250_s21 }
  0xac   : > { %1003 = vmatprep.subr.bf16.mxu0 %v3651_v28  ;;  %1500 = vperm.xlu1 %2899, %v1495_v0  }
  0xad   : > { %614 = vmatpush1.bf16.msra.mxu1 %v2935_v27  ;;  %v395_v27 = vld [vmem:[%s4168_s5] sm:$0xf]  ;;  %p3259_p4 = por %p3258_p1, %p3257_p2 }
  0xae   : > { %615 = vmatprep.subr.bf16.mxu1 %v2939_v29 }
  0xaf   : > { %1004 = vmatpush1.bf16.msra.mxu0 %v3654_v31  ;;  %1866 = vperm.xlu0 %2898, %v1863_v2   ;;  %p3260_p10 = pnand %p3259_p4, %p3253_p12 }
  0xb0   : > { %1005 = vmatprep.subr.bf16.mxu0 %v3657_v33  ;;  %1869 = vperm.xlu1 %2899, %v1864_v5  }
  0xb1   : > { %616 = vmatpush1.bf16.msra.mxu1 %v2941_v30 }
  0xb2   : > { %674 = vmatprep.subr.bf16.mxu1 %v2948_v32 }
  0xb3   : > { %1006 = vmatpush1.bf16.msra.mxu0 %v3662_v35  ;;  %2235 = vperm.xlu0 %2898, %v2232_v8  }
  0xb4   : > { %634 = vmatmul.mubr.bf16.vlgmr.msra.gmra.mrb[0].mxu1 %v3660_v34  ;;  %1358 = vmatprep.subr.bf16.mxu0 %v3615_v6  ;;  %v3719_v6 = vld [vmem:[#allocation13 + $0xc] ss:$16 sps:$4 sm:$0xff]  }
  0xb5   : > { %675 = vmatpush1.bf16.msra.mxu1 %v2946_v38  ;;  %643 = vmatprep.mubr.bf16.mxu1 %v3335_v3 }
  0xb6   : > { %676 = vmatprep.subr.bf16.mxu1 %v2954_v39  ;;  %1024 = vmatmul.mubr.bf16.vlgmr.msra.gmra.mrb[0].mxu0 %v3672_v40 }
  0xb7   : > { %1359 = vmatpush1.bf16.msra.mxu0 %v3617_v7  ;;  %1390 = vmatprep.mubr.bf16.mxu0 %v3335_v3  ;;  %v2233_v7 = vsel %vm2231_vm6, 1, %v3335_v3 }
  0xb8   : > { %1360 = vmatprep.subr.bf16.mxu0 %v3622_v9  ;;  %v3724_v9 = vld [vmem:[#allocation13 + $0x8] ss:$16 sps:$4 sm:$0xff]   ;;  %2238 = vperm.xlu1 %2899, %v2233_v7  }
  0xb9   : > { %677 = vmatpush1.bf16.msra.mxu1 %v2952_v41 }
  0xba   : > { %678 = vmatprep.subr.bf16.mxu1 %v2958_v42 }
  0xbb   : > { %1361 = vmatpush1.bf16.msra.mxu0 %v3624_v10  ;;  %v3730_v10 = vld [vmem:[#allocation13 + $0x2c] ss:$16 sps:$4 sm:$0xff]  }
  0xbc   : > { %644 = vmatmul.mubr.bf16.gmra.mrb[4].mxu1 %v3680_v43  ;;  %1362 = vmatprep.subr.bf16.mxu0 %v3627_v13  ;;  %v3744_v13 = vld [vmem:[#allocation13 + $0x48] ss:$16 sps:$4 sm:$0xff]  }
  0xbd   : > { %679 = vmatpush1.bf16.msra.mxu1 %v2956_v44  ;;  %653 = vmatprep.mubr.bf16.mxu1 %v3335_v3 }
  0xbe   : > { %680 = vmatprep.subr.bf16.mxu1 %v2961_v45 }
  0xbf   : > { %1363 = vmatpush1.bf16.msra.mxu0 %v3630_v14  ;;  %v3747_v14 = vld [vmem:[#allocation13 + $0x6c] ss:$16 sps:$4 sm:$0xff]  }
  0xc0   : > { %1364 = vmatprep.subr.bf16.mxu0 %v3633_v16  ;;  %v3755_v16 = vld [vmem:[#allocation13 + $0x8c] ss:$16 sps:$4 sm:$0xff]  }
  0xc1   : > { %681 = vmatpush1.bf16.msra.mxu1 %v2959_v46 }
  0xc2   : > { %682 = vmatprep.subr.bf16.mxu1 %v2965_v47 }
  0xc3   : > { %1365 = vmatpush1.bf16.msra.mxu0 %v3636_v18  ;;  %v3761_v18 = vld [vmem:[#allocation13 + $0xac] ss:$16 sps:$4 sm:$0xff]  }
  0xc4   : > { %654 = vmatmul.mubr.bf16.gmra.mrb[8].mxu1 %v3692_v50  ;;  %1366 = vmatprep.subr.bf16.mxu0 %v3639_v20  ;;  %v3769_v20 = vld [vmem:[#allocation13 + $0xcc] ss:$16 sps:$4 sm:$0xff]  }
  0xc5   : > { %683 = vmatpush1.bf16.msra.mxu1 %v2963_v51  ;;  %663 = vmatprep.mubr.bf16.mxu1 %v3335_v3 }
  0xc6   : > { %684 = vmatprep.subr.bf16.mxu1 %v2968_v54 }
  0xc7   : > { %1367 = vmatpush1.bf16.msra.mxu0 %v3642_v22  ;;  %v3775_v22 = vld [vmem:[#allocation13 + $0xec] ss:$16 sps:$4 sm:$0xff]  }
  0xc8   : > { %1368 = vmatprep.subr.bf16.mxu0 %v3645_v24  ;;  %v397_v24 = vlaneseq }
  0xc9   : > { %685 = vmatpush1.bf16.msra.mxu1 %v2966_v55 }
  0xca   : > { %686 = vmatprep.subr.bf16.mxu1 %v2972_v59  ;;  %v3803_v25 = vshrl.u32 %v397_v24, 7 }
  0xcb   : > { %1369 = vmatpush1.bf16.msra.mxu0 %v3648_v26 }
  0xcc   : > { %664 = vmatmul.mubr.bf16.gmra.mrb[12].mxu1 %v3710_v61  ;;  %1370 = vmatprep.subr.bf16.mxu0 %v3651_v28  ;;  %v399_v26 = vsub.s32 0, %v3803_v25  ;;  %v403_v28 = vsub.s32 1, %v3803_v25 }
  0xcd   : > { %687 = vmatpush1.bf16.msra.mxu1 %v2970_v63  ;;  %706 = vmatprep.mubr.bf16.mxu1 %v3335_v3 }
  0xce   : > { %688 = vmatprep.subr.bf16.mxu1 %v2975_v1  ;;  %v400_v29 = vrot.slane %v395_v27, %v399_v26 }
  0xcf   : > { %1371 = vmatpush1.bf16.msra.mxu0 %v3654_v31  ;;  %v404_v31 = vrot.slane %v395_v27, %v403_v28 }
  0xd0   : > { %1372 = vmatprep.subr.bf16.mxu0 %v3657_v33 }
  0xd1   : > { %689 = vmatpush1.bf16.msra.mxu1 %v2973_v4 }
  0xd2   : > { %1034 = vmatprep.subr.bf16.mxu1 %v3719_v6 }
  0xd3   : > { %1373 = vmatpush1.bf16.msra.mxu0 %v3662_v35 }
  0xd4   : > { %707 = vmatmul.mubr.bf16.vlgmr.msra.gmra.mrb[16].mxu1 %v3660_v34 }
  0xd5   : > { %1035 = vmatpush1.bf16.msra.mxu1 %v3724_v9  ;;  %716 = vmatprep.mubr.bf16.mxu1 %v3335_v3 }
  0xd6   : > { %1036 = vmatprep.subr.bf16.mxu1 %v3730_v10 }
  0xd9   : > { %1037 = vmatpush1.bf16.msra.mxu1 %v3735_v11 }
  0xda   : > { %1038 = vmatprep.subr.bf16.mxu1 %v3739_v12 }
  0xdc   : > { %717 = vmatmul.mubr.bf16.gmra.mrb[20].mxu1 %v3680_v43 }
  0xdd   : > { %1039 = vmatpush1.bf16.msra.mxu1 %v3744_v13  ;;  %726 = vmatprep.mubr.bf16.mxu1 %v3335_v3 }
  0xde   : > { %1040 = vmatprep.subr.bf16.mxu1 %v3747_v14 }
  0xe1   : > { %1041 = vmatpush1.bf16.msra.mxu1 %v3751_v15 }
  0xe2   : > { %1042 = vmatprep.subr.bf16.mxu1 %v3755_v16 }
  0xe4   : > { %727 = vmatmul.mubr.bf16.gmra.mrb[24].mxu1 %v3692_v50 }
  0xe5   : > { %1043 = vmatpush1.bf16.msra.mxu1 %v3758_v17  ;;  %736 = vmatprep.mubr.bf16.mxu1 %v3335_v3 }
  0xe6   : > { %1044 = vmatprep.subr.bf16.mxu1 %v3761_v18 }
  0xe9   : > { %1045 = vmatpush1.bf16.msra.mxu1 %v3765_v19 }
  0xea   : > { %1046 = vmatprep.subr.bf16.mxu1 %v3769_v20 }
  0xec   : > { %737 = vmatmul.mubr.bf16.gmra.mrb[28].mxu1 %v3710_v61 }
  0xed   : > { %1047 = vmatpush1.bf16.msra.mxu1 %v3772_v21  ;;  %1066 = vmatprep.mubr.bf16.mxu1 %v3335_v3 }
  0xee   : > { %1048 = vmatprep.subr.bf16.mxu1 %v3775_v22 }
  0xf1   : > { %1049 = vmatpush1.bf16.msra.mxu1 %v3779_v23 }
  0xf2   : > { %1401 = vmatprep.subr.bf16.mxu1 %v3719_v6 }
  0xf4   : > { %1067 = vmatmul.mubr.bf16.vlgmr.msra.gmra.mrb[32].mxu1 %v3672_v40 }
  0xf5   : > { %1402 = vmatpush1.bf16.msra.mxu1 %v3724_v9  ;;  %1433 = vmatprep.mubr.bf16.mxu1 %v3335_v3 }
  0xf6   : > { %1403 = vmatprep.subr.bf16.mxu1 %v3730_v10 }
  0xf9   : > { %1404 = vmatpush1.bf16.msra.mxu1 %v3735_v11 }
  0xfa   : > { %1405 = vmatprep.subr.bf16.mxu1 %v3739_v12 }
  0xfd   : > { %1406 = vmatpush1.bf16.msra.mxu1 %v3744_v13 }
  0xfe   : > { %1407 = vmatprep.subr.bf16.mxu1 %v3747_v14 }
 0x101   : > { %1408 = vmatpush1.bf16.msra.mxu1 %v3751_v15 }
 0x102   : > { %1409 = vmatprep.subr.bf16.mxu1 %v3755_v16 }
 0x105   : > { %1410 = vmatpush1.bf16.msra.mxu1 %v3758_v17 }
 0x106   : > { %1411 = vmatprep.subr.bf16.mxu1 %v3761_v18 }
 0x109   : > { %1412 = vmatpush1.bf16.msra.mxu1 %v3765_v19 }
 0x10a   : > { %1413 = vmatprep.subr.bf16.mxu1 %v3769_v20 }
 0x10d   : > { %1414 = vmatpush1.bf16.msra.mxu1 %v3772_v21 }
 0x10e   : > { %1415 = vmatprep.subr.bf16.mxu1 %v3775_v22 }
 0x111   : > { %1416 = vmatpush1.bf16.msra.mxu1 %v3779_v23 }
 0x112   : > { %1770 = vmatprep.subr.bf16.mxu1 %v3719_v6 }
 0x187   : > { %v635_v30 = vpop.f32.mrb[0].mxu1 }
 0x188   : > { %v637_v32 = vpop.f32.mrb[1].mxu1  ;;  %v636_v34 = vadd.f32 %v635_v30, %v400_v29 }
 0x189   : > { %v639_v33 = vpop.f32.mrb[2].mxu1  ;;  %v1025_v39 = vpop.f32.mrb[0].mxu0  ;;  %v638_v40 = vadd.f32 %v637_v32, %v404_v31 }
 0x18a   : > { %v640_v35 = vadd.f32 %v639_v33, %v400_v29  ;;  %v641_v38 = vpop.f32.mrb[3].mxu1  ;;  %v1027_v42 = vpop.f32.mrb[1].mxu0 }
 0x18b   : > { %v642_v41 = vadd.f32 %v641_v38, %v404_v31  ;;  %v1029_v44 = vpop.f32.mrb[2].mxu0 }
 0x18c   : > { %v747_v43 = vpack.c.bf16 %v640_v35, %v636_v34  ;;  %v1031_v46 = vpop.f32.mrb[3].mxu0 }
 0x18d   : > { %v748_v45 = vpack.c.bf16 %v642_v41, %v638_v40  ;;  %v407_v40 = vsub.s32 2, %v3803_v25 }
 0x18e   : > { %v788_v47 = vunpack.c.l.bf16 %v747_v43  ;;  %v792_v48 = vunpack.c.h.bf16 %v747_v43 }
 0x18f   : > { %v789_v49 = vunpack.c.l.bf16 %v748_v45  ;;  %v645_v50 = vpop.f32.mrb[4].mxu1  ;;  %v793_v51 = vunpack.c.h.bf16 %v748_v45  ;;  %v408_v45 = vrot.slane %v395_v27, %v407_v40 }
 0x190   : > { %v3810_v52 = vadd.f32 %v1025_v39, %v788_v47  ;;  %v646_v53 = vadd.f32 %v645_v50, %v400_v29  ;;  %v3812_v54 = vadd.f32 %v1029_v44, %v792_v48  ;;  %v647_v55 = vpop.f32.mrb[5].mxu1 }
 0x191   : > { %v1078_v56 = vadd.f32 %v1027_v42, %v789_v49  ;;  %v648_v57 = vadd.f32 %v647_v55, %v404_v31  ;;  %v3814_v58 = vadd.f32 %v1031_v46, %v793_v51  ;;  %v649_v59 = vpop.f32.mrb[6].mxu1  ;;  %v411_v42 = vsub.s32 3, %v3803_v25 }
 0x192   : > { %v650_v60 = vadd.f32 %v649_v59, %v400_v29  ;;  %v651_v61 = vpop.f32.mrb[7].mxu1  ;;  %v1085_v40 = vmul.f32 0.5, %v3810_v52 }
 0x193   : > { %v652_v62 = vadd.f32 %v651_v61, %v404_v31  ;;  %v412_v47 = vrot.slane %v395_v27, %v411_v42  ;;  %v1094_v42 = vmul.f32 0.5, %v3814_v58 }
 0x194   : > { %v3816_v63 = vpack.c.bf16 %v650_v60, %v646_v53 }
 0x195   : > { %v3818_v0 = vpack.c.bf16 %v652_v62, %v648_v57 }
 0x197   : > { %v655_v1 = vpop.f32.mrb[8].mxu1 }
 0x198   : > { %v656_v2 = vadd.f32 %v655_v1, %v400_v29  ;;  %v657_v4 = vpop.f32.mrb[9].mxu1 }
 0x199   : > { %v658_v5 = vadd.f32 %v657_v4, %v404_v31  ;;  %v659_v6 = vpop.f32.mrb[10].mxu1 }
 0x19a   : > { %v660_v7 = vadd.f32 %v659_v6, %v400_v29  ;;  %v661_v8 = vpop.f32.mrb[11].mxu1 }
 0x19b   : > { %v662_v24 = vadd.f32 %v661_v8, %v404_v31 }
 0x19c   : > { %v3820_v26 = vpack.c.bf16 %v660_v7, %v656_v2 }
 0x19d   : > { %v3822_v28 = vpack.c.bf16 %v662_v24, %v658_v5 }
 0x19f   : > { %v665_v30 = vpop.f32.mrb[12].mxu1 }
 0x1a0   : > { %v666_v32 = vadd.f32 %v665_v30, %v400_v29  ;;  %v667_v33 = vpop.f32.mrb[13].mxu1 }
 0x1a1   : > { %v668_v34 = vadd.f32 %v667_v33, %v404_v31  ;;  %v669_v35 = vpop.f32.mrb[14].mxu1 }
 0x1a2   : > { %v670_v38 = vadd.f32 %v669_v35, %v400_v29  ;;  %v671_v39 = vpop.f32.mrb[15].mxu1 }
 0x1a3   : > { %v672_v41 = vadd.f32 %v671_v39, %v404_v31 }
 0x1a4   : > { %v3826_v43 = vpack.c.bf16 %v670_v38, %v666_v32  ;;  %v1093_v38 = vmul.f32 0.5, %v1078_v56 }
 0x1a5   : > { %v3828_v44 = vpack.c.bf16 %v672_v41, %v668_v34 }
 0x1a6   : > { %3056 = vtanh.f32 %v1093_v38 }
 0x1a7   : > { %v708_v46 = vpop.f32.mrb[16].mxu1  ;;  %3058 = vtanh.f32 %v1085_v40 }
 0x1a8   : > { %v710_v48 = vpop.f32.mrb[17].mxu1  ;;  %v709_v50 = vadd.f32 %v708_v46, %v408_v45  ;;  %3060 = vtanh.f32 %v1094_v42 }
 0x1a9   : > { %v712_v49 = vpop.f32.mrb[18].mxu1  ;;  %v711_v55 = vadd.f32 %v710_v48, %v412_v47  ;;  %v1086_v48 = vmul.f32 0.5, %v3812_v54 }
 0x1aa   : > { %v713_v51 = vadd.f32 %v712_v49, %v408_v45  ;;  %v714_v53 = vpop.f32.mrb[19].mxu1 }
 0x1ab   : > { %v715_v29 = vadd.f32 %v714_v53, %v412_v47  ;;  %3062 = vtanh.f32 %v1086_v48 }
 0x1ac   : > { %v749_v57 = vpack.c.bf16 %v713_v51, %v709_v50 }
 0x1ad   : > { %v750_v59 = vpack.c.bf16 %v715_v29, %v711_v55 }
 0x1ae   : > { %v794_v54 = vunpack.c.h.bf16 %v749_v57 }
 0x1af   : > { %v718_v60 = vpop.f32.mrb[20].mxu1 }
 0x1b0   : > { %v719_v31 = vadd.f32 %v718_v60, %v408_v45  ;;  %v720_v61 = vpop.f32.mrb[21].mxu1 }
 0x1b1   : > { %v721_v62 = vadd.f32 %v720_v61, %v412_v47  ;;  %v722_v1 = vpop.f32.mrb[22].mxu1  ;;  %v791_v61 = vunpack.c.l.bf16 %v750_v59 }
 0x1b2   : > { %v723_v2 = vadd.f32 %v722_v1, %v408_v45  ;;  %v724_v4 = vpop.f32.mrb[23].mxu1 }
 0x1b3   : > { %v725_v5 = vadd.f32 %v724_v4, %v412_v47 }
 0x1b4   : > { %v3830_v6 = vpack.c.bf16 %v723_v2, %v719_v31  ;;  %v790_v31 = vunpack.c.l.bf16 %v749_v57  ;;  %v3845_v57 = vld [vmem:[#allocation3] sm:$0xff] }
 0x1b5   : > { %v3832_v27 = vpack.c.bf16 %v725_v5, %v721_v62  ;;  %v795_v5 = vunpack.c.h.bf16 %v750_v59 }
 0x1b7   : > { %v728_v7 = vpop.f32.mrb[24].mxu1 }
 0x1b8   : > { %v729_v8 = vadd.f32 %v728_v7, %v408_v45  ;;  %v730_v24 = vpop.f32.mrb[25].mxu1  ;;  %v3057_v7 = vpop.eup %3056 }
 0x1b9   : > { %v731_v30 = vadd.f32 %v730_v24, %v412_v47  ;;  %v732_v32 = vpop.f32.mrb[26].mxu1  ;;  %v3059_v24 = vpop.eup %3058 }
 0x1ba   : > { %v733_v33 = vadd.f32 %v732_v32, %v408_v45  ;;  %v734_v34 = vpop.f32.mrb[27].mxu1  ;;  %v1097_v32 = vmul.f32 0.5, %v3057_v7 }
 0x1bb   : > { %v735_v35 = vadd.f32 %v734_v34, %v412_v47 }
 0x1bc   : > { %v3834_v39 = vpack.c.bf16 %v733_v33, %v729_v8  ;;  %v1099_v42 = vadd.f32 0.5, %v1097_v32 }
 0x1bd   : > { %v3837_v41 = vpack.c.bf16 %v735_v35, %v731_v30  ;;  %v3061_v30 = vpop.eup %3060  ;;  %v1089_v35 = vmul.f32 0.5, %v3059_v24 }
 0x1be   : > { %v3063_v34 = vpop.eup %3062  ;;  %v1098_v38 = vmul.f32 0.5, %v3061_v30 }
 0x1bf   : > { %v738_v46 = vpop.f32.mrb[28].mxu1  ;;  %v1091_v59 = vadd.f32 0.5, %v1089_v35 }
 0x1c0   : > { %v739_v49 = vadd.f32 %v738_v46, %v408_v45  ;;  %v740_v50 = vpop.f32.mrb[29].mxu1  ;;  %v1090_v46 = vmul.f32 0.5, %v3063_v34  ;;  %v1100_v48 = vadd.f32 0.5, %v1098_v38  ;;  %v1157_v38 = vunpack.c.l.bf16 %v3830_v6 }
 0x1c1   : > { %v741_v51 = vadd.f32 %v740_v50, %v412_v47  ;;  %v742_v53 = vpop.f32.mrb[30].mxu1  ;;  %v3847_v50 = vld [vmem:[#allocation3 + $0x8] sm:$0xff] }
 0x1c2   : > { %v743_v55 = vadd.f32 %v742_v53, %v408_v45  ;;  %v744_v56 = vpop.f32.mrb[31].mxu1  ;;  %v1113_v53 = vmul.f32 %v3845_v57, %v1099_v42 }
 0x1c3   : > { %v745_v29 = vadd.f32 %v744_v56, %v412_v47 }
 0x1c4   : > { %v3841_v60 = vpack.c.bf16 %v743_v55, %v739_v49 }
 0x1c5   : > { %v3843_v52 = vpack.c.bf16 %v745_v29, %v741_v51  ;;  %v1092_v51 = vadd.f32 0.5, %v1090_v46  ;;  %v1156_v46 = vunpack.c.l.bf16 %v3818_v0 }
 0x1c7   : > { %v1068_v58 = vpop.f32.mrb[32].mxu1 }
 0x1c8   : > { %v1079_v62 = vadd.f32 %v1068_v58, %v790_v31  ;;  %v1070_v1 = vpop.f32.mrb[33].mxu1  ;;  %v1114_v31 = vmul.f32 %v3847_v50, %v1100_v48 }
 0x1c9   : > { %v1080_v2 = vadd.f32 %v1070_v1, %v791_v61  ;;  %v1072_v4 = vpop.f32.mrb[34].mxu1 }
 0x1ca   : > { %3064 = vtanh.f32 %v1079_v62  ;;  %v1083_v8 = vadd.f32 %v1072_v4, %v794_v54  ;;  %v1074_v45 = vpop.f32.mrb[35].mxu1 }
 0x1cb   : > { %v1084_v47 = vadd.f32 %v1074_v45, %v795_v5  ;;  %v1103_v33 = vmul.f32 0.5, %v1080_v2  ;;  %v3857_v2 = vpop.permute.xlu0 %1129 }
 0x1cc   : > { %3066 = vtanh.f32 %v1083_v8  ;;  %vm1134_vm8 = vcmp.eq.s32.totalorder %v3857_v2, 1  ;;  %v3053_v2 = vld [vmem:[#allocation14 + $0x28] sm:$0xff]  }
 0x1cd   : > { %v1104_v40 = vmul.f32 0.5, %v1084_v47  ;;  %3068 = vtanh.f32 %v1103_v33 }
 0x1cf   : > { %3070 = vtanh.f32 %v1104_v40  ;;  %v3861_v24 = vpop.permute.xlu0 %1132 }
 0x1d0   : > { %vm1135_vm9 = vcmp.eq.s32.totalorder %v3861_v24, 1  ;;  %v3054_v24 = vld [vmem:[#allocation14 + $0x30] sm:$0xff]  }
 0x1d1   : > { %vm2765_vm14 = vmpackc.low %vm1135_vm9, %vm1134_vm8 }
 0x1d4   : > { %v3065_v49 = vpop.eup %3064 }
 0x1d5   : > { %v1115_v55 = vmul.f32 %v3065_v49, %v1091_v59  ;;  %v1158_v59 = vunpack.c.l.bf16 %v3832_v27 }
 0x1d6   : > { %v3067_v56 = vpop.eup %3066 }
 0x1d7   : > { %v3850_v29 = vadd.f32 %v1115_v55, %v1113_v53  ;;  %v1116_v58 = vmul.f32 %v3067_v56, %v1092_v51  ;;  %v3069_v62 = vpop.eup %3068  ;;  %v1159_v55 = vunpack.c.h.bf16 %v3816_v63  ;;  %v1161_v56 = vunpack.c.h.bf16 %v3830_v6 }
 0x1d8   : > { %v1107_v54 = vmul.f32 0.5, %v3069_v62 }
 0x1d9   : > { %3072 = vtanh.f32 %v3850_v29  ;;  %v3854_v61 = vadd.f32 %v1116_v58, %v1114_v31  ;;  %v3071_v1 = vpop.eup %3070 }
 0x1da   : > { %v1108_v4 = vmul.f32 0.5, %v3071_v1  ;;  %v1109_v5 = vadd.f32 0.5, %v1107_v54  ;;  %v1160_v54 = vunpack.c.h.bf16 %v3818_v0 }
 0x1db   : > { %3074 = vtanh.f32 %v3854_v61 }
 0x1dc   : > { %v1110_v8 = vadd.f32 0.5, %v1108_v4  ;;  %v1162_v4 = vunpack.c.h.bf16 %v3832_v27 }
 0x1e3   : > { %v3073_v7 = vpop.eup %3072 }
 0x1e4   : > { %v3859_v45 = vmul.f32 %v3073_v7, %v1109_v5 }
 0x1e5   : > { %v3075_v47 = vpop.eup %3074 }
 0x1e6   : > { %v3863_v30 = vmul.f32 %v3075_v47, %v1110_v8  ;;  %v3871_v32 = vsel %vm1134_vm8, %v3859_v45, %v3664_v36  ;;  %v3002_v36 = vld [vmem:[#allocation13 + $0x4] ss:$16 sps:$4 sm:$0xff]  }
 0x1e7   : > { %1727 = vmatprep.subr.bf16.mxu0 %v3002_v36 }
 0x1e8   : > { %v3877_v33 = vsel %vm1135_vm9, %v3863_v30, %v3667_v37  ;;  %v2766_v34 = vpack.c.bf16 %v3863_v30, %v3859_v45  ;;  %v3900_v37 = vld [vmem:[#allocation13] ss:$16 sps:$4 sm:$0xff]   ;;  %v1893_v45 = vunpack.c.l.bf16 %v3826_v43  ;;  %v1895_v30 = vunpack.c.l.bf16 %v3841_v60 }
 0x1e9   : > { %v1165_v35 = vpack.c.bf16 %v3877_v33, %v3871_v32 }
 0x1eb   : > { %1391 = vmatmul.mubr.bf16.vlgmr.msra.gmra.mrb[4].mxu0 %v1165_v35  ;;  %1434 = vmatmul.mubr.bf16.vlgmr.msra.gmra.mrb[36].mxu1 %v1165_v35 }
 0x1ec   : > { %1771 = vmatpush1.bf16.msra.mxu1 %v3724_v9  ;;  %1759 = vmatprep.mubr.bf16.mxu0 %v3335_v3  ;;  %v3903_v9 = vld [vmem:[#allocation13 + $0x24] ss:$16 sps:$4 sm:$0xff]  }
 0x1ed   : > { %1772 = vmatprep.subr.bf16.mxu1 %v3730_v10  ;;  %1802 = vmatprep.mubr.bf16.mxu1 %v3335_v3  ;;  %v3905_v10 = vld [vmem:[#allocation13 + $0x20] ss:$16 sps:$4 sm:$0xff]  }
 0x1ee   : > { %1728 = vmatpush1.bf16.msra.mxu0 %v3900_v37 }
 0x1ef   : > { %1729 = vmatprep.subr.bf16.mxu0 %v3903_v9 }
 0x1f0   : > { %1773 = vmatpush1.bf16.msra.mxu1 %v3735_v11  ;;  %v3909_v11 = vld [vmem:[#allocation13 + $0x44] ss:$16 sps:$4 sm:$0xff]  }
 0x1f1   : > { %1774 = vmatprep.subr.bf16.mxu1 %v3739_v12  ;;  %v3911_v12 = vld [vmem:[#allocation13 + $0x40] ss:$16 sps:$4 sm:$0xff]  }
 0x1f2   : > { %1730 = vmatpush1.bf16.msra.mxu0 %v3905_v10 }
 0x1f3   : > { %1731 = vmatprep.subr.bf16.mxu0 %v3909_v11 }
 0x1f4   : > { %1775 = vmatpush1.bf16.msra.mxu1 %v3744_v13  ;;  %v3915_v13 = vld [vmem:[#allocation13 + $0x64] ss:$16 sps:$4 sm:$0xff]  }
 0x1f5   : > { %1776 = vmatprep.subr.bf16.mxu1 %v3747_v14  ;;  %v3917_v14 = vld [vmem:[#allocation13 + $0x60] ss:$16 sps:$4 sm:$0xff]  }
 0x1f6   : > { %1732 = vmatpush1.bf16.msra.mxu0 %v3911_v12 }
 0x1f7   : > { %1733 = vmatprep.subr.bf16.mxu0 %v3915_v13 }
 0x1f8   : > { %1777 = vmatpush1.bf16.msra.mxu1 %v3751_v15  ;;  %v3921_v15 = vld [vmem:[#allocation13 + $0x84] ss:$16 sps:$4 sm:$0xff]  }
 0x1f9   : > { %1778 = vmatprep.subr.bf16.mxu1 %v3755_v16  ;;  %v3923_v16 = vld [vmem:[#allocation13 + $0x80] ss:$16 sps:$4 sm:$0xff]  }
 0x1fa   : > { %1734 = vmatpush1.bf16.msra.mxu0 %v3917_v14 }
 0x1fb   : > { %1735 = vmatprep.subr.bf16.mxu0 %v3921_v15 }
 0x1fc   : > { %1779 = vmatpush1.bf16.msra.mxu1 %v3758_v17  ;;  %v3927_v17 = vld [vmem:[#allocation13 + $0xa4] ss:$16 sps:$4 sm:$0xff]  }
 0x1fd   : > { %1780 = vmatprep.subr.bf16.mxu1 %v3761_v18  ;;  %v3929_v18 = vld [vmem:[#allocation13 + $0xa0] ss:$16 sps:$4 sm:$0xff]  }
 0x1fe   : > { %1736 = vmatpush1.bf16.msra.mxu0 %v3923_v16 }
 0x1ff   : > { %1737 = vmatprep.subr.bf16.mxu0 %v3927_v17 }
 0x200   : > { %1781 = vmatpush1.bf16.msra.mxu1 %v3765_v19  ;;  %v3933_v19 = vld [vmem:[#allocation13 + $0xc4] ss:$16 sps:$4 sm:$0xff]  }
 0x201   : > { %1782 = vmatprep.subr.bf16.mxu1 %v3769_v20  ;;  %v3935_v20 = vld [vmem:[#allocation13 + $0xc0] ss:$16 sps:$4 sm:$0xff]  }
 0x202   : > { %1738 = vmatpush1.bf16.msra.mxu0 %v3929_v18 }
 0x203   : > { %1739 = vmatprep.subr.bf16.mxu0 %v3933_v19 }
 0x204   : > { %1783 = vmatpush1.bf16.msra.mxu1 %v3772_v21  ;;  %v3939_v21 = vld [vmem:[#allocation13 + $0xe4] ss:$16 sps:$4 sm:$0xff]  }
 0x205   : > { %1784 = vmatprep.subr.bf16.mxu1 %v3775_v22  ;;  %v3941_v22 = vld [vmem:[#allocation13 + $0xe0] ss:$16 sps:$4 sm:$0xff]  }
 0x206   : > { %1740 = vmatpush1.bf16.msra.mxu0 %v3935_v20 }
 0x207   : > { %1741 = vmatprep.subr.bf16.mxu0 %v3939_v21 }
 0x208   : > { %1785 = vmatpush1.bf16.msra.mxu1 %v3779_v23  ;;  %v1155_v23 = vunpack.c.l.bf16 %v3816_v63 }
 0x20a   : > { %1742 = vmatpush1.bf16.msra.mxu0 %v3941_v22 }
 0x20b   : > { %2096 = vmatprep.subr.bf16.mxu0 %v3002_v36 }
 0x2be   : > { %v1392_v40 = vpop.f32.mrb[4].mxu0  ;;  %v1435_v42 = vpop.f32.mrb[36].mxu1 }
 0x2bf   : > { %v1444_v48 = vadd.f32 %v1392_v40, %v1155_v23  ;;  %v1446_v49 = vadd.f32 %v1435_v42, %v1157_v38  ;;  %v1394_v51 = vpop.f32.mrb[5].mxu0  ;;  %v1437_v53 = vpop.f32.mrb[37].mxu1 }
 0x2c0   : > { %v1445_v31 = vadd.f32 %v1394_v51, %v1156_v46  ;;  %v1447_v58 = vadd.f32 %v1437_v53, %v1158_v59  ;;  %v1396_v62 = vpop.f32.mrb[6].mxu0  ;;  %v1439_v1 = vpop.f32.mrb[38].mxu1 }
 0x2c1   : > { %v1452_v5 = vmul.f32 0.5, %v1444_v48  ;;  %v1448_v7 = vadd.f32 %v1396_v62, %v1159_v55  ;;  %v1450_v8 = vadd.f32 %v1439_v1, %v1161_v56  ;;  %v1398_v47 = vpop.f32.mrb[7].mxu0  ;;  %v1441_v35 = vpop.f32.mrb[39].mxu1 }
 0x2c2   : > { %v1460_v36 = vmul.f32 0.5, %v1445_v31  ;;  %v1449_v23 = vadd.f32 %v1398_v47, %v1160_v54  ;;  %v1451_v38 = vadd.f32 %v1441_v35, %v1162_v4  ;;  %v1470_v40 = vmul.f32 0.5, %v1447_v58  ;;  %v3953_v55 = vpop.permute.xlu1 %1497 }
 0x2c3   : > { %3076 = vtanh.f32 %v1452_v5  ;;  %v1453_v63 = vmul.f32 0.5, %v1448_v7  ;;  %vm1502_vm10 = vcmp.eq.s32.totalorder %v3953_v55, 1  ;;  %v1141_v35 = vsel %vm1135_vm9, %v3854_v61, %v3847_v50 }
 0x2c4   : > { %3078 = vtanh.f32 %v1460_v36  ;;  %v1461_v6 = vmul.f32 0.5, %v1449_v23  ;;  %v1471_v59 = vmul.f32 0.5, %v1451_v38  ;;  %v1896_v55 = vunpack.c.l.bf16 %v3843_v52 }
 0x2c5   : > { %3080 = vtanh.f32 %v1453_v63 }
 0x2c6   : > { %3082 = vtanh.f32 %v1446_v49  ;;  %v1140_v49 = vsel %vm1134_vm8, %v3850_v29, %v3845_v57  ;;  %v3964_v36 = vpop.permute.xlu1 %1500 }
 0x2c7   : > { %3084 = vtanh.f32 %v1461_v6  ;;  %vm1503_vm11 = vcmp.eq.s32.totalorder %v3964_v36, 1 }
 0x2c8   : > { %3086 = vtanh.f32 %v1450_v8  ;;  %vm2768_vm15 = vmpackc.low %vm1503_vm11, %vm1502_vm10 }
 0x2c9   : > { %3088 = vtanh.f32 %v1470_v40 }
 0x2ca   : > { %3090 = vtanh.f32 %v1471_v59 }
 0x2cd   : > { %v3077_v0 = vpop.eup %3076 }
 0x2ce   : > { %v3079_v42 = vpop.eup %3078  ;;  %v1456_v27 = vmul.f32 0.5, %v3077_v0 }
 0x2cf   : > { %v1464_v46 = vmul.f32 0.5, %v3079_v42  ;;  %v3081_v48 = vpop.eup %3080 }
 0x2d0   : > { %v1458_v51 = vadd.f32 0.5, %v1456_v27  ;;  %v3083_v53 = vpop.eup %3082  ;;  %v1457_v31 = vmul.f32 0.5, %v3081_v48 }
 0x2d1   : > { %v1466_v56 = vadd.f32 0.5, %v1464_v46  ;;  %v3085_v62 = vpop.eup %3084 }
 0x2d2   : > { %v1482_v58 = vmul.f32 %v3083_v53, %v1458_v51  ;;  %v1459_v54 = vadd.f32 0.5, %v1457_v31  ;;  %v1465_v4 = vmul.f32 0.5, %v3085_v62  ;;  %v3087_v5 = vpop.eup %3086  ;;  %v1526_v31 = vunpack.c.l.bf16 %v3834_v39 }
 0x2d3   : > { %v1480_v1 = vmul.f32 %v1466_v56, %v1140_v49  ;;  %v3089_v23 = vpop.eup %3088 }
 0x2d4   : > { %v1467_v8 = vadd.f32 0.5, %v1465_v4  ;;  %v1483_v47 = vmul.f32 %v3087_v5, %v1459_v54  ;;  %v1474_v6 = vmul.f32 0.5, %v3089_v23  ;;  %v3091_v40 = vpop.eup %3090 }
 0x2d5   : > { %v1484_v7 = vadd.f32 %v1482_v58, %v1480_v1  ;;  %v1475_v61 = vmul.f32 0.5, %v3091_v40  ;;  %v1525_v58 = vunpack.c.l.bf16 %v3822_v28  ;;  %v1527_v1 = vunpack.c.l.bf16 %v3837_v41 }
 0x2d6   : > { %v1481_v29 = vmul.f32 %v1467_v8, %v1141_v35  ;;  %v1476_v50 = vadd.f32 0.5, %v1474_v6  ;;  %v1528_v8 = vunpack.c.h.bf16 %v3820_v26  ;;  %v1529_v6 = vunpack.c.h.bf16 %v3822_v28 }
 0x2d7   : > { %3092 = vtanh.f32 %v1484_v7  ;;  %v3968_v57 = vsel %vm1502_vm10, %v1484_v7, %v1140_v49  ;;  %v1477_v27 = vadd.f32 0.5, %v1475_v61  ;;  %v1531_v40 = vunpack.c.h.bf16 %v3837_v41 }
 0x2d8   : > { %v1485_v38 = vadd.f32 %v1483_v47, %v1481_v29  ;;  %v1530_v47 = vunpack.c.h.bf16 %v3834_v39 }
 0x2da   : > { %3094 = vtanh.f32 %v1485_v38  ;;  %v3973_v63 = vsel %vm1503_vm11, %v1485_v38, %v1141_v35 }
 0x2e1   : > { %v3093_v0 = vpop.eup %3092 }
 0x2e2   : > { %v3975_v42 = vmul.f32 %v3093_v0, %v1476_v50 }
 0x2e4   : > { %v3095_v46 = vpop.eup %3094  ;;  %v3983_v48 = vsel %vm1502_vm10, %v3975_v42, %v3871_v32  ;;  %v3024_v32 = vld [vmem:[#allocation13 + $0x8] ss:$16 sps:$4 sm:$0xff]  }
 0x2e5   : > { %v3977_v59 = vmul.f32 %v3095_v46, %v1477_v27 }
 0x2e7   : > { %v3989_v51 = vsel %vm1503_vm11, %v3977_v59, %v3877_v33  ;;  %v2769_v53 = vpack.c.bf16 %v3977_v59, %v3975_v42  ;;  %v3029_v33 = vld [vmem:[#allocation13 + $0x2c] ss:$16 sps:$4 sm:$0xff]   ;;  %v1899_v42 = vunpack.c.h.bf16 %v3841_v60 }
 0x2e8   : > { %v1534_v56 = vpack.c.bf16 %v3989_v51, %v3983_v48 }
 0x2ea   : > { %1760 = vmatmul.mubr.bf16.vlgmr.msra.gmra.mrb[8].mxu0 %v1534_v56  ;;  %1803 = vmatmul.mubr.bf16.vlgmr.msra.gmra.mrb[40].mxu1 %v1534_v56 }
 0x2eb   : > { %2097 = vmatpush1.bf16.msra.mxu0 %v3900_v37  ;;  %2128 = vmatprep.mubr.bf16.mxu0 %v3335_v3  ;;  %v3027_v37 = vld [vmem:[#allocation13 + $0x28] ss:$16 sps:$4 sm:$0xff]  }
 0x2ec   : > { %2098 = vmatprep.subr.bf16.mxu0 %v3903_v9  ;;  %2171 = vmatprep.mubr.bf16.mxu1 %v3335_v3  ;;  %v3026_v3 = vld [vmem:[#allocation13 + $0xc] ss:$16 sps:$4 sm:$0xff]  }
 0x2ed   : > { %2139 = vmatprep.subr.bf16.mxu1 %v3026_v3  ;;  %v3032_v9 = vld [vmem:[#allocation13 + $0x4c] ss:$16 sps:$4 sm:$0xff]  }
 0x2ee   : > { %2140 = vmatpush1.bf16.msra.mxu1 %v3024_v32 }
 0x2ef   : > { %2099 = vmatpush1.bf16.msra.mxu0 %v3905_v10  ;;  %2141 = vmatprep.subr.bf16.mxu1 %v3029_v33  ;;  %v3030_v10 = vld [vmem:[#allocation13 + $0x48] ss:$16 sps:$4 sm:$0xff]  }
 0x2f0   : > { %2100 = vmatprep.subr.bf16.mxu0 %v3909_v11  ;;  %v3035_v11 = vld [vmem:[#allocation13 + $0x6c] ss:$16 sps:$4 sm:$0xff]  }
 0x2f2   : > { %2142 = vmatpush1.bf16.msra.mxu1 %v3027_v37 }
 0x2f3   : > { %2101 = vmatpush1.bf16.msra.mxu0 %v3911_v12  ;;  %2143 = vmatprep.subr.bf16.mxu1 %v3032_v9  ;;  %v3033_v12 = vld [vmem:[#allocation13 + $0x68] ss:$16 sps:$4 sm:$0xff]  }
 0x2f4   : > { %2102 = vmatprep.subr.bf16.mxu0 %v3915_v13  ;;  %v3038_v13 = vld [vmem:[#allocation13 + $0x8c] ss:$16 sps:$4 sm:$0xff]  }
 0x2f6   : > { %2144 = vmatpush1.bf16.msra.mxu1 %v3030_v10 }
 0x2f7   : > { %2103 = vmatpush1.bf16.msra.mxu0 %v3917_v14  ;;  %2145 = vmatprep.subr.bf16.mxu1 %v3035_v11  ;;  %v3036_v14 = vld [vmem:[#allocation13 + $0x88] ss:$16 sps:$4 sm:$0xff]  }
 0x2f8   : > { %2104 = vmatprep.subr.bf16.mxu0 %v3921_v15  ;;  %v3041_v15 = vld [vmem:[#allocation13 + $0xac] ss:$16 sps:$4 sm:$0xff]  }
 0x2fa   : > { %2146 = vmatpush1.bf16.msra.mxu1 %v3033_v12 }
 0x2fb   : > { %2105 = vmatpush1.bf16.msra.mxu0 %v3923_v16  ;;  %2147 = vmatprep.subr.bf16.mxu1 %v3038_v13  ;;  %v3039_v16 = vld [vmem:[#allocation13 + $0xa8] ss:$16 sps:$4 sm:$0xff]  }
 0x2fc   : > { %2106 = vmatprep.subr.bf16.mxu0 %v3927_v17  ;;  %v3044_v17 = vld [vmem:[#allocation13 + $0xcc] ss:$16 sps:$4 sm:$0xff]  }
 0x2fe   : > { %2148 = vmatpush1.bf16.msra.mxu1 %v3036_v14 }
 0x2ff   : > { %2107 = vmatpush1.bf16.msra.mxu0 %v3929_v18  ;;  %2149 = vmatprep.subr.bf16.mxu1 %v3041_v15  ;;  %v3042_v18 = vld [vmem:[#allocation13 + $0xc8] ss:$16 sps:$4 sm:$0xff]  }
 0x300   : > { %2108 = vmatprep.subr.bf16.mxu0 %v3933_v19  ;;  %v3047_v19 = vld [vmem:[#allocation13 + $0xec] ss:$16 sps:$4 sm:$0xff]  }
 0x302   : > { %2150 = vmatpush1.bf16.msra.mxu1 %v3039_v16 }
 0x303   : > { %2109 = vmatpush1.bf16.msra.mxu0 %v3935_v20  ;;  %2151 = vmatprep.subr.bf16.mxu1 %v3044_v17  ;;  %v3045_v20 = vld [vmem:[#allocation13 + $0xe8] ss:$16 sps:$4 sm:$0xff]  }
 0x304   : > { %2110 = vmatprep.subr.bf16.mxu0 %v3939_v21  ;;  %v4012_v21 = vld [vmem:[#allocation14] sm:$0xff]  }
 0x306   : > { %2152 = vmatpush1.bf16.msra.mxu1 %v3042_v18 }
 0x307   : > { %2111 = vmatpush1.bf16.msra.mxu0 %v3941_v22  ;;  %2153 = vmatprep.subr.bf16.mxu1 %v3047_v19  ;;  %v1524_v22 = vunpack.c.l.bf16 %v3820_v26 }
 0x308   : > { %2789 = vmatprep.subr.bf16.mxu0 %v4012_v21 }
 0x30a   : > { %2154 = vmatpush1.bf16.msra.mxu1 %v3045_v20 }
 0x3bd   : > { %v1761_v62 = vpop.f32.mrb[8].mxu0  ;;  %v1804_v49 = vpop.f32.mrb[40].mxu1 }
 0x3be   : > { %v1813_v54 = vadd.f32 %v1761_v62, %v1524_v22  ;;  %v1815_v4 = vadd.f32 %v1804_v49, %v1526_v31  ;;  %v1763_v5 = vpop.f32.mrb[9].mxu0  ;;  %v1806_v7 = vpop.f32.mrb[41].mxu1 }
 0x3bf   : > { %v1814_v35 = vadd.f32 %v1763_v5, %v1525_v58  ;;  %v1816_v29 = vadd.f32 %v1806_v7, %v1527_v1  ;;  %v1765_v23 = vpop.f32.mrb[10].mxu0  ;;  %v1808_v38 = vpop.f32.mrb[42].mxu1 }
 0x3c0   : > { %v1821_v50 = vmul.f32 0.5, %v1813_v54  ;;  %v1817_v61 = vadd.f32 %v1765_v23, %v1528_v8  ;;  %v1819_v0 = vadd.f32 %v1808_v38, %v1530_v47  ;;  %v1767_v27 = vpop.f32.mrb[11].mxu0  ;;  %v1810_v46 = vpop.f32.mrb[43].mxu1 }
 0x3c1   : > { %v1829_v56 = vmul.f32 0.5, %v1814_v35  ;;  %v1818_v3 = vadd.f32 %v1767_v27, %v1529_v6  ;;  %v1820_v32 = vadd.f32 %v1810_v46, %v1531_v40  ;;  %v1839_v33 = vmul.f32 0.5, %v1816_v29  ;;  %v1867_v31 = vpop.permute.xlu0 %1866  ;;  %v1870_v5 = vpop.permute.xlu1 %1869  ;;  %v3049_v46 = vld [vmem:[#allocation14 + $0x8] sm:$0xff]  }
 0x3c2   : > { %3096 = vtanh.f32 %v1821_v50  ;;  %v1822_v26 = vmul.f32 0.5, %v1817_v61  ;;  %vm1871_vm12 = vcmp.eq.s32.totalorder %v1867_v31, 1  ;;  %vm1872_vm13 = vcmp.eq.s32.totalorder %v1870_v5, 1 }
 0x3c3   : > { %3098 = vtanh.f32 %v1829_v56  ;;  %v1830_v39 = vmul.f32 0.5, %v1818_v3  ;;  %v1840_v10 = vmul.f32 0.5, %v1820_v32  ;;  %v3052_v56 = vld [vmem:[#allocation14 + $0x20] sm:$0xff]   ;;  %vm2771_vm0 = vmpackc.low %vm1872_vm13, %vm1871_vm12  ;;  %v1894_v32 = vunpack.c.l.bf16 %v3828_v44 }
 0x3c4   : > { %3100 = vtanh.f32 %v1822_v26 }
 0x3c5   : > { %3102 = vtanh.f32 %v1815_v4 }
 0x3c6   : > { %3104 = vtanh.f32 %v1830_v39 }
 0x3c7   : > { %3106 = vtanh.f32 %v1819_v0 }
 0x3c8   : > { %3108 = vtanh.f32 %v1839_v33 }
 0x3c9   : > { %3110 = vtanh.f32 %v1840_v10  ;;  %v1900_v10 = vunpack.c.h.bf16 %v3843_v52 }
 0x3cc   : > { %v3097_v28 = vpop.eup %3096 }
 0x3cd   : > { %v3099_v37 = vpop.eup %3098  ;;  %v1825_v41 = vmul.f32 0.5, %v3097_v28  ;;  %v1897_v28 = vunpack.c.h.bf16 %v3826_v43 }
 0x3ce   : > { %v1833_v9 = vmul.f32 0.5, %v3099_v37  ;;  %v3101_v11 = vpop.eup %3100 }
 0x3cf   : > { %v1827_v12 = vadd.f32 0.5, %v1825_v41  ;;  %v3103_v13 = vpop.eup %3102  ;;  %v1826_v15 = vmul.f32 0.5, %v3101_v11 }
 0x3d0   : > { %v1835_v14 = vadd.f32 0.5, %v1833_v9  ;;  %v3105_v16 = vpop.eup %3104  ;;  %v1898_v9 = vunpack.c.h.bf16 %v3828_v44 }
 0x3d1   : > { %v1851_v17 = vmul.f32 %v3103_v13, %v1827_v12  ;;  %v1828_v19 = vadd.f32 0.5, %v1826_v15  ;;  %v1834_v20 = vmul.f32 0.5, %v3105_v16  ;;  %v3107_v22 = vpop.eup %3106 }
 0x3d2   : > { %v1849_v18 = vmul.f32 %v1835_v14, %v3968_v57  ;;  %v3109_v4 = vpop.eup %3108 }
 0x3d3   : > { %v1836_v49 = vadd.f32 0.5, %v1834_v20  ;;  %v1852_v58 = vmul.f32 %v3107_v22, %v1828_v19  ;;  %v1843_v47 = vmul.f32 0.5, %v3109_v4  ;;  %v3111_v35 = vpop.eup %3110 }
 0x3d4   : > { %v1853_v62 = vadd.f32 %v1851_v17, %v1849_v18  ;;  %v1844_v23 = vmul.f32 0.5, %v3111_v35 }
 0x3d5   : > { %v1850_v54 = vmul.f32 %v1836_v49, %v3973_v63  ;;  %v1845_v29 = vadd.f32 0.5, %v1843_v47  ;;  %v2236_v47 = vpop.permute.xlu0 %2235 }
 0x3d6   : > { %3112 = vtanh.f32 %v1853_v62  ;;  %v4026_v1 = vsel %vm1871_vm12, %v1853_v62, %v3968_v57  ;;  %v1846_v40 = vadd.f32 0.5, %v1844_v23  ;;  %vm2240_vm1 = vcmp.eq.s32.totalorder %v2236_v47, 1 }
 0x3d7   : > { %v1854_v7 = vadd.f32 %v1852_v58, %v1850_v54 }
 0x3d9   : > { %3114 = vtanh.f32 %v1854_v7  ;;  %v4031_v8 = vsel %vm1872_vm13, %v1854_v7, %v3973_v63 }
 0x3e0   : > { %v3113_v38 = vpop.eup %3112 }
 0x3e1   : > { %v1857_v6 = vmul.f32 %v3113_v38, %v1845_v29 }
 0x3e3   : > { %v3115_v57 = vpop.eup %3114  ;;  %v4035_v61 = vsel %vm1871_vm12, %v1857_v6, %v3983_v48  ;;  %v3050_v48 = vld [vmem:[#allocation14 + $0x10] sm:$0xff]  }
 0x3e4   : > { %v1858_v50 = vmul.f32 %v3115_v57, %v1846_v40 }
 0x3e6   : > { %v4039_v0 = vsel %vm1872_vm13, %v1858_v50, %v3989_v51  ;;  %v2772_v27 = vpack.c.bf16 %v1858_v50, %v1857_v6  ;;  %v3051_v51 = vld [vmem:[#allocation14 + $0x18] sm:$0xff]   ;;  %v2239_v50 = vpop.permute.xlu1 %2238 }
 0x3e7   : > { %v1903_v63 = vpack.c.bf16 %v4039_v0, %v4035_v61  ;;  %vm2241_vm2 = vcmp.eq.s32.totalorder %v2239_v50, 1 }
 0x3e8   : > { %vm2774_vm7 = vmpackc.low %vm2241_vm2, %vm2240_vm1 }
 0x3e9   : > { %2129 = vmatmul.mubr.bf16.vlgmr.msra.gmra.mrb[12].mxu0 %v1903_v63  ;;  %2172 = vmatmul.mubr.bf16.vlgmr.msra.gmra.mrb[44].mxu1 %v1903_v63 }
 0x3ea   : > { %2790 = vmatpush3.bf16.msra.mxu0 %v4012_v21  ;;  %2805 = vmatprep.mubr.msk.bf16.mxu0 %vm2765_vm14, %v2766_v34  ;;  %v3055_v21 = vld [vmem:[#allocation14 + $0x38] sm:$0xff]  }
 0x3eb   : > { %2791 = vmatprep.subr.bf16.mxu0 %v3049_v46 }
 0x3ee   : > { %2792 = vmatpush3.bf16.msra.mxu0 %v3049_v46 }
 0x3ef   : > { %2793 = vmatprep.subr.bf16.mxu0 %v3050_v48 }
 0x3f2   : > { %2794 = vmatpush3.bf16.msra.mxu0 %v3050_v48 }
 0x3f3   : > { %2795 = vmatprep.subr.bf16.mxu0 %v3051_v51 }
 0x3f6   : > { %2796 = vmatpush3.bf16.msra.mxu0 %v3051_v51  ;;  %v2398_v51 = vadd.s32 16, %v3803_v25 }
 0x3f7   : > { %2797 = vmatprep.subr.bf16.mxu0 %v3052_v56 }
 0x3fa   : > { %2798 = vmatpush3.bf16.msra.mxu0 %v3052_v56 }
 0x3fb   : > { %2799 = vmatprep.subr.bf16.mxu0 %v3053_v2 }
 0x3fe   : > { %2800 = vmatpush3.bf16.msra.mxu0 %v3053_v2  ;;  %v4079_v2 = vstv %s2757_s14 }
 0x3ff   : > { %2801 = vmatprep.subr.bf16.mxu0 %v3054_v24  ;;  %vm2410_vm3 = vcmp.lt.s32.totalorder %v2398_v51, %v4079_v2  ;;  %vm2408_vm4 = vcmp.lt.s32.totalorder %v3803_v25, %v4079_v2 }
 0x402   : > { %2802 = vmatpush3.bf16.msra.mxu0 %v3054_v24 }
 0x403   : > { %2803 = vmatprep.subr.bf16.mxu0 %v3055_v21 }
 0x406   : > { %2804 = vmatpush3.bf16.msra.mxu0 %v3055_v21  ;;  %v2399_v21 = vadd.s32 24, %v3803_v25 }
 0x408   : > { %vm2411_vm5 = vcmp.lt.s32.totalorder %v2399_v21, %v4079_v2 }
 0x409   : > { %2806 = vmatmul.mubr.msk.bf16.vlgmr.msra.gmra.mrb[16].mxu0 %vm2768_vm15, %v2769_v53 }
 0x40a   : > { %2809 = vmatprep.mubr.msk.bf16.mxu0 %vm2771_vm0, %v2772_v27 }
 0x4bc   : > { %v2130_v34 = vpop.f32.mrb[12].mxu0  ;;  %v2173_v3 = vpop.f32.mrb[44].mxu1 }
 0x4bd   : > { %v2182_v36 = vadd.f32 %v2130_v34, %v1893_v45  ;;  %v2184_v26 = vadd.f32 %v2173_v3, %v1895_v30  ;;  %v2132_v39 = vpop.f32.mrb[13].mxu0  ;;  %v2175_v33 = vpop.f32.mrb[45].mxu1  ;;  %v2397_v30 = vadd.s32 8, %v3803_v25 }
 0x4be   : > { %v2183_v59 = vadd.f32 %v2132_v39, %v1894_v32  ;;  %v2185_v53 = vadd.f32 %v2175_v33, %v1896_v55  ;;  %v2134_v37 = vpop.f32.mrb[14].mxu0  ;;  %v2177_v41 = vpop.f32.mrb[46].mxu1 }
 0x4bf   : > { %v2190_v11 = vmul.f32 0.5, %v2182_v36  ;;  %v2186_v12 = vadd.f32 %v2134_v37, %v1897_v28  ;;  %v2188_v13 = vadd.f32 %v2177_v41, %v1899_v42  ;;  %v2136_v14 = vpop.f32.mrb[15].mxu0  ;;  %v2179_v15 = vpop.f32.mrb[47].mxu1  ;;  %vm2409_vm6 = vcmp.lt.s32.totalorder %v2397_v30, %v4079_v2 }
 0x4c0   : > { %v2198_v16 = vmul.f32 0.5, %v2183_v59  ;;  %v2187_v17 = vadd.f32 %v2136_v14, %v1898_v9  ;;  %v2189_v18 = vadd.f32 %v2179_v15, %v1900_v10  ;;  %v2208_v19 = vmul.f32 0.5, %v2185_v53 }
 0x4c1   : > { %3116 = vtanh.f32 %v2190_v11  ;;  %v2191_v43 = vmul.f32 0.5, %v2186_v12 }
 0x4c2   : > { %3118 = vtanh.f32 %v2198_v16  ;;  %v2199_v60 = vmul.f32 0.5, %v2187_v17  ;;  %v2209_v31 = vmul.f32 0.5, %v2189_v18  ;;  %v2400_v16 = vadd.s32 32, %v3803_v25 }
 0x4c3   : > { %3120 = vtanh.f32 %v2191_v43  ;;  %v2403_v17 = vadd.s32 56, %v3803_v25  ;;  %v2401_v18 = vadd.s32 40, %v3803_v25 }
 0x4c4   : > { %3122 = vtanh.f32 %v2184_v26  ;;  %vm2412_vm9 = vcmp.lt.s32.totalorder %v2400_v16, %v4079_v2 }
 0x4c5   : > { %3124 = vtanh.f32 %v2199_v60  ;;  %vm2415_vm10 = vcmp.lt.s32.totalorder %v2403_v17, %v4079_v2  ;;  %vm2413_vm11 = vcmp.lt.s32.totalorder %v2401_v18, %v4079_v2 }
 0x4c6   : > { %3126 = vtanh.f32 %v2188_v13 }
 0x4c7   : > { %3128 = vtanh.f32 %v2208_v19 }
 0x4c8   : > { %3130 = vtanh.f32 %v2209_v31 }
 0x4cb   : > { %v3117_v44 = vpop.eup %3116 }
 0x4cc   : > { %v3119_v52 = vpop.eup %3118  ;;  %v2194_v20 = vmul.f32 0.5, %v3117_v44 }
 0x4cd   : > { %v2202_v22 = vmul.f32 0.5, %v3119_v52  ;;  %v3121_v62 = vpop.eup %3120 }
 0x4ce   : > { %v2196_v49 = vadd.f32 0.5, %v2194_v20  ;;  %v3123_v58 = vpop.eup %3122  ;;  %v2195_v4 = vmul.f32 0.5, %v3121_v62 }
 0x4cf   : > { %v2204_v54 = vadd.f32 0.5, %v2202_v22  ;;  %v3125_v5 = vpop.eup %3124 }
 0x4d0   : > { %v2220_v7 = vmul.f32 %v3123_v58, %v2196_v49  ;;  %v2197_v29 = vadd.f32 0.5, %v2195_v4  ;;  %v2203_v23 = vmul.f32 0.5, %v3125_v5  ;;  %v3127_v38 = vpop.eup %3126 }
 0x4d1   : > { %v2218_v35 = vmul.f32 %v2204_v54, %v4026_v1  ;;  %v3129_v46 = vpop.eup %3128 }
 0x4d2   : > { %v2205_v40 = vadd.f32 0.5, %v2203_v23  ;;  %v2221_v57 = vmul.f32 %v3127_v38, %v2197_v29  ;;  %v2212_v24 = vmul.f32 0.5, %v3129_v46  ;;  %v3131_v45 = vpop.eup %3130 }
 0x4d3   : > { %v2222_v6 = vadd.f32 %v2220_v7, %v2218_v35  ;;  %v2213_v55 = vmul.f32 0.5, %v3131_v45 }
 0x4d4   : > { %v2219_v63 = vmul.f32 %v2205_v40, %v4031_v8 }
 0x4d5   : > { %3132 = vtanh.f32 %v2222_v6  ;;  %v2246_v27 = vsel %vm2240_vm1, %v2222_v6, %v4026_v1  ;;  %v2748_v1 = vld [vmem:[%s4170_s7] ss:$0 sm:$0xff]  ;;  %v2215_v10 = vadd.f32 0.5, %v2213_v55 }
 0x4d6   : > { %2248 = vst [vmem:[#allocation3] sm:$0xff] %v2246_v27  ;;  %v2223_v48 = vadd.f32 %v2221_v57, %v2219_v63 }
 0x4d8   : > { %3134 = vtanh.f32 %v2223_v48  ;;  %v2247_v56 = vsel %vm2241_vm2, %v2223_v48, %v4031_v8  ;;  %v2214_v8 = vadd.f32 0.5, %v2212_v24 }
 0x4d9   : > { %2249 = vst [vmem:[#allocation3 + $0x8] sm:$0xff] %v2247_v56 }
 0x4dc   : > { %v2807_v34 = vpop.f32.mrb[16].mxu0 }
 0x4dd   : > { %v2373_v3 = vadd.f32 %v2807_v34, %v2748_v1  ;;  %v2364_v32 = vpop.f32.mrb[17].mxu0 }
 0x4de   : > { %v2365_v36 = vadd.f32 %v2748_v1, %v2364_v32  ;;  %v2808_v26 = vpop.f32.mrb[18].mxu0 }
 0x4df   : > { %v3133_v39 = vpop.eup %3132  ;;  %v2434_v33 = vsel %vm2410_vm3, %v2373_v3, 0.0  ;;  %v2376_v28 = vadd.f32 %v2808_v26, %v2748_v1  ;;  %v2367_v42 = vpop.f32.mrb[19].mxu0 }
 0x4e0   : > { %v2226_v59 = vmul.f32 %v3133_v39, %v2214_v8  ;;  %2442 = vst [vmem:[%s3608_s27 + $0x10] sm:$0xff] %v2434_v33  ;;  %v2432_v53 = vsel %vm2408_vm4, %v2365_v36, 0.0  ;;  %v2368_v37 = vadd.f32 %v2748_v1, %v2367_v42 }
 0x4e1   : > { %2440 = vst [vmem:[%s3608_s27] sm:$0xff] %v2432_v53  ;;  %v2435_v41 = vsel %vm2411_vm5, %v2376_v28, 0.0 }
 0x4e2   : > { %v2242_v9 = vsel %vm2240_vm1, %v2226_v59, %v4035_v61  ;;  %2443 = vst [vmem:[%s3608_s27 + $0x18] sm:$0xff] %v2435_v41  ;;  %v2433_v11 = vsel %vm2409_vm6, %v2368_v37, 0.0  ;;  %v3135_v12 = vpop.eup %3134  ;;  %v2402_v61 = vadd.s32 48, %v3803_v25 }
 0x4e3   : > { %2244 = vst [vmem:[#allocation2] sm:$0xff] %v2242_v9  ;;  %2441 = vst [vmem:[%s3608_s27 + $0x8] sm:$0xff] %v2433_v11  ;;  %v2227_v13 = vmul.f32 %v3135_v12, %v2215_v10 }
 0x4e4   : > { %vm2414_vm8 = vcmp.lt.s32.totalorder %v2402_v61, %v4079_v2 }
 0x4e5   : > { %v2243_v14 = vsel %vm2241_vm2, %v2227_v13, %v4039_v0  ;;  %v2775_v15 = vpack.c.bf16 %v2227_v13, %v2226_v59 }
 0x4e6   : > { %2245 = vst [vmem:[#allocation2 + $0x8] sm:$0xff] %v2243_v14 }
 0x4e7   : > { %2810 = vmatmul.mubr.msk.bf16.gmra.mrb[20].mxu0 %vm2774_vm7, %v2775_v15 }
 0x5ba   : > { %v2811_v43 = vpop.f32.mrb[20].mxu0 }
 0x5bb   : > { %v2389_v60 = vadd.f32 %v2811_v43, %v2748_v1  ;;  %v2380_v0 = vpop.f32.mrb[21].mxu0 }
 0x5bc   : > { %v2381_v19 = vadd.f32 %v2748_v1, %v2380_v0  ;;  %v2812_v44 = vpop.f32.mrb[22].mxu0 }
 0x5bd   : > { %v2438_v52 = vsel %vm2414_vm8, %v2389_v60, 0.0  ;;  %v2392_v20 = vadd.f32 %v2812_v44, %v2748_v1  ;;  %v2383_v25 = vpop.f32.mrb[23].mxu0 }
 0x5be   : > { %2446 = vst [vmem:[%s3608_s27 + $0x30] sm:$0xff] %v2438_v52  ;;  %v2436_v22 = vsel %vm2412_vm9, %v2381_v19, 0.0  ;;  %v2384_v31 = vadd.f32 %v2748_v1, %v2383_v25 }
 0x5bf   : > { %2444 = vst [vmem:[%s3608_s27 + $0x20] sm:$0xff] %v2436_v22  ;;  %v2439_v62 = vsel %vm2415_vm10, %v2392_v20, 0.0 }
 0x5c0   : > { %2447 = vst [vmem:[%s3608_s27 + $0x38] sm:$0xff] %v2439_v62  ;;  %v2437_v49 = vsel %vm2413_vm11, %v2384_v31, 0.0 }
 0x5c1   : > { %2445 = vst [vmem:[%s3608_s27 + $0x28] sm:$0xff] %v2437_v49 }
 0x5c2   : > { %3263 = shalt.err (!%p3260_p10)
}
 0x5c3   : > { %s3264_s27 = scalar_lea.hbm %s4115_s0, 1024  ;;  %s3268_s19 = scalar_lea.hbm %s4171_s8, 3072 }
 0x5c4   : > { %p3265_p0 = scmp.ne.s32.totalorder %s4115_s0, %s3264_s27  ;;  %p3269_p13 = scmp.lt.u32.totalorder %s4115_s0, %s4171_s8 }
 0x5c5   : > { %p3270_p6 = scmp.lt.u32.totalorder %s3268_s19, %s3264_s27  ;;  %p3272_p3 = scmp.lt.u32.totalorder %s3264_s27, %s4115_s0 }
 0x5c6   : > { %p3266_p11 = pnand %p3265_p0, %p3535_p5 }
 0x5c7   : > { %p3271_p8 = por %p3270_p6, %p3269_p13 }
 0x5c8   : > { %p3267_p9 = pneg %p3266_p11 }
 0x5c9   : > { %p3273_p7 = por %p3272_p3, %p3271_p8 }
 0x5cb   : > { %p3274_p12 = pnand %p3273_p7, %p3267_p9 }
 0x5cd   : > { %3277 = shalt.err (!%p3274_p12)
}
 0x5ce   : > { %s3337_s20 = smov 128   ;;  %s3338_s22 = smov 8  }
 0x5cf   : > { %2827 = dma.vmem_to_hbm [thread:$0]  (%p3535_p5), %s4117_s18, 1024, %s4115_s0, %s2449_s26, %s3337_s20, %s3337_s20, %s3338_s22  }
 0x5d0 PF: > { %s4192_s21 = sld [smem:[#allocation21_spill]]  ;;  %p2854_p2 = scmp.ge.s32.totalorder %s3324_s10, 2 }
 0x5d1   : > { %s2477_s11 = sand.u32 1, %s3312_s29  }
 0x5d2   : > { %s2478_s28 = scalar_lea.sflag [#allocation10], %s2477_s11 }
 0x5d6   : > { %p4193_p1 = scmp.ne.s32.totalorder %s4192_s21, 0 }
 0x5d8   : > { %p2844_p4 = pnand %p2854_p2, %p4193_p1 }
 0x5da   : > { %3307 = dma.done.wait (!%p2844_p4), %s2478_s28, 1024  }
 0x5db   : > { %3309 = vsyncadd (!%p2844_p4), %s2478_s28, 4294966272  ;;  %p24_p10 = scmp.ge.s32.totalorder %s3521_s13, 5   ;;  %s4194_s29 = smov %s3316_s30 }
 0x5dc   : > { %s4195_s30 = smov %s3320_s9  ;;  %s4196_s9 = smov %s3531_s24 }
 0x5dd   : > { %s4197_s10 = smov %s3521_s13  ;;  %26 = sbr.rel (!%p24_p10) target bundleno = 9 (0x9), region = 116 }
 0x5e4   :  { %2483 = vsyncpa [#allocation9], 1 }
 0x5e5   :  { %2485 = vsyncpa [#allocation9 + $0x1], 1 }
 0x5e6   :  { %2486 = vsyncpa [#allocation12], 1 }
 0x5e7   :  { %2487 = vsyncpa [#allocation15], 1 }
 0x5e8   :  { %2488 = vsyncpa [#allocation10], 1 }
 0x5e9   :  { %2490 = vsyncpa [#allocation10 + $0x1], 1 }

</bundles_post_ra>
